<compile_context>
chip_gen: v7x
topology: tpu7x:2x2x1
jax: 0.10.0
libtpu: 0.0.40
codegen_flags: <defaults>
</compile_context>

<pallas_src>
import functools
import numpy as np
import jax
import jax.numpy as jnp
from jax.experimental import pallas as pl
from jax.experimental.pallas import tpu as pltpu


# ---------------------------------------------------------------------------
# Pallas kernels
# ---------------------------------------------------------------------------
def _mm_bias_act_kernel(w_ref, a_ref, b_ref, o_ref, *, act):
    """o = act(w @ a + b) for one (N, tm) output tile.  w:(N,K) a:(K,tm) b:(N,1)."""
    acc = jnp.dot(w_ref[...], a_ref[...], preferred_element_type=jnp.float32)
    acc = acc + b_ref[...]
    if act == "relu":
        acc = jnp.maximum(acc, 0.0)
    elif act == "tanh":
        acc = jnp.tanh(acc)
    o_ref[...] = acc.astype(o_ref.dtype)


def _pick_tm(M, max_groups=16):
    """M tile: multiple of 128, <= 2048, and >= 2 grid blocks whenever M > 128."""
    nb = -(-M // 128)                       # number of 128-lane groups
    if nb <= 1:
        return 128
    blocks = max(2, -(-nb // max_groups))   # >=2 blocks for megacore sharding
    return 128 * (-(-nb // blocks))


def matmul_bias_act(wT, a, bias, act="none"):
    """act(wT @ a + bias[:, None]) with a Pallas TPU kernel.

    wT: (N, K), a: (K, M), bias: (N,).  Returns (N, M) float32.
    Operands go to the MXU in bf16; accumulation and the epilogue stay f32.
    Output tiles are (N, tm) with tm a multiple of 128 -> lane-dense stores.
    """
    N, K = wT.shape
    K2, M = a.shape
    assert K == K2
    tm = _pick_tm(M)
    Mp = pl.cdiv(M, tm) * tm
    a16 = a.astype(jnp.bfloat16)
    if Mp != M:                              # skip no-op pads
        a16 = jnp.pad(a16, ((0, 0), (0, Mp - M)))
    w16 = wT.astype(jnp.bfloat16)
    b2 = bias.reshape(N, 1).astype(jnp.float32)
    out = pl.pallas_call(
        functools.partial(_mm_bias_act_kernel, act=act),
        out_shape=jax.ShapeDtypeStruct((N, Mp), jnp.float32),
        grid=(Mp // tm,),
        in_specs=[
            pl.BlockSpec((N, K), lambda i: (0, 0)),
            pl.BlockSpec((K, tm), lambda i: (0, i)),
            pl.BlockSpec((N, 1), lambda i: (0, 0)),
        ],
        out_specs=pl.BlockSpec((N, tm), lambda i: (0, i)),
        compiler_params=pltpu.CompilerParams(dimension_semantics=("parallel",)),
    )(w16, a16, b2)
    return out if Mp == M else out[:, :M]


def _maxpool_relu_kernel(w_ref, o_ref, *, kk):
    w = w_ref[...]                           # (kk, C*B, OH*OW)
    acc = w[0]
    for t in range(1, kk):
        acc = jnp.maximum(acc, w[t])
    # PyTorch applies ReLU right after each MaxPool; fuse it here.
    o_ref[...] = jnp.maximum(acc, 0.0)


def maxpool2d_relu(x, k, s):
    """MaxPool2d(k, s) + ReLU on a channel-major (C, B, H, W) tensor."""
    C, B, H, W = x.shape
    OH = (H - k) // s + 1
    OW = (W - k) // s + 1
    wins = []
    for i in range(k):
        for j in range(k):
            wins.append(
                jax.lax.slice(
                    x, (0, 0, i, j),
                    (C, B, i + s * (OH - 1) + 1, j + s * (OW - 1) + 1),
                    (1, 1, s, s)))
    wcat = jnp.stack(wins, axis=0).reshape(k * k, C * B, OH * OW)
    out = pl.pallas_call(
        functools.partial(_maxpool_relu_kernel, kk=k * k),
        out_shape=jax.ShapeDtypeStruct((C * B, OH * OW), x.dtype),
        grid=(1,),
        in_specs=[pl.BlockSpec((k * k, C * B, OH * OW), lambda i: (0, 0, 0))],
        out_specs=pl.BlockSpec((C * B, OH * OW), lambda i: (0, 0)),
    )(wcat)
    return out.reshape(C, B, OH, OW)


# ---------------------------------------------------------------------------
# Conv / ConvTranspose built on the Pallas matmul kernel
# ---------------------------------------------------------------------------
def conv2d(x, w, b, stride, pad, act):
    """Conv2d on channel-major x: (Cin, B, H, W); w: (Cout, Cin, KH, KW) (PyTorch)."""
    Cout, Cin, KH, KW = w.shape
    _, B, H, W = x.shape
    xp = jnp.pad(x, ((0, 0), (0, 0), (pad, pad), (pad, pad))) if pad else x
    Hp, Wp = H + 2 * pad, W + 2 * pad
    OH = (Hp - KH) // stride + 1
    OW = (Wp - KW) // stride + 1
    cols = []
    for i in range(KH):
        for j in range(KW):
            cols.append(
                jax.lax.slice(
                    xp, (0, 0, i, j),
                    (Cin, B, i + stride * (OH - 1) + 1, j + stride * (OW - 1) + 1),
                    (1, 1, stride, stride)))
    # TODO(synk): patch extraction (im2col) stays host-side glue; it is not fused
    # into the matmul kernel (matrices are <= ~2.4 MB bf16 at these shapes).
    patches = jnp.stack(cols, axis=1).reshape(Cin * KH * KW, B * OH * OW)
    wT = w.reshape(Cout, Cin * KH * KW)              # rows: cout, cols: (cin, ky, kx)
    out = matmul_bias_act(wT, patches, b, act=act)   # (Cout, B*OH*OW) lane-dense
    return out.reshape(Cout, B, OH, OW)


def conv_transpose2d(x, wt, b, stride, pad, act):
    """ConvTranspose2d via sub-pixel (phase) decomposition -- no zero dilation.

    x: (Cin, B, H, W) channel-major; wt: (Cin, Cout, KH, KW) (PyTorch layout).
    """
    Cin, Cout, KH, KW = wt.shape
    _, B, H, W = x.shape
    s = stride
    A = -(-KH // s)                    # taps per output phase (square kernel/stride)
    Ks = A * s
    # Phase weight matrix: rows (cout, ry, rx), cols (cin, ay, ax):
    #   W[(cout,ry,rx),(cin,ay,ax)] = wt[cin, cout, s*ay+ry, s*ax+rx]  (0 beyond KH).
    wp = jnp.pad(wt, ((0, 0), (0, 0), (0, Ks - KH), (0, Ks - KW)))
    wp = wp.reshape(Cin, Cout, A, s, A, s).transpose(1, 3, 5, 0, 2, 4)
    wT = wp.reshape(Cout * s * s, Cin * A * A)
    b_rep = jnp.repeat(b, s * s)       # one bias per (cout, ry, rx) output row

    # Patch matrix for the equivalent stride-1, AxA-tap convolution.
    Hj, Wj = H + A - 1, W + A - 1
    xp = jnp.pad(x, ((0, 0), (0, 0), (A - 1, A - 1), (A - 1, A - 1))) if A > 1 else x
    taps = []
    for ay in range(A):
        for ax in range(A):
            taps.append(
                jax.lax.slice(
                    xp, (0, 0, A - 1 - ay, A - 1 - ax),
                    (Cin, B, A - 1 - ay + Hj, A - 1 - ax + Wj)))
    patches = jnp.stack(taps, axis=1).reshape(Cin * A * A, B * Hj * Wj)

    full = matmul_bias_act(wT, patches, b_rep, act=act)        # (Cout*s*s, B*Hj*Wj)
    # Pixel shuffle: (cout, ry, rx, b, jy, jx) -> (cout, b, jy, ry, jx, rx), then crop.
    full = full.reshape(Cout, s, s, B, Hj, Wj).transpose(0, 3, 4, 1, 5, 2)
    full = full.reshape(Cout, B, s * Hj, s * Wj)
    OH = (H - 1) * s - 2 * pad + KH
    OW = (W - 1) * s - 2 * pad + KW
    return full[:, :, pad:pad + OH, pad:pad + OW]


# ---------------------------------------------------------------------------
# Model: parameters + forward
# ---------------------------------------------------------------------------
def init_params(key):
    def uinit(k, shape, fan_in):
        bound = 1.0 / np.sqrt(fan_in)
        return jax.random.uniform(k, shape, jnp.float32, -bound, bound)

    ks = jax.random.split(key, 12)
    p = {}
    p["c1_w"] = uinit(ks[0], (16, 3, 8, 8), 3 * 8 * 8)
    p["c1_b"] = uinit(ks[1], (16,), 3 * 8 * 8)
    p["c2_w"] = uinit(ks[2], (8, 16, 4, 4), 16 * 4 * 4)
    p["c2_b"] = uinit(ks[3], (8,), 16 * 4 * 4)
    p["t1_w"] = uinit(ks[4], (8, 16, 5, 5), 16 * 5 * 5)
    p["t1_b"] = uinit(ks[5], (16,), 16 * 5 * 5)
    p["t2_w"] = uinit(ks[6], (16, 8, 2, 2), 8 * 2 * 2)
    p["t2_b"] = uinit(ks[7], (8,), 8 * 2 * 2)
    p["t3_w"] = uinit(ks[8], (8, 3, 6, 6), 3 * 6 * 6)
    p["t3_b"] = uinit(ks[9], (3,), 3 * 6 * 6)
    p["fc_w"] = uinit(ks[10], (9, 36 * 8), 36 * 8)
    p["fc_b"] = uinit(ks[11], (9,), 36 * 8)
    return p


def encoder(x, p):
    y = conv2d(x, p["c1_w"], p["c1_b"], stride=4, pad=2, act="relu")   # (16,B,56,56)
    y = maxpool2d_relu(y, 2, 2)                                        # (16,B,28,28)
    y = conv2d(y, p["c2_w"], p["c2_b"], stride=2, pad=1, act="relu")   # ( 8,B,14,14)
    y = maxpool2d_relu(y, 4, 2)                                        # ( 8,B, 6, 6)
    return y


def decoder(z, p):
    y = conv_transpose2d(z, p["t1_w"], p["t1_b"], stride=5, pad=1, act="relu")  # (16,B,28,28)
    y = conv_transpose2d(y, p["t2_w"], p["t2_b"], stride=2, pad=0, act="relu")  # ( 8,B,56,56)
    y = conv_transpose2d(y, p["t3_w"], p["t3_b"], stride=4, pad=1, act="tanh")  # ( 3,B,224,224)
    return y


def autoencoder_forward(x_nchw, p):
    # Channel-major (C, B, H, W) internally: the Pallas matmuls emit (Cout, B*OH*OW)
    # directly, so no per-layer NHWC<->NCHW transposes are needed.
    B = x_nchw.shape[0]
    x = jnp.transpose(x_nchw, (1, 0, 2, 3))
    # The torch model runs self.encoder(x) twice (inside self.autoencoder and for
    # self.fc); the results are identical, so compute the encoder once.
    z = encoder(x, p)                                        # (8, B, 6, 6)
    dec = jnp.transpose(decoder(z, p), (1, 0, 2, 3))         # (B, 3, 224, 224)
    flat = jnp.transpose(z, (1, 0, 2, 3)).reshape(B, -1)     # nn.Flatten (NCHW) -> (B, 288)
    # fc is a Bx288x9 gemv -- a pallas_call launch costs more than it saves.
    out = flat @ p["fc_w"].T + p["fc_b"]                     # (B, 9)
    return dec, out


if __name__ == "__main__":
    key = jax.random.PRNGKey(0)
    pkey, xkey = jax.random.split(key)
    params = init_params(pkey)
    # Spatial size 224 is forced by the hard-coded Linear(36*8, 9):
    # encoder(224x224) -> (B, 8, 6, 6) -> 288 features.  Batch kept small (2).
    x = jax.random.normal(xkey, (2, 3, 224, 224), jnp.float32)

    fwd = jax.jit(lambda xx: autoencoder_forward(xx, params))
    dec, out = fwd(x)
    jax.block_until_ready((dec, out))

    assert dec.shape == (2, 3, 224, 224) and dec.dtype == jnp.float32
    assert out.shape == (2, 9) and out.dtype == jnp.float32
    assert bool(jnp.all(jnp.isfinite(dec))) and bool(jnp.all(jnp.isfinite(out)))
    assert bool(jnp.all(jnp.abs(dec) <= 1.0))   # tanh output range sanity check
    print("KERNEL_OK")
</pallas_src>

<mosaic_0001>
module attributes {stable_mosaic.version = 11 : i64} {
  func.func @_mm_bias_act_kernel(%arg0: i32, %arg1: memref<16x192xbf16, #tpu.memory_space<vmem>>, %arg2: memref<192x1664xbf16, #tpu.memory_space<vmem>>, %arg3: memref<16x1xf32, #tpu.memory_space<vmem>>, %arg4: memref<16x1664xf32, #tpu.memory_space<vmem>>) attributes {dimension_semantics = [#tpu.dimension_semantics<parallel>], iteration_bounds = array<i64: 4>, scalar_prefetch = 0 : i64, scratch_operands = 0 : i64, tpu.core_type = #tpu.core_type<tc>, window_params = [{pipeline_mode = #tpu.pipeline_mode<synchronous>, transform_indices = @transform_0, window_bounds = array<i64: 16, 192>}, {transform_indices = @transform_1, window_bounds = array<i64: 192, 1664>}, {pipeline_mode = #tpu.pipeline_mode<synchronous>, transform_indices = @transform_2, window_bounds = array<i64: 16, 1>}, {transform_indices = @transform_3, window_bounds = array<i64: 16, 1664>}]} {
    %c0 = arith.constant 0 : index
    %c0_0 = arith.constant 0 : index
    %0 = vector.load %arg1[%c0, %c0_0] : memref<16x192xbf16, #tpu.memory_space<vmem>>, vector<16x192xbf16>
    %c0_1 = arith.constant 0 : index
    %c0_2 = arith.constant 0 : index
    %1 = vector.load %arg2[%c0_1, %c0_2] : memref<192x1664xbf16, #tpu.memory_space<vmem>>, vector<192x1664xbf16>
    %cst = arith.constant dense<0.000000e+00> : vector<16x1664xf32>
    %2 = tpu.matmul %0, %1, %cst {dimension_numbers = #tpu.dot_dimension_numbers<[1], [0], [0], [1], [0, 0, 1, 1], [], []>} : vector<16x192xbf16>, vector<192x1664xbf16>, vector<16x1664xf32> -> vector<16x1664xf32>
    %c0_3 = arith.constant 0 : index
    %c0_4 = arith.constant 0 : index
    %3 = vector.load %arg3[%c0_3, %c0_4] : memref<16x1xf32, #tpu.memory_space<vmem>>, vector<16x1xf32>
    %4 = vector.broadcast %3 : vector<16x1xf32> to vector<16x1664xf32>
    %5 = arith.addf %2, %4 : vector<16x1664xf32>
    %cst_5 = arith.constant 0.000000e+00 : f32
    %6 = vector.broadcast %cst_5 : f32 to vector<16x1664xf32>
    %7 = arith.maximumf %5, %6 : vector<16x1664xf32>
    %c0_6 = arith.constant 0 : index
    %c0_7 = arith.constant 0 : index
    %8 = vector.load %arg4[%c0_6, %c0_7] : memref<16x1664xf32, #tpu.memory_space<vmem>>, vector<16x1664xf32>
    tpu.vector_store %arg4[%c0_6, %c0_7], %7 {strides = array<i32>} : memref<16x1664xf32, #tpu.memory_space<vmem>>, vector<16x1664xf32>,
    return
  }
  func.func @transform_0(%arg0: i32) -> (i32, i32) {
    %c0_i32 = arith.constant 0 : i32
    %c0_i32_0 = arith.constant 0 : i32
    %c0_i32_1 = arith.constant 0 : i32
    return %c0_i32, %c0_i32_0 : i32, i32
  }
  func.func @transform_1(%arg0: i32) -> (i32, i32) {
    %c0_i32 = arith.constant 0 : i32
    %c0_i32_0 = arith.constant 0 : i32
    return %c0_i32, %arg0 : i32, i32
  }
  func.func @transform_2(%arg0: i32) -> (i32, i32) {
    %c0_i32 = arith.constant 0 : i32
    %c0_i32_0 = arith.constant 0 : i32
    %c0_i32_1 = arith.constant 0 : i32
    return %c0_i32, %c0_i32_0 : i32, i32
  }
  func.func @transform_3(%arg0: i32) -> (i32, i32) {
    %c0_i32 = arith.constant 0 : i32
    %c0_i32_0 = arith.constant 0 : i32
    return %c0_i32, %arg0 : i32, i32
  }
}

module attributes {stable_mosaic.version = 11 : i64} {
  func.func @_maxpool_relu_kernel(%arg0: i32, %arg1: memref<4x32x784xf32, #tpu.memory_space<vmem>>, %arg2: memref<32x784xf32, #tpu.memory_space<vmem>>) attributes {dimension_semantics = [#tpu.dimension_semantics<arbitrary>], iteration_bounds = array<i64: 1>, scalar_prefetch = 0 : i64, scratch_operands = 0 : i64, tpu.core_type = #tpu.core_type<tc>, window_params = [{pipeline_mode = #tpu.pipeline_mode<synchronous>, transform_indices = @transform_0, window_bounds = array<i64: 4, 32, 784>}, {pipeline_mode = #tpu.pipeline_mode<synchronous>, transform_indices = @transform_1, window_bounds = array<i64: 32, 784>}]} {
    %c0 = arith.constant 0 : index
    %c0_0 = arith.constant 0 : index
    %c0_1 = arith.constant 0 : index
    %0 = vector.load %arg1[%c0, %c0_0, %c0_1] : memref<4x32x784xf32, #tpu.memory_space<vmem>>, vector<4x32x784xf32>
    %1 = vector.extract_strided_slice %0 {offsets = [0, 0, 0], sizes = [1, 32, 784], strides = [1, 1, 1]} : vector<4x32x784xf32> to vector<1x32x784xf32>
    %2 = vector.shape_cast %1 : vector<1x32x784xf32> to vector<32x784xf32>
    %3 = vector.extract_strided_slice %0 {offsets = [1, 0, 0], sizes = [1, 32, 784], strides = [1, 1, 1]} : vector<4x32x784xf32> to vector<1x32x784xf32>
    %4 = vector.shape_cast %3 : vector<1x32x784xf32> to vector<32x784xf32>
    %5 = arith.maximumf %2, %4 : vector<32x784xf32>
    %6 = vector.extract_strided_slice %0 {offsets = [2, 0, 0], sizes = [1, 32, 784], strides = [1, 1, 1]} : vector<4x32x784xf32> to vector<1x32x784xf32>
    %7 = vector.shape_cast %6 : vector<1x32x784xf32> to vector<32x784xf32>
    %8 = arith.maximumf %5, %7 : vector<32x784xf32>
    %9 = vector.extract_strided_slice %0 {offsets = [3, 0, 0], sizes = [1, 32, 784], strides = [1, 1, 1]} : vector<4x32x784xf32> to vector<1x32x784xf32>
    %10 = vector.shape_cast %9 : vector<1x32x784xf32> to vector<32x784xf32>
    %11 = arith.maximumf %8, %10 : vector<32x784xf32>
    %cst = arith.constant 0.000000e+00 : f32
    %12 = vector.broadcast %cst : f32 to vector<32x784xf32>
    %13 = arith.maximumf %11, %12 : vector<32x784xf32>
    %c0_2 = arith.constant 0 : index
    %c0_3 = arith.constant 0 : index
    %14 = vector.load %arg2[%c0_2, %c0_3] : memref<32x784xf32, #tpu.memory_space<vmem>>, vector<32x784xf32>
    tpu.vector_store %arg2[%c0_2, %c0_3], %13 {strides = array<i32>} : memref<32x784xf32, #tpu.memory_space<vmem>>, vector<32x784xf32>,
    return
  }
  func.func @transform_0(%arg0: i32) -> (i32, i32, i32) {
    %c0_i32 = arith.constant 0 : i32
    %c0_i32_0 = arith.constant 0 : i32
    %c0_i32_1 = arith.constant 0 : i32
    %c0_i32_2 = arith.constant 0 : i32
    return %c0_i32, %c0_i32_0, %c0_i32_1 : i32, i32, i32
  }
  func.func @transform_1(%arg0: i32) -> (i32, i32) {
    %c0_i32 = arith.constant 0 : i32
    %c0_i32_0 = arith.constant 0 : i32
    %c0_i32_1 = arith.constant 0 : i32
    return %c0_i32, %c0_i32_0 : i32, i32
  }
}

module attributes {stable_mosaic.version = 11 : i64} {
  func.func @_mm_bias_act_kernel(%arg0: i32, %arg1: memref<8x256xbf16, #tpu.memory_space<vmem>>, %arg2: memref<256x256xbf16, #tpu.memory_space<vmem>>, %arg3: memref<8x1xf32, #tpu.memory_space<vmem>>, %arg4: memref<8x256xf32, #tpu.memory_space<vmem>>) attributes {dimension_semantics = [#tpu.dimension_semantics<parallel>], iteration_bounds = array<i64: 2>, scalar_prefetch = 0 : i64, scratch_operands = 0 : i64, tpu.core_type = #tpu.core_type<tc>, window_params = [{pipeline_mode = #tpu.pipeline_mode<synchronous>, transform_indices = @transform_0, window_bounds = array<i64: 8, 256>}, {transform_indices = @transform_1, window_bounds = array<i64: 256, 256>}, {pipeline_mode = #tpu.pipeline_mode<synchronous>, transform_indices = @transform_2, window_bounds = array<i64: 8, 1>}, {transform_indices = @transform_3, window_bounds = array<i64: 8, 256>}]} {
    %c0 = arith.constant 0 : index
    %c0_0 = arith.constant 0 : index
    %0 = vector.load %arg1[%c0, %c0_0] : memref<8x256xbf16, #tpu.memory_space<vmem>>, vector<8x256xbf16>
    %c0_1 = arith.constant 0 : index
    %c0_2 = arith.constant 0 : index
    %1 = vector.load %arg2[%c0_1, %c0_2] : memref<256x256xbf16, #tpu.memory_space<vmem>>, vector<256x256xbf16>
    %cst = arith.constant dense<0.000000e+00> : vector<8x256xf32>
    %2 = tpu.matmul %0, %1, %cst {dimension_numbers = #tpu.dot_dimension_numbers<[1], [0], [0], [1], [0, 0, 1, 1], [], []>} : vector<8x256xbf16>, vector<256x256xbf16>, vector<8x256xf32> -> vector<8x256xf32>
    %c0_3 = arith.constant 0 : index
    %c0_4 = arith.constant 0 : index
    %3 = vector.load %arg3[%c0_3, %c0_4] : memref<8x1xf32, #tpu.memory_space<vmem>>, vector<8x1xf32>
    %4 = vector.broadcast %3 : vector<8x1xf32> to vector<8x256xf32>
    %5 = arith.addf %2, %4 : vector<8x256xf32>
    %cst_5 = arith.constant 0.000000e+00 : f32
    %6 = vector.broadcast %cst_5 : f32 to vector<8x256xf32>
    %7 = arith.maximumf %5, %6 : vector<8x256xf32>
    %c0_6 = arith.constant 0 : index
    %c0_7 = arith.constant 0 : index
    %8 = vector.load %arg4[%c0_6, %c0_7] : memref<8x256xf32, #tpu.memory_space<vmem>>, vector<8x256xf32>
    tpu.vector_store %arg4[%c0_6, %c0_7], %7 {strides = array<i32>} : memref<8x256xf32, #tpu.memory_space<vmem>>, vector<8x256xf32>,
    return
  }
  func.func @transform_0(%arg0: i32) -> (i32, i32) {
    %c0_i32 = arith.constant 0 : i32
    %c0_i32_0 = arith.constant 0 : i32
    %c0_i32_1 = arith.constant 0 : i32
    return %c0_i32, %c0_i32_0 : i32, i32
  }
  func.func @transform_1(%arg0: i32) -> (i32, i32) {
    %c0_i32 = arith.constant 0 : i32
    %c0_i32_0 = arith.constant 0 : i32
    return %c0_i32, %arg0 : i32, i32
  }
  func.func @transform_2(%arg0: i32) -> (i32, i32) {
    %c0_i32 = arith.constant 0 : i32
    %c0_i32_0 = arith.constant 0 : i32
    %c0_i32_1 = arith.constant 0 : i32
    return %c0_i32, %c0_i32_0 : i32, i32
  }
  func.func @transform_3(%arg0: i32) -> (i32, i32) {
    %c0_i32 = arith.constant 0 : i32
    %c0_i32_0 = arith.constant 0 : i32
    return %c0_i32, %arg0 : i32, i32
  }
}

module attributes {stable_mosaic.version = 11 : i64} {
  func.func @_maxpool_relu_kernel(%arg0: i32, %arg1: memref<16x16x36xf32, #tpu.memory_space<vmem>>, %arg2: memref<16x36xf32, #tpu.memory_space<vmem>>) attributes {dimension_semantics = [#tpu.dimension_semantics<arbitrary>], iteration_bounds = array<i64: 1>, scalar_prefetch = 0 : i64, scratch_operands = 0 : i64, tpu.core_type = #tpu.core_type<tc>, window_params = [{pipeline_mode = #tpu.pipeline_mode<synchronous>, transform_indices = @transform_0, window_bounds = array<i64: 16, 16, 36>}, {pipeline_mode = #tpu.pipeline_mode<synchronous>, transform_indices = @transform_1, window_bounds = array<i64: 16, 36>}]} {
    %c0 = arith.constant 0 : index
    %c0_0 = arith.constant 0 : index
    %c0_1 = arith.constant 0 : index
    %0 = vector.load %arg1[%c0, %c0_0, %c0_1] : memref<16x16x36xf32, #tpu.memory_space<vmem>>, vector<16x16x36xf32>
    %1 = vector.extract_strided_slice %0 {offsets = [0, 0, 0], sizes = [1, 16, 36], strides = [1, 1, 1]} : vector<16x16x36xf32> to vector<1x16x36xf32>
    %2 = vector.shape_cast %1 : vector<1x16x36xf32> to vector<16x36xf32>
    %3 = vector.extract_strided_slice %0 {offsets = [1, 0, 0], sizes = [1, 16, 36], strides = [1, 1, 1]} : vector<16x16x36xf32> to vector<1x16x36xf32>
    %4 = vector.shape_cast %3 : vector<1x16x36xf32> to vector<16x36xf32>
    %5 = arith.maximumf %2, %4 : vector<16x36xf32>
    %6 = vector.extract_strided_slice %0 {offsets = [2, 0, 0], sizes = [1, 16, 36], strides = [1, 1, 1]} : vector<16x16x36xf32> to vector<1x16x36xf32>
    %7 = vector.shape_cast %6 : vector<1x16x36xf32> to vector<16x36xf32>
    %8 = arith.maximumf %5, %7 : vector<16x36xf32>
    %9 = vector.extract_strided_slice %0 {offsets = [3, 0, 0], sizes = [1, 16, 36], strides = [1, 1, 1]} : vector<16x16x36xf32> to vector<1x16x36xf32>
    %10 = vector.shape_cast %9 : vector<1x16x36xf32> to vector<16x36xf32>
    %11 = arith.maximumf %8, %10 : vector<16x36xf32>
    %12 = vector.extract_strided_slice %0 {offsets = [4, 0, 0], sizes = [1, 16, 36], strides = [1, 1, 1]} : vector<16x16x36xf32> to vector<1x16x36xf32>
    %13 = vector.shape_cast %12 : vector<1x16x36xf32> to vector<16x36xf32>
    %14 = arith.maximumf %11, %13 : vector<16x36xf32>
    %15 = vector.extract_strided_slice %0 {offsets = [5, 0, 0], sizes = [1, 16, 36], strides = [1, 1, 1]} : vector<16x16x36xf32> to vector<1x16x36xf32>
    %16 = vector.shape_cast %15 : vector<1x16x36xf32> to vector<16x36xf32>
    %17 = arith.maximumf %14, %16 : vector<16x36xf32>
    %18 = vector.extract_strided_slice %0 {offsets = [6, 0, 0], sizes = [1, 16, 36], strides = [1, 1, 1]} : vector<16x16x36xf32> to vector<1x16x36xf32>
    %19 = vector.shape_cast %18 : vector<1x16x36xf32> to vector<16x36xf32>
    %20 = arith.maximumf %17, %19 : vector<16x36xf32>
    %21 = vector.extract_strided_slice %0 {offsets = [7, 0, 0], sizes = [1, 16, 36], strides = [1, 1, 1]} : vector<16x16x36xf32> to vector<1x16x36xf32>
    %22 = vector.shape_cast %21 : vector<1x16x36xf32> to vector<16x36xf32>
    %23 = arith.maximumf %20, %22 : vector<16x36xf32>
    %24 = vector.extract_strided_slice %0 {offsets = [8, 0, 0], sizes = [1, 16, 36], strides = [1, 1, 1]} : vector<16x16x36xf32> to vector<1x16x36xf32>
    %25 = vector.shape_cast %24 : vector<1x16x36xf32> to vector<16x36xf32>
    %26 = arith.maximumf %23, %25 : vector<16x36xf32>
    %27 = vector.extract_strided_slice %0 {offsets = [9, 0, 0], sizes = [1, 16, 36], strides = [1, 1, 1]} : vector<16x16x36xf32> to vector<1x16x36xf32>
    %28 = vector.shape_cast %27 : vector<1x16x36xf32> to vector<16x36xf32>
    %29 = arith.maximumf %26, %28 : vector<16x36xf32>
    %30 = vector.extract_strided_slice %0 {offsets = [10, 0, 0], sizes = [1, 16, 36], strides = [1, 1, 1]} : vector<16x16x36xf32> to vector<1x16x36xf32>
    %31 = vector.shape_cast %30 : vector<1x16x36xf32> to vector<16x36xf32>
    %32 = arith.maximumf %29, %31 : vector<16x36xf32>
    %33 = vector.extract_strided_slice %0 {offsets = [11, 0, 0], sizes = [1, 16, 36], strides = [1, 1, 1]} : vector<16x16x36xf32> to vector<1x16x36xf32>
    %34 = vector.shape_cast %33 : vector<1x16x36xf32> to vector<16x36xf32>
    %35 = arith.maximumf %32, %34 : vector<16x36xf32>
    %36 = vector.extract_strided_slice %0 {offsets = [12, 0, 0], sizes = [1, 16, 36], strides = [1, 1, 1]} : vector<16x16x36xf32> to vector<1x16x36xf32>
    %37 = vector.shape_cast %36 : vector<1x16x36xf32> to vector<16x36xf32>
    %38 = arith.maximumf %35, %37 : vector<16x36xf32>
    %39 = vector.extract_strided_slice %0 {offsets = [13, 0, 0], sizes = [1, 16, 36], strides = [1, 1, 1]} : vector<16x16x36xf32> to vector<1x16x36xf32>
    %40 = vector.shape_cast %39 : vector<1x16x36xf32> to vector<16x36xf32>
    %41 = arith.maximumf %38, %40 : vector<16x36xf32>
    %42 = vector.extract_strided_slice %0 {offsets = [14, 0, 0], sizes = [1, 16, 36], strides = [1, 1, 1]} : vector<16x16x36xf32> to vector<1x16x36xf32>
    %43 = vector.shape_cast %42 : vector<1x16x36xf32> to vector<16x36xf32>
    %44 = arith.maximumf %41, %43 : vector<16x36xf32>
    %45 = vector.extract_strided_slice %0 {offsets = [15, 0, 0], sizes = [1, 16, 36], strides = [1, 1, 1]} : vector<16x16x36xf32> to vector<1x16x36xf32>
    %46 = vector.shape_cast %45 : vector<1x16x36xf32> to vector<16x36xf32>
    %47 = arith.maximumf %44, %46 : vector<16x36xf32>
    %cst = arith.constant 0.000000e+00 : f32
    %48 = vector.broadcast %cst : f32 to vector<16x36xf32>
    %49 = arith.maximumf %47, %48 : vector<16x36xf32>
    %c0_2 = arith.constant 0 : index
    %c0_3 = arith.constant 0 : index
    %50 = vector.load %arg2[%c0_2, %c0_3] : memref<16x36xf32, #tpu.memory_space<vmem>>, vector<16x36xf32>
    tpu.vector_store %arg2[%c0_2, %c0_3], %49 {strides = array<i32>} : memref<16x36xf32, #tpu.memory_space<vmem>>, vector<16x36xf32>,
    return
  }
  func.func @transform_0(%arg0: i32) -> (i32, i32, i32) {
    %c0_i32 = arith.constant 0 : i32
    %c0_i32_0 = arith.constant 0 : i32
    %c0_i32_1 = arith.constant 0 : i32
    %c0_i32_2 = arith.constant 0 : i32
    return %c0_i32, %c0_i32_0, %c0_i32_1 : i32, i32, i32
  }
  func.func @transform_1(%arg0: i32) -> (i32, i32) {
    %c0_i32 = arith.constant 0 : i32
    %c0_i32_0 = arith.constant 0 : i32
    %c0_i32_1 = arith.constant 0 : i32
    return %c0_i32, %c0_i32_0 : i32, i32
  }
}

module attributes {stable_mosaic.version = 11 : i64} {
  func.func @_mm_bias_act_kernel(%arg0: i32, %arg1: memref<400x8xbf16, #tpu.memory_space<vmem>>, %arg2: memref<8x128xbf16, #tpu.memory_space<vmem>>, %arg3: memref<400x1xf32, #tpu.memory_space<vmem>>, %arg4: memref<400x128xf32, #tpu.memory_space<vmem>>) attributes {dimension_semantics = [#tpu.dimension_semantics<parallel>], iteration_bounds = array<i64: 1>, scalar_prefetch = 0 : i64, scratch_operands = 0 : i64, tpu.core_type = #tpu.core_type<tc>, window_params = [{pipeline_mode = #tpu.pipeline_mode<synchronous>, transform_indices = @transform_0, window_bounds = array<i64: 400, 8>}, {transform_indices = @transform_1, window_bounds = array<i64: 8, 128>}, {pipeline_mode = #tpu.pipeline_mode<synchronous>, transform_indices = @transform_2, window_bounds = array<i64: 400, 1>}, {transform_indices = @transform_3, window_bounds = array<i64: 400, 128>}]} {
    %c0 = arith.constant 0 : index
    %c0_0 = arith.constant 0 : index
    %0 = vector.load %arg1[%c0, %c0_0] : memref<400x8xbf16, #tpu.memory_space<vmem>>, vector<400x8xbf16>
    %c0_1 = arith.constant 0 : index
    %c0_2 = arith.constant 0 : index
    %1 = vector.load %arg2[%c0_1, %c0_2] : memref<8x128xbf16, #tpu.memory_space<vmem>>, vector<8x128xbf16>
    %cst = arith.constant dense<0.000000e+00> : vector<400x128xf32>
    %2 = tpu.matmul %0, %1, %cst {dimension_numbers = #tpu.dot_dimension_numbers<[1], [0], [0], [1], [0, 0, 1, 1], [], []>} : vector<400x8xbf16>, vector<8x128xbf16>, vector<400x128xf32> -> vector<400x128xf32>
    %c0_3 = arith.constant 0 : index
    %c0_4 = arith.constant 0 : index
    %3 = vector.load %arg3[%c0_3, %c0_4] : memref<400x1xf32, #tpu.memory_space<vmem>>, vector<400x1xf32>
    %4 = vector.broadcast %3 : vector<400x1xf32> to vector<400x128xf32>
    %5 = arith.addf %2, %4 : vector<400x128xf32>
    %cst_5 = arith.constant 0.000000e+00 : f32
    %6 = vector.broadcast %cst_5 : f32 to vector<400x128xf32>
    %7 = arith.maximumf %5, %6 : vector<400x128xf32>
    %c0_6 = arith.constant 0 : index
    %c0_7 = arith.constant 0 : index
    %8 = vector.load %arg4[%c0_6, %c0_7] : memref<400x128xf32, #tpu.memory_space<vmem>>, vector<400x128xf32>
    tpu.vector_store %arg4[%c0_6, %c0_7], %7 {strides = array<i32>} : memref<400x128xf32, #tpu.memory_space<vmem>>, vector<400x128xf32>,
    return
  }
  func.func @transform_0(%arg0: i32) -> (i32, i32) {
    %c0_i32 = arith.constant 0 : i32
    %c0_i32_0 = arith.constant 0 : i32
    %c0_i32_1 = arith.constant 0 : i32
    return %c0_i32, %c0_i32_0 : i32, i32
  }
  func.func @transform_1(%arg0: i32) -> (i32, i32) {
    %c0_i32 = arith.constant 0 : i32
    %c0_i32_0 = arith.constant 0 : i32
    return %c0_i32, %arg0 : i32, i32
  }
  func.func @transform_2(%arg0: i32) -> (i32, i32) {
    %c0_i32 = arith.constant 0 : i32
    %c0_i32_0 = arith.constant 0 : i32
    %c0_i32_1 = arith.constant 0 : i32
    return %c0_i32, %c0_i32_0 : i32, i32
  }
  func.func @transform_3(%arg0: i32) -> (i32, i32) {
    %c0_i32 = arith.constant 0 : i32
    %c0_i32_0 = arith.constant 0 : i32
    return %c0_i32, %arg0 : i32, i32
  }
}

module attributes {stable_mosaic.version = 11 : i64} {
  func.func @_mm_bias_act_kernel(%arg0: i32, %arg1: memref<32x16xbf16, #tpu.memory_space<vmem>>, %arg2: memref<16x896xbf16, #tpu.memory_space<vmem>>, %arg3: memref<32x1xf32, #tpu.memory_space<vmem>>, %arg4: memref<32x896xf32, #tpu.memory_space<vmem>>) attributes {dimension_semantics = [#tpu.dimension_semantics<parallel>], iteration_bounds = array<i64: 2>, scalar_prefetch = 0 : i64, scratch_operands = 0 : i64, tpu.core_type = #tpu.core_type<tc>, window_params = [{pipeline_mode = #tpu.pipeline_mode<synchronous>, transform_indices = @transform_0, window_bounds = array<i64: 32, 16>}, {transform_indices = @transform_1, window_bounds = array<i64: 16, 896>}, {pipeline_mode = #tpu.pipeline_mode<synchronous>, transform_indices = @transform_2, window_bounds = array<i64: 32, 1>}, {transform_indices = @transform_3, window_bounds = array<i64: 32, 896>}]} {
    %c0 = arith.constant 0 : index
    %c0_0 = arith.constant 0 : index
    %0 = vector.load %arg1[%c0, %c0_0] : memref<32x16xbf16, #tpu.memory_space<vmem>>, vector<32x16xbf16>
    %c0_1 = arith.constant 0 : index
    %c0_2 = arith.constant 0 : index
    %1 = vector.load %arg2[%c0_1, %c0_2] : memref<16x896xbf16, #tpu.memory_space<vmem>>, vector<16x896xbf16>
    %cst = arith.constant dense<0.000000e+00> : vector<32x896xf32>
    %2 = tpu.matmul %0, %1, %cst {dimension_numbers = #tpu.dot_dimension_numbers<[1], [0], [0], [1], [0, 0, 1, 1], [], []>} : vector<32x16xbf16>, vector<16x896xbf16>, vector<32x896xf32> -> vector<32x896xf32>
    %c0_3 = arith.constant 0 : index
    %c0_4 = arith.constant 0 : index
    %3 = vector.load %arg3[%c0_3, %c0_4] : memref<32x1xf32, #tpu.memory_space<vmem>>, vector<32x1xf32>
    %4 = vector.broadcast %3 : vector<32x1xf32> to vector<32x896xf32>
    %5 = arith.addf %2, %4 : vector<32x896xf32>
    %cst_5 = arith.constant 0.000000e+00 : f32
    %6 = vector.broadcast %cst_5 : f32 to vector<32x896xf32>
    %7 = arith.maximumf %5, %6 : vector<32x896xf32>
    %c0_6 = arith.constant 0 : index
    %c0_7 = arith.constant 0 : index
    %8 = vector.load %arg4[%c0_6, %c0_7] : memref<32x896xf32, #tpu.memory_space<vmem>>, vector<32x896xf32>
    tpu.vector_store %arg4[%c0_6, %c0_7], %7 {strides = array<i32>} : memref<32x896xf32, #tpu.memory_space<vmem>>, vector<32x896xf32>,
    return
  }
  func.func @transform_0(%arg0: i32) -> (i32, i32) {
    %c0_i32 = arith.constant 0 : i32
    %c0_i32_0 = arith.constant 0 : i32
    %c0_i32_1 = arith.constant 0 : i32
    return %c0_i32, %c0_i32_0 : i32, i32
  }
  func.func @transform_1(%arg0: i32) -> (i32, i32) {
    %c0_i32 = arith.constant 0 : i32
    %c0_i32_0 = arith.constant 0 : i32
    return %c0_i32, %arg0 : i32, i32
  }
  func.func @transform_2(%arg0: i32) -> (i32, i32) {
    %c0_i32 = arith.constant 0 : i32
    %c0_i32_0 = arith.constant 0 : i32
    %c0_i32_1 = arith.constant 0 : i32
    return %c0_i32, %c0_i32_0 : i32, i32
  }
  func.func @transform_3(%arg0: i32) -> (i32, i32) {
    %c0_i32 = arith.constant 0 : i32
    %c0_i32_0 = arith.constant 0 : i32
    return %c0_i32, %arg0 : i32, i32
  }
}

module attributes {stable_mosaic.version = 11 : i64} {
  func.func @_mm_bias_act_kernel(%arg0: i32, %arg1: memref<48x32xbf16, #tpu.memory_space<vmem>>, %arg2: memref<32x1664xbf16, #tpu.memory_space<vmem>>, %arg3: memref<48x1xf32, #tpu.memory_space<vmem>>, %arg4: memref<48x1664xf32, #tpu.memory_space<vmem>>) attributes {dimension_semantics = [#tpu.dimension_semantics<parallel>], iteration_bounds = array<i64: 4>, scalar_prefetch = 0 : i64, scratch_operands = 0 : i64, tpu.core_type = #tpu.core_type<tc>, window_params = [{pipeline_mode = #tpu.pipeline_mode<synchronous>, transform_indices = @transform_0, window_bounds = array<i64: 48, 32>}, {transform_indices = @transform_1, window_bounds = array<i64: 32, 1664>}, {pipeline_mode = #tpu.pipeline_mode<synchronous>, transform_indices = @transform_2, window_bounds = array<i64: 48, 1>}, {transform_indices = @transform_3, window_bounds = array<i64: 48, 1664>}]} {
    %c0 = arith.constant 0 : index
    %c0_0 = arith.constant 0 : index
    %0 = vector.load %arg1[%c0, %c0_0] : memref<48x32xbf16, #tpu.memory_space<vmem>>, vector<48x32xbf16>
    %c0_1 = arith.constant 0 : index
    %c0_2 = arith.constant 0 : index
    %1 = vector.load %arg2[%c0_1, %c0_2] : memref<32x1664xbf16, #tpu.memory_space<vmem>>, vector<32x1664xbf16>
    %cst = arith.constant dense<0.000000e+00> : vector<48x1664xf32>
    %2 = tpu.matmul %0, %1, %cst {dimension_numbers = #tpu.dot_dimension_numbers<[1], [0], [0], [1], [0, 0, 1, 1], [], []>} : vector<48x32xbf16>, vector<32x1664xbf16>, vector<48x1664xf32> -> vector<48x1664xf32>
    %c0_3 = arith.constant 0 : index
    %c0_4 = arith.constant 0 : index
    %3 = vector.load %arg3[%c0_3, %c0_4] : memref<48x1xf32, #tpu.memory_space<vmem>>, vector<48x1xf32>
    %4 = vector.broadcast %3 : vector<48x1xf32> to vector<48x1664xf32>
    %5 = arith.addf %2, %4 : vector<48x1664xf32>
    %6 = math.tanh %5 : vector<48x1664xf32>
    %c0_5 = arith.constant 0 : index
    %c0_6 = arith.constant 0 : index
    %7 = vector.load %arg4[%c0_5, %c0_6] : memref<48x1664xf32, #tpu.memory_space<vmem>>, vector<48x1664xf32>
    tpu.vector_store %arg4[%c0_5, %c0_6], %6 {strides = array<i32>} : memref<48x1664xf32, #tpu.memory_space<vmem>>, vector<48x1664xf32>,
    return
  }
  func.func @transform_0(%arg0: i32) -> (i32, i32) {
    %c0_i32 = arith.constant 0 : i32
    %c0_i32_0 = arith.constant 0 : i32
    %c0_i32_1 = arith.constant 0 : i32
    return %c0_i32, %c0_i32_0 : i32, i32
  }
  func.func @transform_1(%arg0: i32) -> (i32, i32) {
    %c0_i32 = arith.constant 0 : i32
    %c0_i32_0 = arith.constant 0 : i32
    return %c0_i32, %arg0 : i32, i32
  }
  func.func @transform_2(%arg0: i32) -> (i32, i32) {
    %c0_i32 = arith.constant 0 : i32
    %c0_i32_0 = arith.constant 0 : i32
    %c0_i32_1 = arith.constant 0 : i32
    return %c0_i32, %c0_i32_0 : i32, i32
  }
  func.func @transform_3(%arg0: i32) -> (i32, i32) {
    %c0_i32 = arith.constant 0 : i32
    %c0_i32_0 = arith.constant 0 : i32
    return %c0_i32, %arg0 : i32, i32
  }
}

</mosaic_0001>

<bundles_post_ra>
// kernel: _lambda_.7
= control target key start
LH: loop header
LB: loop body
LE: loop exit
PB: predicated region body
PF: predicated region fallthrough
CT: control target
= control target key end

     0   :  { %s2535_s12 = smov 0   ;;  %s2537_s13 = smov 0   ;;  %s3259_s0 = inlined_call_operand.vmem [shape: bf16[16,192], index: 0, kind: input, shape index: {}]   ;;  %s3260_s1 = inlined_call_operand.vmem [shape: bf16[192,6656], index: 1, kind: input, shape index: {}]   ;;  %s3261_s2 = inlined_call_operand.vmem [shape: f32[16,1], index: 2, kind: input, shape index: {}]   ;;  %s3262_s3 = inlined_call_operand.vmem [shape: f32[16,6656], index: 3, kind: output, shape index: {}]  }
   0x1   :  { %s2539_s14 = smov 0  }
   0x2 LB: > { %s2006_s15 = sadd.s32 4294967295, %s2512_s14   ;;  %s2552_s16 = sadd.s32 1, %s2512_s14   ;;  %s2512_s14 = sphi %s2539_s14, %s3266_s14   ;;  %s2508_s13 = sphi %s2537_s13, %s3265_s13   ;;  %s2504_s12 = sphi %s2535_s12, %s3264_s12  }
   0x3   : > { %s38_s17 = ssub.s32 %s2512_s14, %s2552_s16  ;;  %s41_s18 = sadd.s32 1, %s2508_s13 }
   0x4   : > { %p39_p0 = scmp.eq.s32.totalorder %s38_s17, 0  ;;  %p48_p1 = scmp.ne.s32.totalorder %s2508_s13, %s2504_s12 }
   0x5   : > { %p49_p2 = scmp.eq.s32.totalorder %s2512_s14, 0  ;;  %p99_p3 = scmp.eq.s32.totalorder %s2006_s15, 3 }
   0x6   : > { %s2563_s19 = scalar_select %p39_p0, %s2508_s13, %s41_s18  }
   0x7   : > { %p50_p4 = por %p49_p2, %p48_p1  ;;  %p2565_p5 = por %p99_p3, %p48_p1 }
   0x8   : > { %p2009_p6 = scmp.ge.s32.totalorder %s2512_s14, 4 }
   0xa   : > { %127 = sbr.rel (%p2009_p6) target bundleno = 110 (0x6e), region = 24 }
  0x11   : > { %130 = sbr.rel (!%p50_p4) target bundleno = 110 (0x6e), region = 28  ;;  %s132_s21 = sand.u32 (%p50_p4), 1, %s2508_s13  }
  0x12   : > { %s2228_s22 = smul.u32 (%p50_p4), 52, %s2512_s14 }
  0x13   : > { %s2230_s23 = smul.u32 (%p50_p4), 1248, %s132_s21 }
  0x14   : > { %s2575_s26 = scalar_lea.vmem (%p50_p4), %s3260_s1, %s2228_s22 }
  0x15   : > { %v152_v0 = vld [vmem:[%s2575_s26] sm:$0xff] (%p50_p4)  ;;  %v154_v1 = vld [vmem:[%s2575_s26 + $0x8] sm:$0xff] (%p50_p4)  ;;  %v156_v2 = vld [vmem:[%s2575_s26 + $0x10] sm:$0xff] (%p50_p4)  ;;  %s2580_s27 = scalar_lea.vmem (%p50_p4), [#allocation2], %s2230_s23 }
  0x16   : > { %153 = vst [vmem:[%s2580_s27] sm:$0xff] (%p50_p4), %v152_v0  ;;  %155 = vst [vmem:[%s2580_s27 + $0x8] sm:$0xff] (%p50_p4), %v154_v1  ;;  %v158_v3 = vld [vmem:[%s2575_s26 + $0x18] sm:$0xff] (%p50_p4)  ;;  %v160_v4 = vld [vmem:[%s2575_s26 + $0x20] sm:$0xff] (%p50_p4) }
  0x17   : > { %157 = vst [vmem:[%s2580_s27 + $0x10] sm:$0xff] (%p50_p4), %v156_v2  ;;  %v162_v5 = vld [vmem:[%s2575_s26 + $0x28] sm:$0xff] (%p50_p4)  ;;  %159 = vst [vmem:[%s2580_s27 + $0x18] sm:$0xff] (%p50_p4), %v158_v3  ;;  %v164_v6 = vld [vmem:[%s2575_s26 + $0xd0] sm:$0xff] (%p50_p4) }
  0x18   : > { %161 = vst [vmem:[%s2580_s27 + $0x20] sm:$0xff] %v160_v4  ;;  %163 = vst [vmem:[%s2580_s27 + $0x28] sm:$0xff] %v162_v5  ;;  %v166_v7 = vld [vmem:[%s2575_s26 + $0xd8] sm:$0xff]  ;;  %v168_v8 = vld [vmem:[%s2575_s26 + $0xe0] sm:$0xff] }
  0x19   : > { %165 = vst [vmem:[%s2580_s27 + $0x34] sm:$0xff] %v164_v6  ;;  %167 = vst [vmem:[%s2580_s27 + $0x3c] sm:$0xff] %v166_v7  ;;  %v170_v9 = vld [vmem:[%s2575_s26 + $0xe8] sm:$0xff]  ;;  %v172_v10 = vld [vmem:[%s2575_s26 + $0xf0] sm:$0xff] }
  0x1a   : > { %169 = vst [vmem:[%s2580_s27 + $0x44] sm:$0xff] %v168_v8  ;;  %v174_v11 = vld [vmem:[%s2575_s26 + $0xf8] sm:$0xff]  ;;  %171 = vst [vmem:[%s2580_s27 + $0x4c] sm:$0xff] %v170_v9  ;;  %v176_v12 = vld [vmem:[%s2575_s26 + $0x1a0] sm:$0xff] }
  0x1b   : > { %173 = vst [vmem:[%s2580_s27 + $0x54] sm:$0xff] %v172_v10  ;;  %175 = vst [vmem:[%s2580_s27 + $0x5c] sm:$0xff] %v174_v11  ;;  %v178_v13 = vld [vmem:[%s2575_s26 + $0x1a8] sm:$0xff]  ;;  %v180_v14 = vld [vmem:[%s2575_s26 + $0x1b0] sm:$0xff] }
  0x1c   : > { %177 = vst [vmem:[%s2580_s27 + $0x68] sm:$0xff] %v176_v12  ;;  %179 = vst [vmem:[%s2580_s27 + $0x70] sm:$0xff] %v178_v13  ;;  %v182_v15 = vld [vmem:[%s2575_s26 + $0x1b8] sm:$0xff]  ;;  %v184_v16 = vld [vmem:[%s2575_s26 + $0x1c0] sm:$0xff] }
  0x1d   : > { %181 = vst [vmem:[%s2580_s27 + $0x78] sm:$0xff] %v180_v14  ;;  %v186_v17 = vld [vmem:[%s2575_s26 + $0x1c8] sm:$0xff]  ;;  %183 = vst [vmem:[%s2580_s27 + $0x80] sm:$0xff] %v182_v15  ;;  %v188_v18 = vld [vmem:[%s2575_s26 + $0x270] sm:$0xff] }
  0x1e   : > { %185 = vst [vmem:[%s2580_s27 + $0x88] sm:$0xff] %v184_v16  ;;  %187 = vst [vmem:[%s2580_s27 + $0x90] sm:$0xff] %v186_v17  ;;  %v190_v19 = vld [vmem:[%s2575_s26 + $0x278] sm:$0xff]  ;;  %v192_v20 = vld [vmem:[%s2575_s26 + $0x280] sm:$0xff] }
  0x1f   : > { %189 = vst [vmem:[%s2580_s27 + $0x9c] sm:$0xff] %v188_v18  ;;  %191 = vst [vmem:[%s2580_s27 + $0xa4] sm:$0xff] %v190_v19  ;;  %v194_v21 = vld [vmem:[%s2575_s26 + $0x288] sm:$0xff]  ;;  %v196_v22 = vld [vmem:[%s2575_s26 + $0x290] sm:$0xff] }
  0x20   : > { %193 = vst [vmem:[%s2580_s27 + $0xac] sm:$0xff] %v192_v20  ;;  %v198_v23 = vld [vmem:[%s2575_s26 + $0x298] sm:$0xff]  ;;  %195 = vst [vmem:[%s2580_s27 + $0xb4] sm:$0xff] %v194_v21  ;;  %v200_v24 = vld [vmem:[%s2575_s26 + $0x340] sm:$0xff] }
  0x21   : > { %197 = vst [vmem:[%s2580_s27 + $0xbc] sm:$0xff] %v196_v22  ;;  %199 = vst [vmem:[%s2580_s27 + $0xc4] sm:$0xff] %v198_v23  ;;  %v202_v25 = vld [vmem:[%s2575_s26 + $0x348] sm:$0xff]  ;;  %v204_v26 = vld [vmem:[%s2575_s26 + $0x350] sm:$0xff] }
  0x22   : > { %201 = vst [vmem:[%s2580_s27 + $0xd0] sm:$0xff] %v200_v24  ;;  %203 = vst [vmem:[%s2580_s27 + $0xd8] sm:$0xff] %v202_v25  ;;  %v206_v27 = vld [vmem:[%s2575_s26 + $0x358] sm:$0xff]  ;;  %v208_v28 = vld [vmem:[%s2575_s26 + $0x360] sm:$0xff] }
  0x23   : > { %205 = vst [vmem:[%s2580_s27 + $0xe0] sm:$0xff] %v204_v26  ;;  %v210_v29 = vld [vmem:[%s2575_s26 + $0x368] sm:$0xff]  ;;  %207 = vst [vmem:[%s2580_s27 + $0xe8] sm:$0xff] %v206_v27  ;;  %v212_v30 = vld [vmem:[%s2575_s26 + $0x410] sm:$0xff] }
  0x24   : > { %209 = vst [vmem:[%s2580_s27 + $0xf0] sm:$0xff] %v208_v28  ;;  %211 = vst [vmem:[%s2580_s27 + $0xf8] sm:$0xff] %v210_v29  ;;  %v214_v31 = vld [vmem:[%s2575_s26 + $0x418] sm:$0xff]  ;;  %v216_v32 = vld [vmem:[%s2575_s26 + $0x420] sm:$0xff] }
  0x25   : > { %213 = vst [vmem:[%s2580_s27 + $0x104] sm:$0xff] %v212_v30  ;;  %215 = vst [vmem:[%s2580_s27 + $0x10c] sm:$0xff] %v214_v31  ;;  %v218_v33 = vld [vmem:[%s2575_s26 + $0x428] sm:$0xff]  ;;  %v220_v34 = vld [vmem:[%s2575_s26 + $0x430] sm:$0xff] }
  0x26   : > { %217 = vst [vmem:[%s2580_s27 + $0x114] sm:$0xff] %v216_v32  ;;  %v222_v35 = vld [vmem:[%s2575_s26 + $0x438] sm:$0xff]  ;;  %219 = vst [vmem:[%s2580_s27 + $0x11c] sm:$0xff] %v218_v33  ;;  %v224_v36 = vld [vmem:[%s2575_s26 + $0x4e0] sm:$0xff] }
  0x27   : > { %221 = vst [vmem:[%s2580_s27 + $0x124] sm:$0xff] %v220_v34  ;;  %223 = vst [vmem:[%s2580_s27 + $0x12c] sm:$0xff] %v222_v35  ;;  %v226_v37 = vld [vmem:[%s2575_s26 + $0x4e8] sm:$0xff]  ;;  %v228_v38 = vld [vmem:[%s2575_s26 + $0x4f0] sm:$0xff] }
  0x28   : > { %225 = vst [vmem:[%s2580_s27 + $0x138] sm:$0xff] %v224_v36  ;;  %227 = vst [vmem:[%s2580_s27 + $0x140] sm:$0xff] %v226_v37  ;;  %v230_v39 = vld [vmem:[%s2575_s26 + $0x4f8] sm:$0xff]  ;;  %v232_v40 = vld [vmem:[%s2575_s26 + $0x500] sm:$0xff] }
  0x29   : > { %229 = vst [vmem:[%s2580_s27 + $0x148] sm:$0xff] %v228_v38  ;;  %v234_v41 = vld [vmem:[%s2575_s26 + $0x508] sm:$0xff]  ;;  %231 = vst [vmem:[%s2580_s27 + $0x150] sm:$0xff] %v230_v39  ;;  %v236_v42 = vld [vmem:[%s2575_s26 + $0x5b0] sm:$0xff] }
  0x2a   : > { %233 = vst [vmem:[%s2580_s27 + $0x158] sm:$0xff] %v232_v40  ;;  %235 = vst [vmem:[%s2580_s27 + $0x160] sm:$0xff] %v234_v41  ;;  %v238_v43 = vld [vmem:[%s2575_s26 + $0x5b8] sm:$0xff]  ;;  %v240_v44 = vld [vmem:[%s2575_s26 + $0x5c0] sm:$0xff] }
  0x2b   : > { %237 = vst [vmem:[%s2580_s27 + $0x16c] sm:$0xff] %v236_v42  ;;  %239 = vst [vmem:[%s2580_s27 + $0x174] sm:$0xff] %v238_v43  ;;  %v242_v45 = vld [vmem:[%s2575_s26 + $0x5c8] sm:$0xff]  ;;  %v244_v46 = vld [vmem:[%s2575_s26 + $0x5d0] sm:$0xff] }
  0x2c   : > { %241 = vst [vmem:[%s2580_s27 + $0x17c] sm:$0xff] %v240_v44  ;;  %v246_v47 = vld [vmem:[%s2575_s26 + $0x5d8] sm:$0xff]  ;;  %243 = vst [vmem:[%s2580_s27 + $0x184] sm:$0xff] %v242_v45  ;;  %v248_v48 = vld [vmem:[%s2575_s26 + $0x680] sm:$0xff] }
  0x2d   : > { %245 = vst [vmem:[%s2580_s27 + $0x18c] sm:$0xff] %v244_v46  ;;  %247 = vst [vmem:[%s2580_s27 + $0x194] sm:$0xff] %v246_v47  ;;  %v250_v49 = vld [vmem:[%s2575_s26 + $0x688] sm:$0xff]  ;;  %v252_v50 = vld [vmem:[%s2575_s26 + $0x690] sm:$0xff] }
  0x2e   : > { %249 = vst [vmem:[%s2580_s27 + $0x1a0] sm:$0xff] %v248_v48  ;;  %251 = vst [vmem:[%s2580_s27 + $0x1a8] sm:$0xff] %v250_v49  ;;  %v254_v51 = vld [vmem:[%s2575_s26 + $0x698] sm:$0xff]  ;;  %v256_v52 = vld [vmem:[%s2575_s26 + $0x6a0] sm:$0xff] }
  0x2f   : > { %253 = vst [vmem:[%s2580_s27 + $0x1b0] sm:$0xff] %v252_v50  ;;  %v258_v53 = vld [vmem:[%s2575_s26 + $0x6a8] sm:$0xff]  ;;  %255 = vst [vmem:[%s2580_s27 + $0x1b8] sm:$0xff] %v254_v51  ;;  %v260_v54 = vld [vmem:[%s2575_s26 + $0x750] sm:$0xff] }
  0x30   : > { %257 = vst [vmem:[%s2580_s27 + $0x1c0] sm:$0xff] %v256_v52  ;;  %259 = vst [vmem:[%s2580_s27 + $0x1c8] sm:$0xff] %v258_v53  ;;  %v262_v55 = vld [vmem:[%s2575_s26 + $0x758] sm:$0xff]  ;;  %v264_v56 = vld [vmem:[%s2575_s26 + $0x760] sm:$0xff] }
  0x31   : > { %261 = vst [vmem:[%s2580_s27 + $0x1d4] sm:$0xff] %v260_v54  ;;  %263 = vst [vmem:[%s2580_s27 + $0x1dc] sm:$0xff] %v262_v55  ;;  %v266_v57 = vld [vmem:[%s2575_s26 + $0x768] sm:$0xff]  ;;  %v268_v58 = vld [vmem:[%s2575_s26 + $0x770] sm:$0xff] }
  0x32   : > { %265 = vst [vmem:[%s2580_s27 + $0x1e4] sm:$0xff] %v264_v56  ;;  %v270_v59 = vld [vmem:[%s2575_s26 + $0x778] sm:$0xff]  ;;  %267 = vst [vmem:[%s2580_s27 + $0x1ec] sm:$0xff] %v266_v57  ;;  %v272_v60 = vld [vmem:[%s2575_s26 + $0x820] sm:$0xff] }
  0x33   : > { %269 = vst [vmem:[%s2580_s27 + $0x1f4] sm:$0xff] %v268_v58  ;;  %271 = vst [vmem:[%s2580_s27 + $0x1fc] sm:$0xff] %v270_v59  ;;  %v274_v61 = vld [vmem:[%s2575_s26 + $0x828] sm:$0xff]  ;;  %v276_v62 = vld [vmem:[%s2575_s26 + $0x830] sm:$0xff] }
  0x34   : > { %273 = vst [vmem:[%s2580_s27 + $0x208] sm:$0xff] %v272_v60  ;;  %275 = vst [vmem:[%s2580_s27 + $0x210] sm:$0xff] %v274_v61  ;;  %v278_v63 = vld [vmem:[%s2575_s26 + $0x838] sm:$0xff]  ;;  %v280_v0 = vld [vmem:[%s2575_s26 + $0x840] sm:$0xff] }
  0x35   : > { %277 = vst [vmem:[%s2580_s27 + $0x218] sm:$0xff] %v276_v62  ;;  %v282_v1 = vld [vmem:[%s2575_s26 + $0x848] sm:$0xff]  ;;  %279 = vst [vmem:[%s2580_s27 + $0x220] sm:$0xff] %v278_v63  ;;  %v284_v2 = vld [vmem:[%s2575_s26 + $0x8f0] sm:$0xff] }
  0x36   : > { %281 = vst [vmem:[%s2580_s27 + $0x228] sm:$0xff] %v280_v0  ;;  %283 = vst [vmem:[%s2580_s27 + $0x230] sm:$0xff] %v282_v1  ;;  %v286_v3 = vld [vmem:[%s2575_s26 + $0x8f8] sm:$0xff]  ;;  %v288_v4 = vld [vmem:[%s2575_s26 + $0x900] sm:$0xff] }
  0x37   : > { %285 = vst [vmem:[%s2580_s27 + $0x23c] sm:$0xff] %v284_v2  ;;  %287 = vst [vmem:[%s2580_s27 + $0x244] sm:$0xff] %v286_v3  ;;  %v290_v5 = vld [vmem:[%s2575_s26 + $0x908] sm:$0xff]  ;;  %v292_v6 = vld [vmem:[%s2575_s26 + $0x910] sm:$0xff] }
  0x38   : > { %289 = vst [vmem:[%s2580_s27 + $0x24c] sm:$0xff] %v288_v4  ;;  %v294_v7 = vld [vmem:[%s2575_s26 + $0x918] sm:$0xff]  ;;  %291 = vst [vmem:[%s2580_s27 + $0x254] sm:$0xff] %v290_v5  ;;  %v296_v8 = vld [vmem:[%s2575_s26 + $0x9c0] sm:$0xff] }
  0x39   : > { %293 = vst [vmem:[%s2580_s27 + $0x25c] sm:$0xff] %v292_v6  ;;  %295 = vst [vmem:[%s2580_s27 + $0x264] sm:$0xff] %v294_v7  ;;  %v298_v9 = vld [vmem:[%s2575_s26 + $0x9c8] sm:$0xff]  ;;  %v300_v10 = vld [vmem:[%s2575_s26 + $0x9d0] sm:$0xff] }
  0x3a   : > { %297 = vst [vmem:[%s2580_s27 + $0x270] sm:$0xff] %v296_v8  ;;  %299 = vst [vmem:[%s2580_s27 + $0x278] sm:$0xff] %v298_v9  ;;  %v302_v11 = vld [vmem:[%s2575_s26 + $0x9d8] sm:$0xff]  ;;  %v304_v12 = vld [vmem:[%s2575_s26 + $0x9e0] sm:$0xff] }
  0x3b   : > { %301 = vst [vmem:[%s2580_s27 + $0x280] sm:$0xff] %v300_v10  ;;  %v306_v13 = vld [vmem:[%s2575_s26 + $0x9e8] sm:$0xff]  ;;  %303 = vst [vmem:[%s2580_s27 + $0x288] sm:$0xff] %v302_v11  ;;  %v308_v14 = vld [vmem:[%s2575_s26 + $0xa90] sm:$0xff] }
  0x3c   : > { %305 = vst [vmem:[%s2580_s27 + $0x290] sm:$0xff] %v304_v12  ;;  %307 = vst [vmem:[%s2580_s27 + $0x298] sm:$0xff] %v306_v13  ;;  %v310_v15 = vld [vmem:[%s2575_s26 + $0xa98] sm:$0xff]  ;;  %v312_v16 = vld [vmem:[%s2575_s26 + $0xaa0] sm:$0xff] }
  0x3d   : > { %309 = vst [vmem:[%s2580_s27 + $0x2a4] sm:$0xff] %v308_v14  ;;  %311 = vst [vmem:[%s2580_s27 + $0x2ac] sm:$0xff] %v310_v15  ;;  %v314_v17 = vld [vmem:[%s2575_s26 + $0xaa8] sm:$0xff]  ;;  %v316_v18 = vld [vmem:[%s2575_s26 + $0xab0] sm:$0xff] }
  0x3e   : > { %313 = vst [vmem:[%s2580_s27 + $0x2b4] sm:$0xff] %v312_v16  ;;  %v318_v19 = vld [vmem:[%s2575_s26 + $0xab8] sm:$0xff]  ;;  %315 = vst [vmem:[%s2580_s27 + $0x2bc] sm:$0xff] %v314_v17  ;;  %v320_v20 = vld [vmem:[%s2575_s26 + $0xb60] sm:$0xff] }
  0x3f   : > { %317 = vst [vmem:[%s2580_s27 + $0x2c4] sm:$0xff] %v316_v18  ;;  %319 = vst [vmem:[%s2580_s27 + $0x2cc] sm:$0xff] %v318_v19  ;;  %v322_v21 = vld [vmem:[%s2575_s26 + $0xb68] sm:$0xff]  ;;  %v324_v22 = vld [vmem:[%s2575_s26 + $0xb70] sm:$0xff] }
  0x40   : > { %321 = vst [vmem:[%s2580_s27 + $0x2d8] sm:$0xff] %v320_v20  ;;  %323 = vst [vmem:[%s2580_s27 + $0x2e0] sm:$0xff] %v322_v21  ;;  %v326_v23 = vld [vmem:[%s2575_s26 + $0xb78] sm:$0xff]  ;;  %v328_v24 = vld [vmem:[%s2575_s26 + $0xb80] sm:$0xff] }
  0x41   : > { %325 = vst [vmem:[%s2580_s27 + $0x2e8] sm:$0xff] %v324_v22  ;;  %v330_v25 = vld [vmem:[%s2575_s26 + $0xb88] sm:$0xff]  ;;  %327 = vst [vmem:[%s2580_s27 + $0x2f0] sm:$0xff] %v326_v23  ;;  %v332_v26 = vld [vmem:[%s2575_s26 + $0xc30] sm:$0xff] }
  0x42   : > { %329 = vst [vmem:[%s2580_s27 + $0x2f8] sm:$0xff] %v328_v24  ;;  %331 = vst [vmem:[%s2580_s27 + $0x300] sm:$0xff] %v330_v25  ;;  %v334_v27 = vld [vmem:[%s2575_s26 + $0xc38] sm:$0xff]  ;;  %v336_v28 = vld [vmem:[%s2575_s26 + $0xc40] sm:$0xff] }
  0x43   : > { %333 = vst [vmem:[%s2580_s27 + $0x30c] sm:$0xff] %v332_v26  ;;  %335 = vst [vmem:[%s2580_s27 + $0x314] sm:$0xff] %v334_v27  ;;  %v338_v29 = vld [vmem:[%s2575_s26 + $0xc48] sm:$0xff]  ;;  %v340_v30 = vld [vmem:[%s2575_s26 + $0xc50] sm:$0xff] }
  0x44   : > { %337 = vst [vmem:[%s2580_s27 + $0x31c] sm:$0xff] %v336_v28  ;;  %v342_v31 = vld [vmem:[%s2575_s26 + $0xc58] sm:$0xff]  ;;  %339 = vst [vmem:[%s2580_s27 + $0x324] sm:$0xff] %v338_v29  ;;  %v344_v32 = vld [vmem:[%s2575_s26 + $0xd00] sm:$0xff] }
  0x45   : > { %341 = vst [vmem:[%s2580_s27 + $0x32c] sm:$0xff] %v340_v30  ;;  %343 = vst [vmem:[%s2580_s27 + $0x334] sm:$0xff] %v342_v31  ;;  %v346_v33 = vld [vmem:[%s2575_s26 + $0xd08] sm:$0xff]  ;;  %v348_v34 = vld [vmem:[%s2575_s26 + $0xd10] sm:$0xff] }
  0x46   : > { %345 = vst [vmem:[%s2580_s27 + $0x340] sm:$0xff] %v344_v32  ;;  %347 = vst [vmem:[%s2580_s27 + $0x348] sm:$0xff] %v346_v33  ;;  %v350_v35 = vld [vmem:[%s2575_s26 + $0xd18] sm:$0xff]  ;;  %v352_v36 = vld [vmem:[%s2575_s26 + $0xd20] sm:$0xff] }
  0x47   : > { %349 = vst [vmem:[%s2580_s27 + $0x350] sm:$0xff] %v348_v34  ;;  %v354_v37 = vld [vmem:[%s2575_s26 + $0xd28] sm:$0xff]  ;;  %351 = vst [vmem:[%s2580_s27 + $0x358] sm:$0xff] %v350_v35  ;;  %v356_v38 = vld [vmem:[%s2575_s26 + $0xdd0] sm:$0xff] }
  0x48   : > { %353 = vst [vmem:[%s2580_s27 + $0x360] sm:$0xff] %v352_v36  ;;  %355 = vst [vmem:[%s2580_s27 + $0x368] sm:$0xff] %v354_v37  ;;  %v358_v39 = vld [vmem:[%s2575_s26 + $0xdd8] sm:$0xff]  ;;  %v360_v40 = vld [vmem:[%s2575_s26 + $0xde0] sm:$0xff] }
  0x49   : > { %357 = vst [vmem:[%s2580_s27 + $0x374] sm:$0xff] %v356_v38  ;;  %359 = vst [vmem:[%s2580_s27 + $0x37c] sm:$0xff] %v358_v39  ;;  %v362_v41 = vld [vmem:[%s2575_s26 + $0xde8] sm:$0xff]  ;;  %v364_v42 = vld [vmem:[%s2575_s26 + $0xdf0] sm:$0xff] }
  0x4a   : > { %361 = vst [vmem:[%s2580_s27 + $0x384] sm:$0xff] %v360_v40  ;;  %v366_v43 = vld [vmem:[%s2575_s26 + $0xdf8] sm:$0xff]  ;;  %363 = vst [vmem:[%s2580_s27 + $0x38c] sm:$0xff] %v362_v41  ;;  %v368_v44 = vld [vmem:[%s2575_s26 + $0xea0] sm:$0xff] }
  0x4b   : > { %365 = vst [vmem:[%s2580_s27 + $0x394] sm:$0xff] %v364_v42  ;;  %367 = vst [vmem:[%s2580_s27 + $0x39c] sm:$0xff] %v366_v43  ;;  %v370_v45 = vld [vmem:[%s2575_s26 + $0xea8] sm:$0xff]  ;;  %v372_v46 = vld [vmem:[%s2575_s26 + $0xeb0] sm:$0xff] }
  0x4c   : > { %369 = vst [vmem:[%s2580_s27 + $0x3a8] sm:$0xff] %v368_v44  ;;  %371 = vst [vmem:[%s2580_s27 + $0x3b0] sm:$0xff] %v370_v45  ;;  %v374_v47 = vld [vmem:[%s2575_s26 + $0xeb8] sm:$0xff]  ;;  %v376_v48 = vld [vmem:[%s2575_s26 + $0xec0] sm:$0xff] }
  0x4d   : > { %373 = vst [vmem:[%s2580_s27 + $0x3b8] sm:$0xff] %v372_v46  ;;  %v378_v49 = vld [vmem:[%s2575_s26 + $0xec8] sm:$0xff]  ;;  %375 = vst [vmem:[%s2580_s27 + $0x3c0] sm:$0xff] %v374_v47  ;;  %v380_v50 = vld [vmem:[%s2575_s26 + $0xf70] sm:$0xff] }
  0x4e   : > { %377 = vst [vmem:[%s2580_s27 + $0x3c8] sm:$0xff] %v376_v48  ;;  %379 = vst [vmem:[%s2580_s27 + $0x3d0] sm:$0xff] %v378_v49  ;;  %v382_v51 = vld [vmem:[%s2575_s26 + $0xf78] sm:$0xff]  ;;  %v384_v52 = vld [vmem:[%s2575_s26 + $0xf80] sm:$0xff] }
  0x4f   : > { %381 = vst [vmem:[%s2580_s27 + $0x3dc] sm:$0xff] %v380_v50  ;;  %383 = vst [vmem:[%s2580_s27 + $0x3e4] sm:$0xff] %v382_v51  ;;  %v386_v53 = vld [vmem:[%s2575_s26 + $0xf88] sm:$0xff]  ;;  %v388_v54 = vld [vmem:[%s2575_s26 + $0xf90] sm:$0xff] }
  0x50   : > { %385 = vst [vmem:[%s2580_s27 + $0x3ec] sm:$0xff] %v384_v52  ;;  %v390_v55 = vld [vmem:[%s2575_s26 + $0xf98] sm:$0xff]  ;;  %387 = vst [vmem:[%s2580_s27 + $0x3f4] sm:$0xff] %v386_v53  ;;  %v392_v56 = vld [vmem:[%s2575_s26 + $0x1040] sm:$0xff] }
  0x51   : > { %389 = vst [vmem:[%s2580_s27 + $0x3fc] sm:$0xff] %v388_v54  ;;  %391 = vst [vmem:[%s2580_s27 + $0x404] sm:$0xff] %v390_v55  ;;  %v394_v57 = vld [vmem:[%s2575_s26 + $0x1048] sm:$0xff]  ;;  %v396_v58 = vld [vmem:[%s2575_s26 + $0x1050] sm:$0xff] }
  0x52   : > { %393 = vst [vmem:[%s2580_s27 + $0x410] sm:$0xff] %v392_v56  ;;  %395 = vst [vmem:[%s2580_s27 + $0x418] sm:$0xff] %v394_v57  ;;  %v398_v59 = vld [vmem:[%s2575_s26 + $0x1058] sm:$0xff]  ;;  %v400_v60 = vld [vmem:[%s2575_s26 + $0x1060] sm:$0xff] }
  0x53   : > { %397 = vst [vmem:[%s2580_s27 + $0x420] sm:$0xff] %v396_v58  ;;  %v402_v61 = vld [vmem:[%s2575_s26 + $0x1068] sm:$0xff]  ;;  %399 = vst [vmem:[%s2580_s27 + $0x428] sm:$0xff] %v398_v59  ;;  %v404_v62 = vld [vmem:[%s2575_s26 + $0x1110] sm:$0xff] }
  0x54   : > { %401 = vst [vmem:[%s2580_s27 + $0x430] sm:$0xff] %v400_v60  ;;  %403 = vst [vmem:[%s2580_s27 + $0x438] sm:$0xff] %v402_v61  ;;  %v406_v63 = vld [vmem:[%s2575_s26 + $0x1118] sm:$0xff]  ;;  %v408_v0 = vld [vmem:[%s2575_s26 + $0x1120] sm:$0xff] }
  0x55   : > { %405 = vst [vmem:[%s2580_s27 + $0x444] sm:$0xff] %v404_v62  ;;  %407 = vst [vmem:[%s2580_s27 + $0x44c] sm:$0xff] %v406_v63  ;;  %v410_v1 = vld [vmem:[%s2575_s26 + $0x1128] sm:$0xff]  ;;  %v412_v2 = vld [vmem:[%s2575_s26 + $0x1130] sm:$0xff] }
  0x56   : > { %409 = vst [vmem:[%s2580_s27 + $0x454] sm:$0xff] %v408_v0  ;;  %v414_v3 = vld [vmem:[%s2575_s26 + $0x1138] sm:$0xff]  ;;  %411 = vst [vmem:[%s2580_s27 + $0x45c] sm:$0xff] %v410_v1  ;;  %v416_v4 = vld [vmem:[%s2575_s26 + $0x11e0] sm:$0xff] }
  0x57   : > { %413 = vst [vmem:[%s2580_s27 + $0x464] sm:$0xff] %v412_v2  ;;  %415 = vst [vmem:[%s2580_s27 + $0x46c] sm:$0xff] %v414_v3  ;;  %v418_v5 = vld [vmem:[%s2575_s26 + $0x11e8] sm:$0xff]  ;;  %v420_v6 = vld [vmem:[%s2575_s26 + $0x11f0] sm:$0xff] }
  0x58   : > { %417 = vst [vmem:[%s2580_s27 + $0x478] sm:$0xff] %v416_v4  ;;  %419 = vst [vmem:[%s2580_s27 + $0x480] sm:$0xff] %v418_v5  ;;  %v422_v7 = vld [vmem:[%s2575_s26 + $0x11f8] sm:$0xff]  ;;  %v424_v8 = vld [vmem:[%s2575_s26 + $0x1200] sm:$0xff] }
  0x59   : > { %421 = vst [vmem:[%s2580_s27 + $0x488] sm:$0xff] %v420_v6  ;;  %v426_v9 = vld [vmem:[%s2575_s26 + $0x1208] sm:$0xff]  ;;  %423 = vst [vmem:[%s2580_s27 + $0x490] sm:$0xff] %v422_v7  ;;  %v428_v10 = vld [vmem:[%s2575_s26 + $0x12b0] sm:$0xff] }
  0x5a   : > { %425 = vst [vmem:[%s2580_s27 + $0x498] sm:$0xff] %v424_v8  ;;  %427 = vst [vmem:[%s2580_s27 + $0x4a0] sm:$0xff] %v426_v9  ;;  %v430_v11 = vld [vmem:[%s2575_s26 + $0x12b8] sm:$0xff]  ;;  %v432_v12 = vld [vmem:[%s2575_s26 + $0x12c0] sm:$0xff] }
  0x5b   : > { %429 = vst [vmem:[%s2580_s27 + $0x4ac] sm:$0xff] %v428_v10  ;;  %431 = vst [vmem:[%s2580_s27 + $0x4b4] sm:$0xff] %v430_v11  ;;  %v434_v13 = vld [vmem:[%s2575_s26 + $0x12c8] sm:$0xff]  ;;  %v436_v14 = vld [vmem:[%s2575_s26 + $0x12d0] sm:$0xff] }
  0x5c   : > { %433 = vst [vmem:[%s2580_s27 + $0x4bc] sm:$0xff] %v432_v12  ;;  %v438_v15 = vld [vmem:[%s2575_s26 + $0x12d8] sm:$0xff]  ;;  %435 = vst [vmem:[%s2580_s27 + $0x4c4] sm:$0xff] %v434_v13  ;;  %v2011_v16 = vld [vmem:[%s2575_s26 + $0x30] sm:$0xf] }
  0x5d   : > { %437 = vst [vmem:[%s2580_s27 + $0x4cc] sm:$0xff] %v436_v14  ;;  %439 = vst [vmem:[%s2580_s27 + $0x4d4] sm:$0xff] %v438_v15  ;;  %v2013_v17 = vld [vmem:[%s2575_s26 + $0x100] sm:$0xf]  ;;  %v2015_v18 = vld [vmem:[%s2575_s26 + $0x1d0] sm:$0xf] }
  0x5e   : > { %2012 = vst [vmem:[%s2580_s27 + $0x30] sm:$0xf] %v2011_v16  ;;  %2014 = vst [vmem:[%s2580_s27 + $0x64] sm:$0xf] %v2013_v17  ;;  %v2017_v19 = vld [vmem:[%s2575_s26 + $0x2a0] sm:$0xf] }
  0x5f   : > { %2016 = vst [vmem:[%s2580_s27 + $0x98] sm:$0xf] %v2015_v18  ;;  %v2019_v20 = vld [vmem:[%s2575_s26 + $0x370] sm:$0xf]  ;;  %v2021_v21 = vld [vmem:[%s2575_s26 + $0x440] sm:$0xf] }
  0x60   : > { %2018 = vst [vmem:[%s2580_s27 + $0xcc] sm:$0xf] %v2017_v19  ;;  %2020 = vst [vmem:[%s2580_s27 + $0x100] sm:$0xf] %v2019_v20  ;;  %v2023_v22 = vld [vmem:[%s2575_s26 + $0x510] sm:$0xf] }
  0x61   : > { %2022 = vst [vmem:[%s2580_s27 + $0x134] sm:$0xf] %v2021_v21  ;;  %v2025_v23 = vld [vmem:[%s2575_s26 + $0x5e0] sm:$0xf]  ;;  %v2027_v24 = vld [vmem:[%s2575_s26 + $0x6b0] sm:$0xf] }
  0x62   : > { %2024 = vst [vmem:[%s2580_s27 + $0x168] sm:$0xf] %v2023_v22  ;;  %2026 = vst [vmem:[%s2580_s27 + $0x19c] sm:$0xf] %v2025_v23  ;;  %v2029_v25 = vld [vmem:[%s2575_s26 + $0x780] sm:$0xf] }
  0x63   : > { %2028 = vst [vmem:[%s2580_s27 + $0x1d0] sm:$0xf] %v2027_v24  ;;  %v2031_v26 = vld [vmem:[%s2575_s26 + $0x850] sm:$0xf]  ;;  %v2033_v27 = vld [vmem:[%s2575_s26 + $0x920] sm:$0xf] }
  0x64   : > { %2030 = vst [vmem:[%s2580_s27 + $0x204] sm:$0xf] %v2029_v25  ;;  %2032 = vst [vmem:[%s2580_s27 + $0x238] sm:$0xf] %v2031_v26  ;;  %v2035_v28 = vld [vmem:[%s2575_s26 + $0x9f0] sm:$0xf] }
  0x65   : > { %2034 = vst [vmem:[%s2580_s27 + $0x26c] sm:$0xf] %v2033_v27  ;;  %v2037_v29 = vld [vmem:[%s2575_s26 + $0xac0] sm:$0xf]  ;;  %v2039_v30 = vld [vmem:[%s2575_s26 + $0xb90] sm:$0xf] }
  0x66   : > { %2036 = vst [vmem:[%s2580_s27 + $0x2a0] sm:$0xf] %v2035_v28  ;;  %2038 = vst [vmem:[%s2580_s27 + $0x2d4] sm:$0xf] %v2037_v29  ;;  %v2041_v31 = vld [vmem:[%s2575_s26 + $0xc60] sm:$0xf] }
  0x67   : > { %2040 = vst [vmem:[%s2580_s27 + $0x308] sm:$0xf] %v2039_v30  ;;  %v2043_v32 = vld [vmem:[%s2575_s26 + $0xd30] sm:$0xf]  ;;  %v2045_v33 = vld [vmem:[%s2575_s26 + $0xe00] sm:$0xf] }
  0x68   : > { %2042 = vst [vmem:[%s2580_s27 + $0x33c] sm:$0xf] %v2041_v31  ;;  %2044 = vst [vmem:[%s2580_s27 + $0x370] sm:$0xf] %v2043_v32  ;;  %v2047_v34 = vld [vmem:[%s2575_s26 + $0xed0] sm:$0xf] }
  0x69   : > { %2046 = vst [vmem:[%s2580_s27 + $0x3a4] sm:$0xf] %v2045_v33  ;;  %v2049_v35 = vld [vmem:[%s2575_s26 + $0xfa0] sm:$0xf]  ;;  %v2051_v36 = vld [vmem:[%s2575_s26 + $0x1070] sm:$0xf] }
  0x6a   : > { %2048 = vst [vmem:[%s2580_s27 + $0x3d8] sm:$0xf] %v2047_v34  ;;  %2050 = vst [vmem:[%s2580_s27 + $0x40c] sm:$0xf] %v2049_v35  ;;  %v2053_v37 = vld [vmem:[%s2575_s26 + $0x1140] sm:$0xf] }
  0x6b   : > { %2052 = vst [vmem:[%s2580_s27 + $0x440] sm:$0xf] %v2051_v36  ;;  %v2055_v38 = vld [vmem:[%s2575_s26 + $0x1210] sm:$0xf]  ;;  %v2057_v39 = vld [vmem:[%s2575_s26 + $0x12e0] sm:$0xf] }
  0x6c   : > { %2054 = vst [vmem:[%s2580_s27 + $0x474] sm:$0xf] %v2053_v37  ;;  %2056 = vst [vmem:[%s2580_s27 + $0x4a8] sm:$0xf] %v2055_v38 }
  0x6d   : > { %2058 = vst [vmem:[%s2580_s27 + $0x4dc] sm:$0xf] %v2057_v39 }
  0x6e PF: > { %p2059_p7 = scmp.ge.s32.totalorder %s2512_s14, 1  ;;  %p499_p8 = scmp.lt.s32.totalorder %s2512_s14, 5 }
  0x70   : > { %p500_p9 = pnand %p2059_p7, %p499_p8 }
  0x71   : > { %s506_s28 = sand.u32 (!%p500_p9), 1, %s2504_s12   ;;  %v2921_v40 = vld [vmem:[%s3259_s0 + $0x4] ss:$8 sps:$4 sm:$0xff] (!%p500_p9)   ;;  %vm1514_vm0 = vcmask (!%p500_p9), 523264   ;;  %v2514_v43 = vmov (!%p500_p9), 0  }
  0x72   : > { %503 = sbr.rel (%p500_p9) target bundleno = 538 (0x21a), region = 54  ;;  %2218 = vmatprep.mubr.msk.bf16.mxu0 (!%p500_p9), %vm1514_vm0, %v2921_v40  ;;  %2219 = vmatprep.mubr.msk.bf16.mxu1 (!%p500_p9), %vm1514_vm0, %v2921_v40  ;;  %v2977_v20 = vld [vmem:[%s3259_s0] ss:$8 sps:$4 sm:$0xff] (!%p500_p9)  }
  0x73   : > { %s2231_s4 = smul.u32 (!%p500_p9), 1248, %s506_s28  ;;  %2258 = vset.pattern.permute.xlu0 (!%p500_p9), %v2514_v43 }
  0x74   : > { %s2232_s17 = smul.u32 (!%p500_p9), 208, %s506_s28 }
  0x75   : > { %s2929_s5 = scalar_lea.vmem (!%p500_p9), [#allocation2], %s2231_s4 }
  0x76   : > { %v2259_v41 = vld [vmem:[%s2929_s5 + $0x4] ss:$52 sps:$4 sm:$0xff] (!%p500_p9)   ;;  %v2261_v42 = vld [vmem:[%s2929_s5] ss:$52 sps:$4 sm:$0xff] (!%p500_p9)   ;;  %v2264_v45 = vld [vmem:[%s2929_s5 + $0x68] ss:$52 sps:$4 sm:$0xff] (!%p500_p9)  }
  0x77   : > { %1518 = vmatprep.subr.bf16.mxu0 (!%p500_p9), %v2259_v41  ;;  %v2262_v44 = vld [vmem:[%s2929_s5 + $0x6c] ss:$52 sps:$4 sm:$0xff] (!%p500_p9)   ;;  %v2265_v46 = vld [vmem:[%s2929_s5 + $0xd4] ss:$52 sps:$4 sm:$0xff] (!%p500_p9)   ;;  %v2267_v47 = vld [vmem:[%s2929_s5 + $0xd0] ss:$52 sps:$4 sm:$0xff] (!%p500_p9)  }
  0x78   : > { %1519 = vmatpush1.bf16.msra.mxu0 (!%p500_p9), %v2261_v42  ;;  %v2268_v48 = vld [vmem:[%s2929_s5 + $0x13c] ss:$52 sps:$4 sm:$0xff] (!%p500_p9)   ;;  %v2270_v49 = vld [vmem:[%s2929_s5 + $0x138] ss:$52 sps:$4 sm:$0xff] (!%p500_p9)   ;;  %v2273_v51 = vld [vmem:[%s2929_s5 + $0x1a0] ss:$52 sps:$4 sm:$0xff] (!%p500_p9)  }
  0x79   : > { %1520 = vmatprep.subr.bf16.mxu0 %v2262_v44  ;;  %v2271_v50 = vld [vmem:[%s2929_s5 + $0x1a4] ss:$52 sps:$4 sm:$0xff]   ;;  %v2292_v52 = vld [vmem:[%s2929_s5 + $0xc] ss:$52 sps:$4 sm:$0xff]   ;;  %v2296_v54 = vld [vmem:[%s2929_s5 + $0x8] ss:$52 sps:$4 sm:$0xff]  }
  0x7a   : > { %v2274_v53 = vld [vmem:[%s2929_s5 + $0x20c] ss:$52 sps:$4 sm:$0xff]   ;;  %1561 = vmatprep.subr.bf16.mxu1 %v2292_v52  ;;  %v2300_v55 = vld [vmem:[%s2929_s5 + $0x74] ss:$52 sps:$4 sm:$0xff]   ;;  %v2303_v56 = vld [vmem:[%s2929_s5 + $0x70] ss:$52 sps:$4 sm:$0xff]  }
  0x7b   : > { %1562 = vmatpush1.bf16.msra.mxu1 %v2296_v54  ;;  %v2276_v57 = vld [vmem:[%s2929_s5 + $0x208] ss:$52 sps:$4 sm:$0xff]   ;;  %v2309_v60 = vld [vmem:[%s2929_s5 + $0xd8] ss:$52 sps:$4 sm:$0xff]   ;;  %v2279_v61 = vld [vmem:[%s2929_s5 + $0x270] ss:$52 sps:$4 sm:$0xff]  }
  0x7c   : > { %1521 = vmatpush1.bf16.msra.mxu0 %v2264_v45  ;;  %v2277_v58 = vld [vmem:[%s2929_s5 + $0x274] ss:$52 sps:$4 sm:$0xff]   ;;  %1563 = vmatprep.subr.bf16.mxu1 %v2300_v55  ;;  %v2307_v59 = vld [vmem:[%s2929_s5 + $0xdc] ss:$52 sps:$4 sm:$0xff]   ;;  %v2313_v62 = vld [vmem:[%s2929_s5 + $0x144] ss:$52 sps:$4 sm:$0xff]  }
  0x7d   : > { %1522 = vmatprep.subr.bf16.mxu0 %v2265_v46  ;;  %v2280_v63 = vld [vmem:[%s2929_s5 + $0x2dc] ss:$52 sps:$4 sm:$0xff]   ;;  %v2315_v0 = vld [vmem:[%s2929_s5 + $0x140] ss:$52 sps:$4 sm:$0xff]   ;;  %v2282_v1 = vld [vmem:[%s2929_s5 + $0x2d8] ss:$52 sps:$4 sm:$0xff]  }
  0x7e   : > { %v2319_v2 = vld [vmem:[%s2929_s5 + $0x1ac] ss:$52 sps:$4 sm:$0xff]   ;;  %v2283_v3 = vld [vmem:[%s2929_s5 + $0x344] ss:$52 sps:$4 sm:$0xff]   ;;  %v2321_v4 = vld [vmem:[%s2929_s5 + $0x1a8] ss:$52 sps:$4 sm:$0xff]  }
  0x7f   : > { %1564 = vmatpush1.bf16.msra.mxu1 %v2303_v56  ;;  %v2285_v5 = vld [vmem:[%s2929_s5 + $0x340] ss:$52 sps:$4 sm:$0xff]   ;;  %v2327_v8 = vld [vmem:[%s2929_s5 + $0x210] ss:$52 sps:$4 sm:$0xff]   ;;  %v2288_v9 = vld [vmem:[%s2929_s5 + $0x3a8] ss:$52 sps:$4 sm:$0xff]  }
  0x80   : > { %1523 = vmatpush1.bf16.msra.mxu0 %v2267_v47  ;;  %1565 = vmatprep.subr.bf16.mxu1 %v2307_v59  ;;  %v2325_v6 = vld [vmem:[%s2929_s5 + $0x214] ss:$52 sps:$4 sm:$0xff]   ;;  %v2286_v7 = vld [vmem:[%s2929_s5 + $0x3ac] ss:$52 sps:$4 sm:$0xff]   ;;  %v2331_v10 = vld [vmem:[%s2929_s5 + $0x27c] ss:$52 sps:$4 sm:$0xff]  }
  0x81   : > { %1524 = vmatprep.subr.bf16.mxu0 %v2268_v48  ;;  %v2289_v11 = vld [vmem:[%s2929_s5 + $0x414] ss:$52 sps:$4 sm:$0xff]   ;;  %v2333_v12 = vld [vmem:[%s2929_s5 + $0x278] ss:$52 sps:$4 sm:$0xff]   ;;  %v2291_v13 = vld [vmem:[%s2929_s5 + $0x410] ss:$52 sps:$4 sm:$0xff]  }
  0x82   : > { %v2337_v14 = vld [vmem:[%s2929_s5 + $0x2e4] ss:$52 sps:$4 sm:$0xff]   ;;  %v2294_v15 = vld [vmem:[%s2929_s5 + $0x47c] ss:$52 sps:$4 sm:$0xff]   ;;  %v2339_v16 = vld [vmem:[%s2929_s5 + $0x2e0] ss:$52 sps:$4 sm:$0xff]  }
  0x83   : > { %1566 = vmatpush1.bf16.msra.mxu1 %v2309_v60  ;;  %v2297_v17 = vld [vmem:[%s2929_s5 + $0x478] ss:$52 sps:$4 sm:$0xff]   ;;  %v2306_v19 = vld [vmem:[%s2929_s5 + $0x14] ss:$52 sps:$4 sm:$0xff]   ;;  %v2304_v22 = vld [vmem:[%s2929_s5 + $0x10] ss:$52 sps:$4 sm:$0xff]  }
  0x84   : > { %1525 = vmatpush1.bf16.msra.mxu0 %v2270_v49  ;;  %1567 = vmatprep.subr.bf16.mxu1 %v2313_v62  ;;  %v2343_v18 = vld [vmem:[%s2929_s5 + $0x34c] ss:$52 sps:$4 sm:$0xff]   ;;  %v2345_v21 = vld [vmem:[%s2929_s5 + $0x348] ss:$52 sps:$4 sm:$0xff]   ;;  %v2351_v25 = vld [vmem:[%s2929_s5 + $0x3b0] ss:$52 sps:$4 sm:$0xff]  }
  0x85   : > { %1526 = vmatprep.subr.bf16.mxu0 %v2271_v50  ;;  %v2349_v23 = vld [vmem:[%s2929_s5 + $0x3b4] ss:$52 sps:$4 sm:$0xff]   ;;  %v2312_v24 = vld [vmem:[%s2929_s5 + $0x7c] ss:$52 sps:$4 sm:$0xff]   ;;  %v2310_v26 = vld [vmem:[%s2929_s5 + $0x78] ss:$52 sps:$4 sm:$0xff]  }
  0x86   : > { %v2355_v27 = vld [vmem:[%s2929_s5 + $0x41c] ss:$52 sps:$4 sm:$0xff]   ;;  %v2318_v28 = vld [vmem:[%s2929_s5 + $0xe4] ss:$52 sps:$4 sm:$0xff]   ;;  %v2316_v30 = vld [vmem:[%s2929_s5 + $0xe0] ss:$52 sps:$4 sm:$0xff]  }
  0x87   : > { %1568 = vmatpush1.bf16.msra.mxu1 %v2315_v0  ;;  %v2357_v29 = vld [vmem:[%s2929_s5 + $0x418] ss:$52 sps:$4 sm:$0xff]   ;;  %v2363_v33 = vld [vmem:[%s2929_s5 + $0x480] ss:$52 sps:$4 sm:$0xff]   ;;  %v2322_v34 = vld [vmem:[%s2929_s5 + $0x148] ss:$52 sps:$4 sm:$0xff]  }
  0x88   : > { %1527 = vmatpush1.bf16.msra.mxu0 %v2273_v51  ;;  %1569 = vmatprep.subr.bf16.mxu1 %v2319_v2  ;;  %v2361_v31 = vld [vmem:[%s2929_s5 + $0x484] ss:$52 sps:$4 sm:$0xff]   ;;  %v2324_v32 = vld [vmem:[%s2929_s5 + $0x14c] ss:$52 sps:$4 sm:$0xff]   ;;  %v2369_v35 = vld [vmem:[%s2929_s5 + $0x1c] ss:$52 sps:$4 sm:$0xff]  }
  0x89   : > { %1528 = vmatprep.subr.bf16.mxu0 %v2274_v53  ;;  %v2330_v36 = vld [vmem:[%s2929_s5 + $0x1b4] ss:$52 sps:$4 sm:$0xff]   ;;  %v2367_v37 = vld [vmem:[%s2929_s5 + $0x18] ss:$52 sps:$4 sm:$0xff]   ;;  %v2328_v38 = vld [vmem:[%s2929_s5 + $0x1b0] ss:$52 sps:$4 sm:$0xff]  }
  0x8a   : > { %v2375_v39 = vld [vmem:[%s2929_s5 + $0x84] ss:$52 sps:$4 sm:$0xff]   ;;  %v2336_v41 = vld [vmem:[%s2929_s5 + $0x21c] ss:$52 sps:$4 sm:$0xff]   ;;  %v2373_v42 = vld [vmem:[%s2929_s5 + $0x80] ss:$52 sps:$4 sm:$0xff]  }
  0x8b   : > { %1570 = vmatpush1.bf16.msra.mxu1 %v2321_v4  ;;  %v2334_v44 = vld [vmem:[%s2929_s5 + $0x218] ss:$52 sps:$4 sm:$0xff]   ;;  %v2379_v47 = vld [vmem:[%s2929_s5 + $0xe8] ss:$52 sps:$4 sm:$0xff]   ;;  %v2340_v48 = vld [vmem:[%s2929_s5 + $0x280] ss:$52 sps:$4 sm:$0xff]  }
  0x8c   : > { %1529 = vmatpush1.bf16.msra.mxu0 %v2276_v57  ;;  %1571 = vmatprep.subr.bf16.mxu1 %v2325_v6  ;;  %v2381_v45 = vld [vmem:[%s2929_s5 + $0xec] ss:$52 sps:$4 sm:$0xff]   ;;  %v2342_v46 = vld [vmem:[%s2929_s5 + $0x284] ss:$52 sps:$4 sm:$0xff]   ;;  %v2387_v49 = vld [vmem:[%s2929_s5 + $0x154] ss:$52 sps:$4 sm:$0xff]  }
  0x8d   : > { %1530 = vmatprep.subr.bf16.mxu0 %v2277_v58  ;;  %v2348_v50 = vld [vmem:[%s2929_s5 + $0x2ec] ss:$52 sps:$4 sm:$0xff]   ;;  %v2346_v52 = vld [vmem:[%s2929_s5 + $0x2e8] ss:$52 sps:$4 sm:$0xff]   ;;  %v2385_v53 = vld [vmem:[%s2929_s5 + $0x150] ss:$52 sps:$4 sm:$0xff]  }
  0x8e   : > { %v701_v51 = vld [vmem:[%s3261_s2] sm:$0xff]  ;;  %v2393_v54 = vld [vmem:[%s2929_s5 + $0x1bc] ss:$52 sps:$4 sm:$0xff]   ;;  %v2354_v55 = vld [vmem:[%s2929_s5 + $0x354] ss:$52 sps:$4 sm:$0xff]   ;;  %s3138_s18 = scalar_lea.vmem [#allocation3], %s2232_s17 }
  0x8f   : > { %1572 = vmatpush1.bf16.msra.mxu1 %v2327_v8  ;;  %705 = vperm.xlu0 %2258, %v701_v51   ;;  %v702_v56 = vld [vmem:[%s3261_s2 + $0x8] sm:$0xff]  ;;  %v2352_v57 = vld [vmem:[%s2929_s5 + $0x350] ss:$52 sps:$4 sm:$0xff]   ;;  %v2397_v62 = vld [vmem:[%s2929_s5 + $0x220] ss:$52 sps:$4 sm:$0xff]   ;;  %s2229_s12 = smul.u32 (%p2565_p5), 104, %s2006_s15 }
  0x90   : > { %1531 = vmatpush1.bf16.msra.mxu0 %v2279_v61  ;;  %1573 = vmatprep.subr.bf16.mxu1 %v2331_v10  ;;  %v2391_v58 = vld [vmem:[%s2929_s5 + $0x1b8] ss:$52 sps:$4 sm:$0xff]   ;;  %v2360_v60 = vld [vmem:[%s2929_s5 + $0x3bc] ss:$52 sps:$4 sm:$0xff]   ;;  %v2364_v2 = vld [vmem:[%s2929_s5 + $0x420] ss:$52 sps:$4 sm:$0xff]  }
  0x91   : > { %1532 = vmatprep.subr.bf16.mxu0 %v2280_v63  ;;  %v2399_v59 = vld [vmem:[%s2929_s5 + $0x224] ss:$52 sps:$4 sm:$0xff]   ;;  %v2405_v63 = vld [vmem:[%s2929_s5 + $0x28c] ss:$52 sps:$4 sm:$0xff]   ;;  %v2438_v51 = vld [vmem:[%s2929_s5 + $0x434] ss:$52 sps:$4 sm:$0xff]   ;;  %s3201_s21 = scalar_lea.vmem (%p2565_p5), %s3262_s3, %s2229_s12 }
  0x92   : > { %v2358_v61 = vld [vmem:[%s2929_s5 + $0x3b8] ss:$52 sps:$4 sm:$0xff]   ;;  %v2409_v6 = vld [vmem:[%s2929_s5 + $0x2f0] ss:$52 sps:$4 sm:$0xff]  }
  0x93   : > { %1574 = vmatpush1.bf16.msra.mxu1 %v2333_v12  ;;  %710 = vperm.xlu0 %2258, %v702_v56   ;;  %v2366_v0 = vld [vmem:[%s2929_s5 + $0x424] ss:$52 sps:$4 sm:$0xff]   ;;  %v2372_v4 = vld [vmem:[%s2929_s5 + $0x48c] ss:$52 sps:$4 sm:$0xff]  }
  0x94   : > { %1533 = vmatpush1.bf16.msra.mxu0 %v2282_v1  ;;  %1575 = vmatprep.subr.bf16.mxu1 %v2337_v14  ;;  %v2403_v1 = vld [vmem:[%s2929_s5 + $0x288] ss:$52 sps:$4 sm:$0xff]   ;;  %v2378_v8 = vld [vmem:[%s2929_s5 + $0x24] ss:$52 sps:$4 sm:$0xff]   ;;  %v2384_v12 = vld [vmem:[%s2929_s5 + $0x8c] ss:$52 sps:$4 sm:$0xff]  }
  0x95   : > { %1534 = vmatprep.subr.bf16.mxu0 %v2283_v3  ;;  %v2411_v3 = vld [vmem:[%s2929_s5 + $0x2f4] ss:$52 sps:$4 sm:$0xff]   ;;  %v2415_v10 = vld [vmem:[%s2929_s5 + $0x358] ss:$52 sps:$4 sm:$0xff]  }
  0x96   : > { %v2382_v14 = vld [vmem:[%s2929_s5 + $0x88] ss:$52 sps:$4 sm:$0xff]   ;;  %v2469_v56 = vld [vmem:[%s2929_s5 + $0x300] ss:$52 sps:$4 sm:$0xff]  }
  0x97   : > { %1576 = vmatpush1.bf16.msra.mxu1 %v2339_v16  ;;  %v2390_v16 = vld [vmem:[%s2929_s5 + $0xf4] ss:$52 sps:$4 sm:$0xff]  }
  0x98   : > { %1535 = vmatpush1.bf16.msra.mxu0 %v2285_v5  ;;  %1577 = vmatprep.subr.bf16.mxu1 %v2343_v18  ;;  %v2370_v5 = vld [vmem:[%s2929_s5 + $0x488] ss:$52 sps:$4 sm:$0xff]  }
  0x99   : > { %1536 = vmatprep.subr.bf16.mxu0 %v2286_v7  ;;  %v2417_v7 = vld [vmem:[%s2929_s5 + $0x35c] ss:$52 sps:$4 sm:$0xff]  }
  0x9a   : > { %v2427_v18 = vld [vmem:[%s2929_s5 + $0x428] ss:$52 sps:$4 sm:$0xff]  }
  0x9b   : > { %1578 = vmatpush1.bf16.msra.mxu1 %v2345_v21  ;;  %v2396_v21 = vld [vmem:[%s2929_s5 + $0x15c] ss:$52 sps:$4 sm:$0xff]  }
  0x9c   : > { %1537 = vmatpush1.bf16.msra.mxu0 %v2288_v9  ;;  %1579 = vmatprep.subr.bf16.mxu1 %v2349_v23  ;;  %v2376_v9 = vld [vmem:[%s2929_s5 + $0x20] ss:$52 sps:$4 sm:$0xff]   ;;  %v2433_v23 = vld [vmem:[%s2929_s5 + $0x490] ss:$52 sps:$4 sm:$0xff]  }
  0x9d   : > { %1538 = vmatprep.subr.bf16.mxu0 %v2289_v11  ;;  %v2423_v11 = vld [vmem:[%s2929_s5 + $0x3c4] ss:$52 sps:$4 sm:$0xff]  }
  0x9f   : > { %1580 = vmatpush1.bf16.msra.mxu1 %v2351_v25  ;;  %v2402_v25 = vld [vmem:[%s2929_s5 + $0x1c4] ss:$52 sps:$4 sm:$0xff]  }
  0xa0   : > { %1539 = vmatpush1.bf16.msra.mxu0 %v2291_v13  ;;  %1581 = vmatprep.subr.bf16.mxu1 %v2355_v27  ;;  %v2421_v13 = vld [vmem:[%s2929_s5 + $0x3c0] ss:$52 sps:$4 sm:$0xff]  }
  0xa1   : > { %1540 = vmatprep.subr.bf16.mxu0 %v2294_v15  ;;  %v2429_v15 = vld [vmem:[%s2929_s5 + $0x42c] ss:$52 sps:$4 sm:$0xff]  }
  0xa2   : > { %v2400_v27 = vld [vmem:[%s2929_s5 + $0x1c0] ss:$52 sps:$4 sm:$0xff]  }
  0xa3   : > { %1582 = vmatpush1.bf16.msra.mxu1 %v2357_v29  ;;  %v2408_v29 = vld [vmem:[%s2929_s5 + $0x22c] ss:$52 sps:$4 sm:$0xff]  }
  0xa4   : > { %1541 = vmatpush1.bf16.msra.mxu0 %v2297_v17  ;;  %1583 = vmatprep.subr.bf16.mxu1 %v2361_v31  ;;  %v2388_v17 = vld [vmem:[%s2929_s5 + $0xf0] ss:$52 sps:$4 sm:$0xff]   ;;  %v2406_v31 = vld [vmem:[%s2929_s5 + $0x228] ss:$52 sps:$4 sm:$0xff]  }
  0xa5   : > { %1604 = vmatprep.subr.bf16.mxu0 %v2306_v19  ;;  %v2435_v19 = vld [vmem:[%s2929_s5 + $0x494] ss:$52 sps:$4 sm:$0xff]  }
  0xa7   : > { %1551 = vmatmul.mubr.bf16.vlgmr.msra.gmra.mrb[0].mxu0 %v2977_v20  ;;  %1584 = vmatpush1.bf16.msra.mxu1 %v2363_v33  ;;  %v2414_v33 = vld [vmem:[%s2929_s5 + $0x294] ss:$52 sps:$4 sm:$0xff]  }
  0xa8   : > { %1605 = vmatpush1.bf16.msra.mxu0 %v2304_v22  ;;  %2220 = vmatprep.mubr.msk.bf16.mxu0 %vm1514_vm0, %v2921_v40  ;;  %v2394_v22 = vld [vmem:[%s2929_s5 + $0x158] ss:$52 sps:$4 sm:$0xff]  }
  0xa9   : > { %1606 = vmatprep.subr.bf16.mxu0 %v2312_v24  ;;  %1647 = vmatprep.subr.bf16.mxu1 %v2369_v35  ;;  %v2441_v24 = vld [vmem:[%s2929_s5 + $0x2c] ss:$52 sps:$4 sm:$0xff]   ;;  %v2412_v35 = vld [vmem:[%s2929_s5 + $0x290] ss:$52 sps:$4 sm:$0xff]  }
  0xaa   : > { %1594 = vmatmul.mubr.bf16.vlgmr.msra.gmra.mrb[0].mxu1 %v2977_v20 }
  0xab   : > { %1648 = vmatpush1.bf16.msra.mxu1 %v2367_v37  ;;  %2221 = vmatprep.mubr.msk.bf16.mxu1 %vm1514_vm0, %v2921_v40  ;;  %v2420_v37 = vld [vmem:[%s2929_s5 + $0x2fc] ss:$52 sps:$4 sm:$0xff]  }
  0xac   : > { %1607 = vmatpush1.bf16.msra.mxu0 %v2310_v26  ;;  %1649 = vmatprep.subr.bf16.mxu1 %v2375_v39  ;;  %v2439_v26 = vld [vmem:[%s2929_s5 + $0x28] ss:$52 sps:$4 sm:$0xff]   ;;  %v2418_v39 = vld [vmem:[%s2929_s5 + $0x2f8] ss:$52 sps:$4 sm:$0xff]  }
  0xad   : > { %1608 = vmatprep.subr.bf16.mxu0 %v2318_v28  ;;  %v2447_v28 = vld [vmem:[%s2929_s5 + $0x94] ss:$52 sps:$4 sm:$0xff]  }
  0xaf   : > { %1650 = vmatpush1.bf16.msra.mxu1 %v2373_v42  ;;  %v2426_v42 = vld [vmem:[%s2929_s5 + $0x364] ss:$52 sps:$4 sm:$0xff]  }
  0xb0   : > { %1609 = vmatpush1.bf16.msra.mxu0 %v2316_v30  ;;  %1651 = vmatprep.subr.bf16.mxu1 %v2381_v45  ;;  %v2445_v30 = vld [vmem:[%s2929_s5 + $0x90] ss:$52 sps:$4 sm:$0xff]   ;;  %v2424_v45 = vld [vmem:[%s2929_s5 + $0x360] ss:$52 sps:$4 sm:$0xff]  }
  0xb1   : > { %1610 = vmatprep.subr.bf16.mxu0 %v2324_v32  ;;  %v2451_v32 = vld [vmem:[%s2929_s5 + $0xfc] ss:$52 sps:$4 sm:$0xff]  }
  0xb3   : > { %1652 = vmatpush1.bf16.msra.mxu1 %v2379_v47  ;;  %v2432_v47 = vld [vmem:[%s2929_s5 + $0x3cc] ss:$52 sps:$4 sm:$0xff]  }
  0xb4   : > { %1611 = vmatpush1.bf16.msra.mxu0 %v2322_v34  ;;  %1653 = vmatprep.subr.bf16.mxu1 %v2387_v49  ;;  %v2449_v34 = vld [vmem:[%s2929_s5 + $0xf8] ss:$52 sps:$4 sm:$0xff]   ;;  %v2430_v49 = vld [vmem:[%s2929_s5 + $0x3c8] ss:$52 sps:$4 sm:$0xff]  }
  0xb5   : > { %1612 = vmatprep.subr.bf16.mxu0 %v2330_v36  ;;  %v2455_v36 = vld [vmem:[%s2929_s5 + $0x164] ss:$52 sps:$4 sm:$0xff]  }
  0xb7   : > { %1654 = vmatpush1.bf16.msra.mxu1 %v2385_v53  ;;  %v2436_v53 = vld [vmem:[%s2929_s5 + $0x430] ss:$52 sps:$4 sm:$0xff]  }
  0xb8   : > { %1613 = vmatpush1.bf16.msra.mxu0 %v2328_v38  ;;  %1655 = vmatprep.subr.bf16.mxu1 %v2393_v54  ;;  %v2453_v38 = vld [vmem:[%s2929_s5 + $0x160] ss:$52 sps:$4 sm:$0xff]   ;;  %v2471_v54 = vld [vmem:[%s2929_s5 + $0x304] ss:$52 sps:$4 sm:$0xff]  }
  0xb9   : > { %1614 = vmatprep.subr.bf16.mxu0 %v2336_v41  ;;  %v2459_v41 = vld [vmem:[%s2929_s5 + $0x1cc] ss:$52 sps:$4 sm:$0xff]  }
  0xbb   : > { %1656 = vmatpush1.bf16.msra.mxu1 %v2391_v58  ;;  %v2475_v58 = vld [vmem:[%s2929_s5 + $0x36c] ss:$52 sps:$4 sm:$0xff]  }
  0xbc   : > { %1615 = vmatpush1.bf16.msra.mxu0 %v2334_v44  ;;  %1657 = vmatprep.subr.bf16.mxu1 %v2399_v59  ;;  %v2457_v44 = vld [vmem:[%s2929_s5 + $0x1c8] ss:$52 sps:$4 sm:$0xff]  }
  0xbd   : > { %1616 = vmatprep.subr.bf16.mxu0 %v2342_v46  ;;  %v2463_v46 = vld [vmem:[%s2929_s5 + $0x234] ss:$52 sps:$4 sm:$0xff]  }
  0xbe   : > { %v2473_v59 = vld [vmem:[%s2929_s5 + $0x368] ss:$52 sps:$4 sm:$0xff]  }
  0xbf   : > { %1658 = vmatpush1.bf16.msra.mxu1 %v2397_v62  ;;  %v2477_v62 = vld [vmem:[%s2929_s5 + $0x3d0] ss:$52 sps:$4 sm:$0xff]  }
  0xc0   : > { %1617 = vmatpush1.bf16.msra.mxu0 %v2340_v48  ;;  %1659 = vmatprep.subr.bf16.mxu1 %v2405_v63  ;;  %v2461_v48 = vld [vmem:[%s2929_s5 + $0x230] ss:$52 sps:$4 sm:$0xff]   ;;  %v2452_v63 = vld [vmem:[%s2929_s5 + $0x98] ss:$52 sps:$4 sm:$0xff]  }
  0xc1   : > { %1618 = vmatprep.subr.bf16.mxu0 %v2348_v50  ;;  %v2467_v50 = vld [vmem:[%s2929_s5 + $0x29c] ss:$52 sps:$4 sm:$0xff]  }
  0xc3   : > { %1660 = vmatpush1.bf16.msra.mxu1 %v2403_v1  ;;  %v2481_v1 = vld [vmem:[%s2929_s5 + $0x438] ss:$52 sps:$4 sm:$0xff]  }
  0xc4   : > { %1619 = vmatpush1.bf16.msra.mxu0 %v2346_v52  ;;  %1661 = vmatprep.subr.bf16.mxu1 %v2411_v3  ;;  %v2465_v52 = vld [vmem:[%s2929_s5 + $0x298] ss:$52 sps:$4 sm:$0xff]  }
  0xc5   : > { %1620 = vmatprep.subr.bf16.mxu0 %v2354_v55  ;;  %v2444_v55 = vld [vmem:[%s2929_s5 + $0x49c] ss:$52 sps:$4 sm:$0xff]   ;;  %v2487_v3 = vld [vmem:[%s2929_s5 + $0x4a4] ss:$52 sps:$4 sm:$0xff]  }
  0xc7   : > { %1662 = vmatpush1.bf16.msra.mxu1 %v2409_v6  ;;  %v2468_v6 = vld [vmem:[%s2929_s5 + $0x238] ss:$52 sps:$4 sm:$0xff]  }
  0xc8   : > { %1621 = vmatpush1.bf16.msra.mxu0 %v2352_v57  ;;  %1663 = vmatprep.subr.bf16.mxu1 %v2417_v7  ;;  %v2442_v57 = vld [vmem:[%s2929_s5 + $0x498] ss:$52 sps:$4 sm:$0xff]   ;;  %v2472_v7 = vld [vmem:[%s2929_s5 + $0x2a0] ss:$52 sps:$4 sm:$0xff]  }
  0xc9   : > { %1622 = vmatprep.subr.bf16.mxu0 %v2360_v60  ;;  %v2448_v60 = vld [vmem:[%s2929_s5 + $0x30] ss:$52 sps:$4 sm:$0xff]  }
  0xcb   : > { %1664 = vmatpush1.bf16.msra.mxu1 %v2415_v10  ;;  %v2484_v10 = vld [vmem:[%s2929_s5 + $0x3d8] ss:$52 sps:$4 sm:$0xff]  }
  0xcc   : > { %1623 = vmatpush1.bf16.msra.mxu0 %v2358_v61  ;;  %1665 = vmatprep.subr.bf16.mxu1 %v2423_v11  ;;  %v2479_v61 = vld [vmem:[%s2929_s5 + $0x3d4] ss:$52 sps:$4 sm:$0xff]  }
  0xcd   : > { %1624 = vmatprep.subr.bf16.mxu0 %v2366_v0  ;;  %v2483_v0 = vld [vmem:[%s2929_s5 + $0x43c] ss:$52 sps:$4 sm:$0xff]   ;;  %v2488_v11 = vld [vmem:[%s2929_s5 + $0x440] ss:$52 sps:$4 sm:$0xff]  }
  0xcf   : > { %1666 = vmatpush1.bf16.msra.mxu1 %v2421_v13 }
  0xd0   : > { %1625 = vmatpush1.bf16.msra.mxu0 %v2364_v2  ;;  %1667 = vmatprep.subr.bf16.mxu1 %v2429_v15  ;;  %v2456_v2 = vld [vmem:[%s2929_s5 + $0x100] ss:$52 sps:$4 sm:$0xff]  }
  0xd1   : > { %1626 = vmatprep.subr.bf16.mxu0 %v2372_v4  ;;  %v2485_v4 = vld [vmem:[%s2929_s5 + $0x4a0] ss:$52 sps:$4 sm:$0xff]  }
  0xd3   : > { %1668 = vmatpush1.bf16.msra.mxu1 %v2427_v18 }
  0xd4   : > { %1627 = vmatpush1.bf16.msra.mxu0 %v2370_v5  ;;  %1669 = vmatprep.subr.bf16.mxu1 %v2435_v19  ;;  %v2460_v5 = vld [vmem:[%s2929_s5 + $0x168] ss:$52 sps:$4 sm:$0xff]  }
  0xd5   : > { %1690 = vmatprep.subr.bf16.mxu0 %v2378_v8  ;;  %v2476_v8 = vld [vmem:[%s2929_s5 + $0x308] ss:$52 sps:$4 sm:$0xff]  }
  0xd7   : > { %1637 = vmatmul.mubr.bf16.vlgmr.msra.gmra.mrb[4].mxu0 %v2977_v20  ;;  %1670 = vmatpush1.bf16.msra.mxu1 %v2433_v23 }
  0xd8   : > { %1691 = vmatpush1.bf16.msra.mxu0 %v2376_v9  ;;  %2222 = vmatprep.mubr.msk.bf16.mxu0 %vm1514_vm0, %v2921_v40  ;;  %v2480_v9 = vld [vmem:[%s2929_s5 + $0x370] ss:$52 sps:$4 sm:$0xff]  }
  0xd9   : > { %1692 = vmatprep.subr.bf16.mxu0 %v2384_v12  ;;  %1733 = vmatprep.subr.bf16.mxu1 %v2441_v24  ;;  %v2489_v12 = vld [vmem:[%s2929_s5 + $0x4a8] ss:$52 sps:$4 sm:$0xff]  }
  0xda   : > { %1680 = vmatmul.mubr.bf16.vlgmr.msra.gmra.mrb[4].mxu1 %v2977_v20 }
  0xdb   : > { %1734 = vmatpush1.bf16.msra.mxu1 %v2439_v26  ;;  %2223 = vmatprep.mubr.msk.bf16.mxu1 %vm1514_vm0, %v2921_v40 }
  0xdc   : > { %1693 = vmatpush1.bf16.msra.mxu0 %v2382_v14  ;;  %1735 = vmatprep.subr.bf16.mxu1 %v2447_v28 }
  0xdd   : > { %1694 = vmatprep.subr.bf16.mxu0 %v2390_v16 }
  0xdf   : > { %1736 = vmatpush1.bf16.msra.mxu1 %v2445_v30 }
  0xe0   : > { %1695 = vmatpush1.bf16.msra.mxu0 %v2388_v17  ;;  %1737 = vmatprep.subr.bf16.mxu1 %v2451_v32 }
  0xe1   : > { %1696 = vmatprep.subr.bf16.mxu0 %v2396_v21 }
  0xe3   : > { %1738 = vmatpush1.bf16.msra.mxu1 %v2449_v34 }
  0xe4   : > { %1697 = vmatpush1.bf16.msra.mxu0 %v2394_v22  ;;  %1739 = vmatprep.subr.bf16.mxu1 %v2455_v36 }
  0xe5   : > { %1698 = vmatprep.subr.bf16.mxu0 %v2402_v25 }
  0xe7   : > { %1740 = vmatpush1.bf16.msra.mxu1 %v2453_v38 }
  0xe8   : > { %1699 = vmatpush1.bf16.msra.mxu0 %v2400_v27  ;;  %1741 = vmatprep.subr.bf16.mxu1 %v2459_v41 }
  0xe9   : > { %1700 = vmatprep.subr.bf16.mxu0 %v2408_v29 }
  0xeb   : > { %1742 = vmatpush1.bf16.msra.mxu1 %v2457_v44 }
  0xec   : > { %1701 = vmatpush1.bf16.msra.mxu0 %v2406_v31  ;;  %1743 = vmatprep.subr.bf16.mxu1 %v2463_v46 }
  0xed   : > { %1702 = vmatprep.subr.bf16.mxu0 %v2414_v33 }
  0xef   : > { %1744 = vmatpush1.bf16.msra.mxu1 %v2461_v48 }
  0xf0   : > { %1703 = vmatpush1.bf16.msra.mxu0 %v2412_v35  ;;  %1745 = vmatprep.subr.bf16.mxu1 %v2467_v50 }
  0xf1   : > { %1704 = vmatprep.subr.bf16.mxu0 %v2420_v37 }
  0xf3   : > { %1746 = vmatpush1.bf16.msra.mxu1 %v2465_v52 }
  0xf4   : > { %1705 = vmatpush1.bf16.msra.mxu0 %v2418_v39  ;;  %1747 = vmatprep.subr.bf16.mxu1 %v2471_v54 }
  0xf5   : > { %1706 = vmatprep.subr.bf16.mxu0 %v2426_v42 }
  0xf7   : > { %1748 = vmatpush1.bf16.msra.mxu1 %v2469_v56 }
  0xf8   : > { %1707 = vmatpush1.bf16.msra.mxu0 %v2424_v45  ;;  %1749 = vmatprep.subr.bf16.mxu1 %v2475_v58 }
  0xf9   : > { %1708 = vmatprep.subr.bf16.mxu0 %v2432_v47 }
  0xfb   : > { %1750 = vmatpush1.bf16.msra.mxu1 %v2473_v59 }
  0xfc   : > { %1709 = vmatpush1.bf16.msra.mxu0 %v2430_v49  ;;  %1751 = vmatprep.subr.bf16.mxu1 %v2479_v61 }
  0xfd   : > { %1710 = vmatprep.subr.bf16.mxu0 %v2438_v51 }
  0xff   : > { %1752 = vmatpush1.bf16.msra.mxu1 %v2477_v62 }
 0x100   : > { %1711 = vmatpush1.bf16.msra.mxu0 %v2436_v53  ;;  %1753 = vmatprep.subr.bf16.mxu1 %v2483_v0 }
 0x101   : > { %1712 = vmatprep.subr.bf16.mxu0 %v2444_v55 }
 0x103   : > { %1754 = vmatpush1.bf16.msra.mxu1 %v2481_v1 }
 0x104   : > { %1713 = vmatpush1.bf16.msra.mxu0 %v2442_v57  ;;  %1755 = vmatprep.subr.bf16.mxu1 %v2487_v3 }
 0x105   : > { %1776 = vmatprep.subr.bf16.mxu0 %v2514_v43 }
 0x107   : > { %1723 = vmatmul.mubr.bf16.vlgmr.msra.gmra.mrb[8].mxu0 %v2977_v20  ;;  %1756 = vmatpush1.bf16.msra.mxu1 %v2485_v4 }
 0x108   : > { %1777 = vmatpush1.bf16.msra.mxu0 %v2448_v60  ;;  %2224 = vmatprep.mubr.msk.bf16.mxu0 %vm1514_vm0, %v2921_v40  ;;  %v2464_v40 = vld [vmem:[%s2929_s5 + $0x1d0] ss:$52 sps:$4 sm:$0xff]  }
 0x109   : > { %1778 = vmatprep.subr.bf16.mxu0 %v2514_v43 }
 0x10a   : > { %1766 = vmatmul.mubr.bf16.vlgmr.msra.gmra.mrb[8].mxu1 %v2977_v20 }
 0x10c   : > { %1779 = vmatpush1.bf16.msra.mxu0 %v2452_v63 }
 0x10d   : > { %1780 = vmatprep.subr.bf16.mxu0 %v2514_v43 }
 0x10e   : > { %v3128_v13 = vpop.permute.xlu0 %705 }
 0x110   : > { %1781 = vmatpush1.bf16.msra.mxu0 %v2456_v2 }
 0x111   : > { %1782 = vmatprep.subr.bf16.mxu0 %v2514_v43 }
 0x112   : > { %v3132_v15 = vpop.permute.xlu0 %710 }
 0x114   : > { %1783 = vmatpush1.bf16.msra.mxu0 %v2460_v5 }
 0x115   : > { %1784 = vmatprep.subr.bf16.mxu0 %v2514_v43 }
 0x118   : > { %1785 = vmatpush1.bf16.msra.mxu0 %v2464_v40 }
 0x119   : > { %1786 = vmatprep.subr.bf16.mxu0 %v2514_v43 }
 0x11c   : > { %1787 = vmatpush1.bf16.msra.mxu0 %v2468_v6 }
 0x11d   : > { %1788 = vmatprep.subr.bf16.mxu0 %v2514_v43 }
 0x120   : > { %1789 = vmatpush1.bf16.msra.mxu0 %v2472_v7 }
 0x121   : > { %1790 = vmatprep.subr.bf16.mxu0 %v2514_v43 }
 0x124   : > { %1791 = vmatpush1.bf16.msra.mxu0 %v2476_v8 }
 0x125   : > { %1792 = vmatprep.subr.bf16.mxu0 %v2514_v43 }
 0x128   : > { %1793 = vmatpush1.bf16.msra.mxu0 %v2480_v9 }
 0x129   : > { %1794 = vmatprep.subr.bf16.mxu0 %v2514_v43 }
 0x12c   : > { %1795 = vmatpush1.bf16.msra.mxu0 %v2484_v10 }
 0x12d   : > { %1796 = vmatprep.subr.bf16.mxu0 %v2514_v43 }
 0x130   : > { %1797 = vmatpush1.bf16.msra.mxu0 %v2488_v11 }
 0x131   : > { %1798 = vmatprep.subr.bf16.mxu0 %v2514_v43 }
 0x134   : > { %1799 = vmatpush1.bf16.msra.mxu0 %v2489_v12 }
 0x137   : > { %1809 = vmatmul.mubr.bf16.vlgmr.msra.gmra.mrb[12].mxu0 %v2977_v20 }
 0x17a   : > { %v1552_v14 = vpop.f32.mrb[0].mxu0 }
 0x17b   : > { %v1553_v16 = vadd.f32 %v1552_v14, %v3128_v13  ;;  %v1554_v17 = vpop.f32.mrb[1].mxu0 }
 0x17c   : > { %v1555_v18 = vadd.f32 %v1554_v17, %v3128_v13  ;;  %v1556_v19 = vpop.f32.mrb[2].mxu0 }
 0x17d   : > { %v1817_v21 = vmax.f32 %v1553_v16, 0.0  ;;  %v1557_v22 = vadd.f32 %v1556_v19, %v3132_v15  ;;  %v1558_v43 = vpop.f32.mrb[3].mxu0  ;;  %v1595_v26 = vpop.f32.mrb[0].mxu1 }
 0x17e   : > { %v1818_v23 = vmax.f32 %v1555_v18, 0.0  ;;  %v1559_v20 = vadd.f32 %v1558_v43, %v3132_v15  ;;  %v1596_v27 = vadd.f32 %v1595_v26, %v3128_v13  ;;  %v1597_v28 = vpop.f32.mrb[1].mxu1 }
 0x17f   : > { %1843 = vst [vmem:[%s3138_s18] sm:$0xff] %v1817_v21  ;;  %v1830_v24 = vmax.f32 %v1557_v22, 0.0  ;;  %v1598_v29 = vadd.f32 %v1597_v28, %v3128_v13  ;;  %v1599_v30 = vpop.f32.mrb[2].mxu1 }
 0x180   : > { %1844 = vst [vmem:[%s3138_s18 + $0x8] sm:$0xff] %v1818_v23  ;;  %v1831_v25 = vmax.f32 %v1559_v20, 0.0  ;;  %v1819_v31 = vmax.f32 %v1596_v27, 0.0  ;;  %v1600_v32 = vadd.f32 %v1599_v30, %v3132_v15  ;;  %v1601_v33 = vpop.f32.mrb[3].mxu1 }
 0x181   : > { %1856 = vst [vmem:[%s3138_s18 + $0x68] sm:$0xff] %v1830_v24  ;;  %v1820_v34 = vmax.f32 %v1598_v29, 0.0  ;;  %v1602_v35 = vadd.f32 %v1601_v33, %v3132_v15 }
 0x182   : > { %1857 = vst [vmem:[%s3138_s18 + $0x70] sm:$0xff] %v1831_v25  ;;  %1845 = vst [vmem:[%s3138_s18 + $0x10] sm:$0xff] %v1819_v31  ;;  %v1832_v36 = vmax.f32 %v1600_v32, 0.0 }
 0x183   : > { %1846 = vst [vmem:[%s3138_s18 + $0x18] sm:$0xff] %v1820_v34  ;;  %v1833_v37 = vmax.f32 %v1602_v35, 0.0 }
 0x184   : > { %1858 = vst [vmem:[%s3138_s18 + $0x78] sm:$0xff] %v1832_v36 }
 0x185   : > { %1859 = vst [vmem:[%s3138_s18 + $0x80] sm:$0xff] %v1833_v37 }
 0x189   : > { %v1895_v32 = vld [vmem:[%s3138_s18 + $0x10] sm:$0xff] (%p2565_p5) }
 0x18a   : > { %v1897_v33 = vld [vmem:[%s3138_s18 + $0x18] sm:$0xff] (%p2565_p5)  ;;  %1896 = vst [vmem:[%s3201_s21 + $0x10] sm:$0xff] (%p2565_p5), %v1895_v32 }
 0x18b   : > { %1898 = vst [vmem:[%s3201_s21 + $0x18] sm:$0xff] (%p2565_p5), %v1897_v33 }
 0x1aa   : > { %v1638_v38 = vpop.f32.mrb[4].mxu0 }
 0x1ab   : > { %v1639_v39 = vadd.f32 %v1638_v38, %v3128_v13  ;;  %v1640_v41 = vpop.f32.mrb[5].mxu0 }
 0x1ac   : > { %v1641_v42 = vadd.f32 %v1640_v41, %v3128_v13  ;;  %v1642_v44 = vpop.f32.mrb[6].mxu0 }
 0x1ad   : > { %v1821_v45 = vmax.f32 %v1639_v39, 0.0  ;;  %v1643_v46 = vadd.f32 %v1642_v44, %v3132_v15  ;;  %v1644_v47 = vpop.f32.mrb[7].mxu0  ;;  %v1681_v52 = vpop.f32.mrb[4].mxu1 }
 0x1ae   : > { %v1822_v48 = vmax.f32 %v1641_v42, 0.0  ;;  %v1645_v49 = vadd.f32 %v1644_v47, %v3132_v15  ;;  %v1682_v53 = vadd.f32 %v1681_v52, %v3128_v13  ;;  %v1683_v54 = vpop.f32.mrb[5].mxu1  ;;  %v1921_v47 = vld [vmem:[%s3138_s18 + $0x78] sm:$0xff] (%p2565_p5) }
 0x1af   : > { %1847 = vst [vmem:[%s3138_s18 + $0x20] sm:$0xff] %v1821_v45  ;;  %v1834_v50 = vmax.f32 %v1643_v46, 0.0  ;;  %v1684_v55 = vadd.f32 %v1683_v54, %v3128_v13  ;;  %v1685_v56 = vpop.f32.mrb[6].mxu1  ;;  %v1917_v45 = vld [vmem:[%s3138_s18 + $0x68] sm:$0xff] (%p2565_p5)  ;;  %v1919_v46 = vld [vmem:[%s3138_s18 + $0x70] sm:$0xff] (%p2565_p5)  ;;  %1922 = vst [vmem:[%s3201_s21 + $0x1b0] sm:$0xff] (%p2565_p5), %v1921_v47 }
 0x1b0   : > { %1848 = vst [vmem:[%s3138_s18 + $0x28] sm:$0xff] %v1822_v48  ;;  %v1835_v51 = vmax.f32 %v1645_v49, 0.0  ;;  %v1823_v57 = vmax.f32 %v1682_v53, 0.0  ;;  %v1686_v58 = vadd.f32 %v1685_v56, %v3132_v15  ;;  %v1687_v59 = vpop.f32.mrb[7].mxu1  ;;  %1918 = vst [vmem:[%s3201_s21 + $0x1a0] sm:$0xff] (%p2565_p5), %v1917_v45  ;;  %v1923_v48 = vld [vmem:[%s3138_s18 + $0x80] sm:$0xff] (%p2565_p5) }
 0x1b1   : > { %1860 = vst [vmem:[%s3138_s18 + $0x88] sm:$0xff] %v1834_v50  ;;  %v1824_v60 = vmax.f32 %v1684_v55, 0.0  ;;  %v1688_v61 = vadd.f32 %v1687_v59, %v3132_v15  ;;  %1920 = vst [vmem:[%s3201_s21 + $0x1a8] sm:$0xff] (%p2565_p5), %v1919_v46 }
 0x1b2   : > { %1861 = vst [vmem:[%s3138_s18 + $0x90] sm:$0xff] %v1835_v51  ;;  %1849 = vst [vmem:[%s3138_s18 + $0x30] sm:$0xff] %v1823_v57  ;;  %v1836_v62 = vmax.f32 %v1686_v58, 0.0 }
 0x1b3   : > { %1850 = vst [vmem:[%s3138_s18 + $0x38] sm:$0xff] %v1824_v60  ;;  %v1837_v63 = vmax.f32 %v1688_v61, 0.0  ;;  %1924 = vst [vmem:[%s3201_s21 + $0x1b8] sm:$0xff] (%p2565_p5), %v1923_v48 }
 0x1b4   : > { %1862 = vst [vmem:[%s3138_s18 + $0x98] sm:$0xff] %v1836_v62 }
 0x1b5   : > { %1863 = vst [vmem:[%s3138_s18 + $0xa0] sm:$0xff] %v1837_v63 }
 0x1b6   : > { %v1899_v34 = vld [vmem:[%s3138_s18 + $0x20] sm:$0xff] (%p2565_p5) }
 0x1b7   : > { %v1901_v35 = vld [vmem:[%s3138_s18 + $0x28] sm:$0xff] (%p2565_p5)  ;;  %1900 = vst [vmem:[%s3201_s21 + $0x20] sm:$0xff] (%p2565_p5), %v1899_v34 }
 0x1b8   : > { %1902 = vst [vmem:[%s3201_s21 + $0x28] sm:$0xff] (%p2565_p5), %v1901_v35  ;;  %v1925_v49 = vld [vmem:[%s3138_s18 + $0x88] sm:$0xff] (%p2565_p5) }
 0x1b9   : > { %v1903_v36 = vld [vmem:[%s3138_s18 + $0x30] sm:$0xff] (%p2565_p5)  ;;  %1926 = vst [vmem:[%s3201_s21 + $0x1c0] sm:$0xff] (%p2565_p5), %v1925_v49 }
 0x1ba   : > { %v1905_v37 = vld [vmem:[%s3138_s18 + $0x38] sm:$0xff] (%p2565_p5)  ;;  %1904 = vst [vmem:[%s3201_s21 + $0x30] sm:$0xff] (%p2565_p5), %v1903_v36  ;;  %v1927_v50 = vld [vmem:[%s3138_s18 + $0x90] sm:$0xff] (%p2565_p5) }
 0x1bb   : > { %1906 = vst [vmem:[%s3201_s21 + $0x38] sm:$0xff] (%p2565_p5), %v1905_v37  ;;  %v1929_v51 = vld [vmem:[%s3138_s18 + $0x98] sm:$0xff] (%p2565_p5)  ;;  %1928 = vst [vmem:[%s3201_s21 + $0x1c8] sm:$0xff] (%p2565_p5), %v1927_v50 }
 0x1bc   : > { %v1931_v52 = vld [vmem:[%s3138_s18 + $0xa0] sm:$0xff] (%p2565_p5)  ;;  %1930 = vst [vmem:[%s3201_s21 + $0x1d0] sm:$0xff] (%p2565_p5), %v1929_v51 }
 0x1bd   : > { %1932 = vst [vmem:[%s3201_s21 + $0x1d8] sm:$0xff] (%p2565_p5), %v1931_v52 }
 0x1da   : > { %v1724_v0 = vpop.f32.mrb[8].mxu0 }
 0x1db   : > { %v1725_v1 = vadd.f32 %v1724_v0, %v3128_v13  ;;  %v1726_v2 = vpop.f32.mrb[9].mxu0 }
 0x1dc   : > { %v1727_v3 = vadd.f32 %v1726_v2, %v3128_v13  ;;  %v1728_v4 = vpop.f32.mrb[10].mxu0 }
 0x1dd   : > { %v1825_v5 = vmax.f32 %v1725_v1, 0.0  ;;  %v1729_v40 = vadd.f32 %v1728_v4, %v3132_v15  ;;  %v1730_v6 = vpop.f32.mrb[11].mxu0  ;;  %v1767_v11 = vpop.f32.mrb[8].mxu1 }
 0x1de   : > { %v1826_v7 = vmax.f32 %v1727_v3, 0.0  ;;  %v1731_v8 = vadd.f32 %v1730_v6, %v3132_v15  ;;  %v1768_v12 = vadd.f32 %v1767_v11, %v3128_v13  ;;  %v1769_v14 = vpop.f32.mrb[9].mxu1 }
 0x1df   : > { %1851 = vst [vmem:[%s3138_s18 + $0x40] sm:$0xff] %v1825_v5  ;;  %v1838_v9 = vmax.f32 %v1729_v40, 0.0  ;;  %v1770_v16 = vadd.f32 %v1769_v14, %v3128_v13  ;;  %v1771_v17 = vpop.f32.mrb[10].mxu1 }
 0x1e0   : > { %1852 = vst [vmem:[%s3138_s18 + $0x48] sm:$0xff] %v1826_v7  ;;  %v1839_v10 = vmax.f32 %v1731_v8, 0.0  ;;  %v1827_v18 = vmax.f32 %v1768_v12, 0.0  ;;  %v1772_v19 = vadd.f32 %v1771_v17, %v3132_v15  ;;  %v1773_v21 = vpop.f32.mrb[11].mxu1 }
 0x1e1   : > { %1864 = vst [vmem:[%s3138_s18 + $0xa8] sm:$0xff] %v1838_v9  ;;  %v1828_v22 = vmax.f32 %v1770_v16, 0.0  ;;  %v1774_v43 = vadd.f32 %v1773_v21, %v3132_v15 }
 0x1e2   : > { %1865 = vst [vmem:[%s3138_s18 + $0xb0] sm:$0xff] %v1839_v10  ;;  %1853 = vst [vmem:[%s3138_s18 + $0x50] sm:$0xff] %v1827_v18  ;;  %v1840_v23 = vmax.f32 %v1772_v19, 0.0 }
 0x1e3   : > { %1854 = vst [vmem:[%s3138_s18 + $0x58] sm:$0xff] %v1828_v22  ;;  %v1841_v20 = vmax.f32 %v1774_v43, 0.0 }
 0x1e4   : > { %1866 = vst [vmem:[%s3138_s18 + $0xb8] sm:$0xff] %v1840_v23 }
 0x1e5   : > { %1867 = vst [vmem:[%s3138_s18 + $0xc0] sm:$0xff] %v1841_v20 }
 0x1e6   : > { %v1907_v38 = vld [vmem:[%s3138_s18 + $0x40] sm:$0xff] (%p2565_p5) }
 0x1e7   : > { %1908 = vst [vmem:[%s3201_s21 + $0x40] sm:$0xff] (%p2565_p5), %v1907_v38  ;;  %v1909_v39 = vld [vmem:[%s3138_s18 + $0x48] sm:$0xff] (%p2565_p5) }
 0x1e8   : > { %1910 = vst [vmem:[%s3201_s21 + $0x48] sm:$0xff] (%p2565_p5), %v1909_v39  ;;  %v1933_v53 = vld [vmem:[%s3138_s18 + $0xa8] sm:$0xff] (%p2565_p5) }
 0x1e9   : > { %v1911_v41 = vld [vmem:[%s3138_s18 + $0x50] sm:$0xff] (%p2565_p5)  ;;  %1934 = vst [vmem:[%s3201_s21 + $0x1e0] sm:$0xff] (%p2565_p5), %v1933_v53 }
 0x1ea   : > { %v1913_v42 = vld [vmem:[%s3138_s18 + $0x58] sm:$0xff] (%p2565_p5)  ;;  %1912 = vst [vmem:[%s3201_s21 + $0x50] sm:$0xff] (%p2565_p5), %v1911_v41  ;;  %v1935_v54 = vld [vmem:[%s3138_s18 + $0xb0] sm:$0xff] (%p2565_p5) }
 0x1eb   : > { %1914 = vst [vmem:[%s3201_s21 + $0x58] sm:$0xff] (%p2565_p5), %v1913_v42  ;;  %v1937_v55 = vld [vmem:[%s3138_s18 + $0xb8] sm:$0xff] (%p2565_p5)  ;;  %1936 = vst [vmem:[%s3201_s21 + $0x1e8] sm:$0xff] (%p2565_p5), %v1935_v54 }
 0x1ec   : > { %1938 = vst [vmem:[%s3201_s21 + $0x1f0] sm:$0xff] (%p2565_p5), %v1937_v55  ;;  %v1939_v56 = vld [vmem:[%s3138_s18 + $0xc0] sm:$0xff] (%p2565_p5) }
 0x1ed   : > { %1940 = vst [vmem:[%s3201_s21 + $0x1f8] sm:$0xff] (%p2565_p5), %v1939_v56 }
 0x20a   : > { %v1810_v24 = vpop.f32.mrb[12].mxu0 }
 0x20b   : > { %v1811_v25 = vadd.f32 %v1810_v24, %v3128_v13  ;;  %v1812_v26 = vpop.f32.mrb[13].mxu0  ;;  %1875 = sbr.rel (!%p2565_p5) target bundleno = 538 (0x21a), region = 62  ;;  %v1891_v13 = vld [vmem:[%s3138_s18] sm:$0xff] (%p2565_p5) }
 0x20c   : > { %v1813_v27 = vpop.f32.mrb[14].mxu0  ;;  %1892 = vst [vmem:[%s3201_s21] sm:$0xff] (%p2565_p5), %v1891_v13 }
 0x20d   : > { %v1829_v28 = vmax.f32 %v1811_v25, 0.0  ;;  %v1814_v29 = vadd.f32 %v1813_v27, %v3132_v15  ;;  %v1815_v30 = vpop.f32.mrb[15].mxu0  ;;  %v1893_v15 = vld [vmem:[%s3138_s18 + $0x8] sm:$0xff] (%p2565_p5) }
 0x20e   : > { %1894 = vst [vmem:[%s3201_s21 + $0x8] sm:$0xff] (%p2565_p5), %v1893_v15 }
 0x20f   : > { %1855 = vst [vmem:[%s3138_s18 + $0x60] sm:$0xff] %v1829_v28  ;;  %v1842_v31 = vmax.f32 %v1814_v29, 0.0 }
 0x211   : > { %1868 = vst [vmem:[%s3138_s18 + $0xc8] sm:$0xff] %v1842_v31 }
 0x216   : > { %v1915_v44 = vld [vmem:[%s3138_s18 + $0x60] sm:$0xff] }
 0x217   : > { %1916 = vst [vmem:[%s3201_s21 + $0x60] sm:$0xff] %v1915_v44 }
 0x218   : > { %v1941_v57 = vld [vmem:[%s3138_s18 + $0xc8] sm:$0xff] }
 0x219   : > { %1942 = vst [vmem:[%s3201_s21 + $0x200] sm:$0xff] %v1941_v57 }
 0x21a PF: > { %p10_p10 = scmp.ge.s32.totalorder %s2552_s16, 6   ;;  %s3264_s12 = smov %s2508_s13 }
 0x21b   : > { %s3265_s13 = smov %s2563_s19  ;;  %s3266_s14 = smov %s2552_s16 }
 0x21c   :  { %12 = sbr.rel (!%p10_p10) target bundleno = 2 (0x2), region = 122 }

// kernel: _lambda_.8
= control target key start
LH: loop header
LB: loop body
LE: loop exit
PB: predicated region body
PF: predicated region fallthrough
CT: control target
= control target key end

     0   :  { %vm238_vm0 = vcmask 130048   ;;  %s699_s0 = inlined_call_operand.vmem [shape: f32[4,32,784], index: 0, kind: input, shape index: {}]   ;;  %s700_s1 = inlined_call_operand.vmem [shape: f32[32,784], index: 1, kind: output, shape index: {}]  }
   0x1   :  { %v8_v0 = vld [vmem:[%s699_s0] sm:$0xff]  ;;  %v9_v4 = vld [vmem:[%s699_s0 + $0x8] sm:$0xff]  ;;  %v10_v9 = vld [vmem:[%s699_s0 + $0x10] sm:$0xff] }
   0x2   :  { %v36_v1 = vld [vmem:[%s699_s0 + $0xe0] sm:$0xff]  ;;  %v37_v5 = vld [vmem:[%s699_s0 + $0xe8] sm:$0xff]  ;;  %v38_v12 = vld [vmem:[%s699_s0 + $0xf0] sm:$0xff] }
   0x3   :  { %v64_v2 = vld [vmem:[%s699_s0 + $0x1c0] sm:$0xff]  ;;  %v120_v3 = vmax.f32 %v8_v0, %v36_v1  ;;  %v65_v7 = vld [vmem:[%s699_s0 + $0x1c8] sm:$0xff]  ;;  %v121_v8 = vmax.f32 %v9_v4, %v37_v5  ;;  %v66_v13 = vld [vmem:[%s699_s0 + $0x1d0] sm:$0xff]  ;;  %v122_v15 = vmax.f32 %v10_v9, %v38_v12 }
   0x4   :  { %v92_v6 = vld [vmem:[%s699_s0 + $0x2a0] sm:$0xff]  ;;  %v93_v11 = vld [vmem:[%s699_s0 + $0x2a8] sm:$0xff]  ;;  %v11_v16 = vld [vmem:[%s699_s0 + $0x18] sm:$0xff] }
   0x5   :  { %v148_v10 = vmax.f32 %v120_v3, %v64_v2  ;;  %v149_v14 = vmax.f32 %v121_v8, %v65_v7  ;;  %v39_v17 = vld [vmem:[%s699_s0 + $0xf8] sm:$0xff]  ;;  %v94_v20 = vld [vmem:[%s699_s0 + $0x2b0] sm:$0xff]  ;;  %v12_v22 = vld [vmem:[%s699_s0 + $0x20] sm:$0xff]  ;;  %v150_v25 = vmax.f32 %v122_v15, %v66_v13 }
   0x6   :  { %v67_v18 = vld [vmem:[%s699_s0 + $0x1d8] sm:$0xff]  ;;  %v123_v21 = vmax.f32 %v11_v16, %v39_v17  ;;  %v40_v23 = vld [vmem:[%s699_s0 + $0x100] sm:$0xff]  ;;  %v13_v29 = vld [vmem:[%s699_s0 + $0x28] sm:$0xff] }
   0x7   :  { %v176_v19 = vmax.f32 %v148_v10, %v92_v6  ;;  %v177_v24 = vmax.f32 %v149_v14, %v93_v11  ;;  %v95_v26 = vld [vmem:[%s699_s0 + $0x2b8] sm:$0xff]  ;;  %v68_v27 = vld [vmem:[%s699_s0 + $0x1e0] sm:$0xff]  ;;  %v124_v28 = vmax.f32 %v12_v22, %v40_v23  ;;  %v41_v33 = vld [vmem:[%s699_s0 + $0x108] sm:$0xff]  ;;  %v178_v36 = vmax.f32 %v150_v25, %v94_v20 }
   0x8   :  { %v151_v31 = vmax.f32 %v123_v21, %v67_v18  ;;  %v96_v32 = vld [vmem:[%s699_s0 + $0x2c0] sm:$0xff]  ;;  %v69_v34 = vld [vmem:[%s699_s0 + $0x1e8] sm:$0xff]  ;;  %v125_v38 = vmax.f32 %v13_v29, %v41_v33  ;;  %v14_v39 = vld [vmem:[%s699_s0 + $0x30] sm:$0xff] }
   0x9   :  { %v204_v30 = vmax.f32 %v176_v19, 0.0  ;;  %v205_v35 = vmax.f32 %v177_v24, 0.0  ;;  %v152_v37 = vmax.f32 %v124_v28, %v68_v27  ;;  %v42_v40 = vld [vmem:[%s699_s0 + $0x110] sm:$0xff]  ;;  %v97_v43 = vld [vmem:[%s699_s0 + $0x2c8] sm:$0xff]  ;;  %v15_v45 = vld [vmem:[%s699_s0 + $0x38] sm:$0xff]  ;;  %v206_v47 = vmax.f32 %v178_v36, 0.0 }
   0xa   :  { %v70_v41 = vld [vmem:[%s699_s0 + $0x1f0] sm:$0xff]  ;;  %v179_v42 = vmax.f32 %v151_v31, %v95_v26  ;;  %v126_v44 = vmax.f32 %v14_v39, %v42_v40  ;;  %v43_v46 = vld [vmem:[%s699_s0 + $0x118] sm:$0xff]  ;;  %v153_v49 = vmax.f32 %v125_v38, %v69_v34  ;;  %v16_v53 = vld [vmem:[%s699_s0 + $0x40] sm:$0xff] }
   0xb   :  { %232 = vst [vmem:[%s700_s1] sm:$0xff] %v204_v30  ;;  %233 = vst [vmem:[%s700_s1 + $0x8] sm:$0xff] %v205_v35  ;;  %v180_v48 = vmax.f32 %v152_v37, %v96_v32  ;;  %v98_v50 = vld [vmem:[%s699_s0 + $0x2d0] sm:$0xff]  ;;  %v71_v51 = vld [vmem:[%s699_s0 + $0x1f8] sm:$0xff]  ;;  %v127_v52 = vmax.f32 %v15_v45, %v43_v46 }
   0xc   :  { %v207_v54 = vmax.f32 %v179_v42, 0.0  ;;  %v154_v55 = vmax.f32 %v126_v44, %v70_v41  ;;  %v99_v56 = vld [vmem:[%s699_s0 + $0x2d8] sm:$0xff]  ;;  %v44_v57 = vld [vmem:[%s699_s0 + $0x120] sm:$0xff]  ;;  %234 = vst [vmem:[%s700_s1 + $0x10] sm:$0xff] %v206_v47  ;;  %v181_v60 = vmax.f32 %v153_v49, %v97_v43  ;;  %v17_v63 = vld [vmem:[%s699_s0 + $0x48] sm:$0xff] }
   0xd   :  { %v72_v58 = vld [vmem:[%s699_s0 + $0x200] sm:$0xff]  ;;  %v208_v59 = vmax.f32 %v180_v48, 0.0  ;;  %v155_v61 = vmax.f32 %v127_v52, %v71_v51  ;;  %v128_v62 = vmax.f32 %v16_v53, %v44_v57  ;;  %v45_v0 = vld [vmem:[%s699_s0 + $0x128] sm:$0xff]  ;;  %v18_v5 = vld [vmem:[%s699_s0 + $0x50] sm:$0xff] }
   0xe   :  { %v73_v1 = vld [vmem:[%s699_s0 + $0x208] sm:$0xff]  ;;  %235 = vst [vmem:[%s700_s1 + $0x18] sm:$0xff] %v207_v54  ;;  %v182_v2 = vmax.f32 %v154_v55, %v98_v50  ;;  %v100_v3 = vld [vmem:[%s699_s0 + $0x2e0] sm:$0xff]  ;;  %v129_v4 = vmax.f32 %v17_v63, %v45_v0  ;;  %v46_v6 = vld [vmem:[%s699_s0 + $0x130] sm:$0xff]  ;;  %v209_v7 = vmax.f32 %v181_v60, 0.0 }
   0xf   :  { %236 = vst [vmem:[%s700_s1 + $0x20] sm:$0xff] %v208_v59  ;;  %v183_v8 = vmax.f32 %v155_v61, %v99_v56  ;;  %v156_v9 = vmax.f32 %v128_v62, %v72_v58  ;;  %v101_v10 = vld [vmem:[%s699_s0 + $0x2e8] sm:$0xff]  ;;  %v74_v11 = vld [vmem:[%s699_s0 + $0x210] sm:$0xff]  ;;  %v130_v12 = vmax.f32 %v18_v5, %v46_v6  ;;  %v19_v13 = vld [vmem:[%s699_s0 + $0x58] sm:$0xff] }
  0x10   :  { %v210_v14 = vmax.f32 %v182_v2, 0.0  ;;  %v157_v15 = vmax.f32 %v129_v4, %v73_v1  ;;  %v102_v16 = vld [vmem:[%s699_s0 + $0x2f0] sm:$0xff]  ;;  %v47_v17 = vld [vmem:[%s699_s0 + $0x138] sm:$0xff]  ;;  %237 = vst [vmem:[%s700_s1 + $0x28] sm:$0xff] %v209_v7  ;;  %v20_v23 = vld [vmem:[%s699_s0 + $0x60] sm:$0xff] }
  0x11   :  { %v75_v18 = vld [vmem:[%s699_s0 + $0x218] sm:$0xff]  ;;  %v211_v19 = vmax.f32 %v183_v8, 0.0  ;;  %v184_v20 = vmax.f32 %v156_v9, %v100_v3  ;;  %v158_v21 = vmax.f32 %v130_v12, %v74_v11  ;;  %v131_v22 = vmax.f32 %v19_v13, %v47_v17  ;;  %v48_v24 = vld [vmem:[%s699_s0 + $0x140] sm:$0xff]  ;;  %v21_v29 = vld [vmem:[%s699_s0 + $0x68] sm:$0xff] }
  0x12   :  { %v76_v25 = vld [vmem:[%s699_s0 + $0x220] sm:$0xff]  ;;  %239 = vst.msk [vmem:[%s700_s1 + $0x30] sm:$0xff] %vm238_vm0, %v210_v14  ;;  %v185_v26 = vmax.f32 %v157_v15, %v101_v10  ;;  %v103_v27 = vld [vmem:[%s699_s0 + $0x2f8] sm:$0xff]  ;;  %v132_v28 = vmax.f32 %v20_v23, %v48_v24  ;;  %v49_v30 = vld [vmem:[%s699_s0 + $0x148] sm:$0xff] }
  0x13   :  { %240 = vst [vmem:[%s700_s1 + $0x38] sm:$0xff] %v211_v19  ;;  %v212_v31 = vmax.f32 %v184_v20, 0.0  ;;  %v186_v32 = vmax.f32 %v158_v21, %v102_v16  ;;  %v159_v33 = vmax.f32 %v131_v22, %v75_v18  ;;  %v104_v34 = vld [vmem:[%s699_s0 + $0x300] sm:$0xff]  ;;  %v77_v35 = vld [vmem:[%s699_s0 + $0x228] sm:$0xff]  ;;  %v133_v36 = vmax.f32 %v21_v29, %v49_v30  ;;  %v22_v37 = vld [vmem:[%s699_s0 + $0x70] sm:$0xff] }
  0x14   :  { %v213_v38 = vmax.f32 %v185_v26, 0.0  ;;  %v160_v39 = vmax.f32 %v132_v28, %v76_v25  ;;  %v105_v40 = vld [vmem:[%s699_s0 + $0x308] sm:$0xff]  ;;  %v50_v41 = vld [vmem:[%s699_s0 + $0x150] sm:$0xff]  ;;  %v23_v47 = vld [vmem:[%s699_s0 + $0x78] sm:$0xff] }
  0x15   :  { %v78_v42 = vld [vmem:[%s699_s0 + $0x230] sm:$0xff]  ;;  %241 = vst [vmem:[%s700_s1 + $0x40] sm:$0xff] %v212_v31  ;;  %v214_v43 = vmax.f32 %v186_v32, 0.0  ;;  %v187_v44 = vmax.f32 %v159_v33, %v103_v27  ;;  %v161_v45 = vmax.f32 %v133_v36, %v77_v35  ;;  %v134_v46 = vmax.f32 %v22_v37, %v50_v41  ;;  %v51_v48 = vld [vmem:[%s699_s0 + $0x158] sm:$0xff]  ;;  %v24_v53 = vld [vmem:[%s699_s0 + $0x80] sm:$0xff] }
  0x16   :  { %v79_v49 = vld [vmem:[%s699_s0 + $0x238] sm:$0xff]  ;;  %242 = vst [vmem:[%s700_s1 + $0x48] sm:$0xff] %v213_v38  ;;  %v188_v50 = vmax.f32 %v160_v39, %v104_v34  ;;  %v106_v51 = vld [vmem:[%s699_s0 + $0x310] sm:$0xff]  ;;  %v135_v52 = vmax.f32 %v23_v47, %v51_v48  ;;  %v52_v54 = vld [vmem:[%s699_s0 + $0x160] sm:$0xff] }
  0x17   :  { %243 = vst [vmem:[%s700_s1 + $0x50] sm:$0xff] %v214_v43  ;;  %v215_v55 = vmax.f32 %v187_v44, 0.0  ;;  %v189_v56 = vmax.f32 %v161_v45, %v105_v40  ;;  %v162_v57 = vmax.f32 %v134_v46, %v78_v42  ;;  %v107_v58 = vld [vmem:[%s699_s0 + $0x318] sm:$0xff]  ;;  %v80_v59 = vld [vmem:[%s699_s0 + $0x240] sm:$0xff]  ;;  %v136_v60 = vmax.f32 %v24_v53, %v52_v54  ;;  %v25_v61 = vld [vmem:[%s699_s0 + $0x88] sm:$0xff] }
  0x18   :  { %v216_v62 = vmax.f32 %v188_v50, 0.0  ;;  %v163_v63 = vmax.f32 %v135_v52, %v79_v49  ;;  %v108_v0 = vld [vmem:[%s699_s0 + $0x320] sm:$0xff]  ;;  %v53_v1 = vld [vmem:[%s699_s0 + $0x168] sm:$0xff]  ;;  %v26_v7 = vld [vmem:[%s699_s0 + $0x90] sm:$0xff] }
  0x19   :  { %v81_v2 = vld [vmem:[%s699_s0 + $0x248] sm:$0xff]  ;;  %244 = vst [vmem:[%s700_s1 + $0x58] sm:$0xff] %v215_v55  ;;  %v217_v3 = vmax.f32 %v189_v56, 0.0  ;;  %v190_v4 = vmax.f32 %v162_v57, %v106_v51  ;;  %v164_v5 = vmax.f32 %v136_v60, %v80_v59  ;;  %v137_v6 = vmax.f32 %v25_v61, %v53_v1  ;;  %v54_v8 = vld [vmem:[%s699_s0 + $0x170] sm:$0xff]  ;;  %v27_v13 = vld [vmem:[%s699_s0 + $0x98] sm:$0xff] }
  0x1a   :  { %v82_v9 = vld [vmem:[%s699_s0 + $0x250] sm:$0xff]  ;;  %245 = vst [vmem:[%s700_s1 + $0x60] sm:$0xff] %v216_v62  ;;  %v191_v10 = vmax.f32 %v163_v63, %v107_v58  ;;  %v109_v11 = vld [vmem:[%s699_s0 + $0x328] sm:$0xff]  ;;  %v138_v12 = vmax.f32 %v26_v7, %v54_v8  ;;  %v55_v14 = vld [vmem:[%s699_s0 + $0x178] sm:$0xff] }
  0x1b   :  { %246 = vst.msk [vmem:[%s700_s1 + $0x68] sm:$0xff] %vm238_vm0, %v217_v3  ;;  %v218_v15 = vmax.f32 %v190_v4, 0.0  ;;  %v192_v16 = vmax.f32 %v164_v5, %v108_v0  ;;  %v165_v17 = vmax.f32 %v137_v6, %v81_v2  ;;  %v110_v18 = vld [vmem:[%s699_s0 + $0x330] sm:$0xff]  ;;  %v83_v19 = vld [vmem:[%s699_s0 + $0x258] sm:$0xff]  ;;  %v139_v20 = vmax.f32 %v27_v13, %v55_v14  ;;  %v28_v21 = vld [vmem:[%s699_s0 + $0xa0] sm:$0xff] }
  0x1c   :  { %v219_v22 = vmax.f32 %v191_v10, 0.0  ;;  %v166_v23 = vmax.f32 %v138_v12, %v82_v9  ;;  %v111_v24 = vld [vmem:[%s699_s0 + $0x338] sm:$0xff]  ;;  %v56_v25 = vld [vmem:[%s699_s0 + $0x180] sm:$0xff]  ;;  %v29_v31 = vld [vmem:[%s699_s0 + $0xa8] sm:$0xff] }
  0x1d   :  { %v84_v26 = vld [vmem:[%s699_s0 + $0x260] sm:$0xff]  ;;  %247 = vst [vmem:[%s700_s1 + $0x70] sm:$0xff] %v218_v15  ;;  %v220_v27 = vmax.f32 %v192_v16, 0.0  ;;  %v193_v28 = vmax.f32 %v165_v17, %v109_v11  ;;  %v167_v29 = vmax.f32 %v139_v20, %v83_v19  ;;  %v140_v30 = vmax.f32 %v28_v21, %v56_v25  ;;  %v57_v32 = vld [vmem:[%s699_s0 + $0x188] sm:$0xff]  ;;  %v30_v37 = vld [vmem:[%s699_s0 + $0xb0] sm:$0xff] }
  0x1e   :  { %v85_v33 = vld [vmem:[%s699_s0 + $0x268] sm:$0xff]  ;;  %248 = vst [vmem:[%s700_s1 + $0x78] sm:$0xff] %v219_v22  ;;  %v194_v34 = vmax.f32 %v166_v23, %v110_v18  ;;  %v112_v35 = vld [vmem:[%s699_s0 + $0x340] sm:$0xff]  ;;  %v141_v36 = vmax.f32 %v29_v31, %v57_v32  ;;  %v58_v38 = vld [vmem:[%s699_s0 + $0x190] sm:$0xff] }
  0x1f   :  { %249 = vst [vmem:[%s700_s1 + $0x80] sm:$0xff] %v220_v27  ;;  %v221_v39 = vmax.f32 %v193_v28, 0.0  ;;  %v195_v40 = vmax.f32 %v167_v29, %v111_v24  ;;  %v168_v41 = vmax.f32 %v140_v30, %v84_v26  ;;  %v113_v42 = vld [vmem:[%s699_s0 + $0x348] sm:$0xff]  ;;  %v86_v43 = vld [vmem:[%s699_s0 + $0x270] sm:$0xff]  ;;  %v142_v44 = vmax.f32 %v30_v37, %v58_v38  ;;  %v31_v45 = vld [vmem:[%s699_s0 + $0xb8] sm:$0xff] }
  0x20   :  { %v222_v46 = vmax.f32 %v194_v34, 0.0  ;;  %v169_v47 = vmax.f32 %v141_v36, %v85_v33  ;;  %v114_v48 = vld [vmem:[%s699_s0 + $0x350] sm:$0xff]  ;;  %v59_v49 = vld [vmem:[%s699_s0 + $0x198] sm:$0xff]  ;;  %v32_v55 = vld [vmem:[%s699_s0 + $0xc0] sm:$0xff] }
  0x21   :  { %v87_v50 = vld [vmem:[%s699_s0 + $0x278] sm:$0xff]  ;;  %250 = vst [vmem:[%s700_s1 + $0x88] sm:$0xff] %v221_v39  ;;  %v223_v51 = vmax.f32 %v195_v40, 0.0  ;;  %v196_v52 = vmax.f32 %v168_v41, %v112_v35  ;;  %v170_v53 = vmax.f32 %v142_v44, %v86_v43  ;;  %v143_v54 = vmax.f32 %v31_v45, %v59_v49  ;;  %v60_v56 = vld [vmem:[%s699_s0 + $0x1a0] sm:$0xff]  ;;  %v33_v61 = vld [vmem:[%s699_s0 + $0xc8] sm:$0xff] }
  0x22   :  { %v88_v57 = vld [vmem:[%s699_s0 + $0x280] sm:$0xff]  ;;  %251 = vst [vmem:[%s700_s1 + $0x90] sm:$0xff] %v222_v46  ;;  %v197_v58 = vmax.f32 %v169_v47, %v113_v42  ;;  %v115_v59 = vld [vmem:[%s699_s0 + $0x358] sm:$0xff]  ;;  %v144_v60 = vmax.f32 %v32_v55, %v60_v56  ;;  %v61_v62 = vld [vmem:[%s699_s0 + $0x1a8] sm:$0xff] }
  0x23   :  { %252 = vst [vmem:[%s700_s1 + $0x98] sm:$0xff] %v223_v51  ;;  %v224_v63 = vmax.f32 %v196_v52, 0.0  ;;  %v198_v0 = vmax.f32 %v170_v53, %v114_v48  ;;  %v171_v1 = vmax.f32 %v143_v54, %v87_v50  ;;  %v116_v2 = vld [vmem:[%s699_s0 + $0x360] sm:$0xff]  ;;  %v89_v3 = vld [vmem:[%s699_s0 + $0x288] sm:$0xff]  ;;  %v145_v4 = vmax.f32 %v33_v61, %v61_v62  ;;  %v34_v5 = vld [vmem:[%s699_s0 + $0xd0] sm:$0xff] }
  0x24   :  { %v225_v6 = vmax.f32 %v197_v58, 0.0  ;;  %v172_v7 = vmax.f32 %v144_v60, %v88_v57  ;;  %v117_v8 = vld [vmem:[%s699_s0 + $0x368] sm:$0xff]  ;;  %v62_v9 = vld [vmem:[%s699_s0 + $0x1b0] sm:$0xff]  ;;  %v35_v15 = vld [vmem:[%s699_s0 + $0xd8] sm:$0xff] }
  0x25   :  { %v90_v10 = vld [vmem:[%s699_s0 + $0x290] sm:$0xff]  ;;  %253 = vst.msk [vmem:[%s700_s1 + $0xa0] sm:$0xff] %vm238_vm0, %v224_v63  ;;  %v226_v11 = vmax.f32 %v198_v0, 0.0  ;;  %v199_v12 = vmax.f32 %v171_v1, %v115_v59  ;;  %v173_v13 = vmax.f32 %v145_v4, %v89_v3  ;;  %v146_v14 = vmax.f32 %v34_v5, %v62_v9  ;;  %v63_v16 = vld [vmem:[%s699_s0 + $0x1b8] sm:$0xff] }
  0x26   :  { %v91_v17 = vld [vmem:[%s699_s0 + $0x298] sm:$0xff]  ;;  %254 = vst [vmem:[%s700_s1 + $0xa8] sm:$0xff] %v225_v6  ;;  %v200_v18 = vmax.f32 %v172_v7, %v116_v2  ;;  %v118_v19 = vld [vmem:[%s699_s0 + $0x370] sm:$0xff]  ;;  %v147_v20 = vmax.f32 %v35_v15, %v63_v16 }
  0x27   :  { %255 = vst [vmem:[%s700_s1 + $0xb0] sm:$0xff] %v226_v11  ;;  %v227_v21 = vmax.f32 %v199_v12, 0.0  ;;  %v201_v22 = vmax.f32 %v173_v13, %v117_v8  ;;  %v174_v23 = vmax.f32 %v146_v14, %v90_v10  ;;  %v119_v24 = vld [vmem:[%s699_s0 + $0x378] sm:$0xff] }
  0x28   :  { %v228_v25 = vmax.f32 %v200_v18, 0.0  ;;  %v175_v26 = vmax.f32 %v147_v20, %v91_v17 }
  0x29   :  { %256 = vst [vmem:[%s700_s1 + $0xb8] sm:$0xff] %v227_v21  ;;  %v229_v27 = vmax.f32 %v201_v22, 0.0  ;;  %v202_v28 = vmax.f32 %v174_v23, %v118_v19 }
  0x2a   :  { %257 = vst [vmem:[%s700_s1 + $0xc0] sm:$0xff] %v228_v25  ;;  %v203_v29 = vmax.f32 %v175_v26, %v119_v24 }
  0x2b   :  { %258 = vst [vmem:[%s700_s1 + $0xc8] sm:$0xff] %v229_v27  ;;  %v230_v30 = vmax.f32 %v202_v28, 0.0 }
  0x2c   :  { %v231_v31 = vmax.f32 %v203_v29, 0.0 }
  0x2d   :  { %259 = vst [vmem:[%s700_s1 + $0xd0] sm:$0xff] %v230_v30 }
  0x2e   :  { %260 = vst.msk [vmem:[%s700_s1 + $0xd8] sm:$0xff] %vm238_vm0, %v231_v31 }

// kernel: _lambda_.9
= control target key start
LH: loop header
LB: loop body
LE: loop exit
PB: predicated region body
PF: predicated region fallthrough
CT: control target
= control target key end

     0   :  { %s814_s12 = smov 0   ;;  %s816_s13 = smov 0   ;;  %s980_s0 = inlined_call_operand.vmem [shape: bf16[8,256], index: 0, kind: input, shape index: {}]   ;;  %s981_s1 = inlined_call_operand.vmem [shape: bf16[256,512], index: 1, kind: input, shape index: {}]   ;;  %s982_s2 = inlined_call_operand.vmem [shape: f32[8,1], index: 2, kind: input, shape index: {}]   ;;  %s983_s3 = inlined_call_operand.vmem [shape: f32[8,512], index: 3, kind: output, shape index: {}]  }
   0x1   :  { %s818_s14 = smov 0  }
   0x2 LB: > { %s645_s15 = sadd.s32 4294967295, %s791_s14   ;;  %s831_s16 = sadd.s32 1, %s791_s14   ;;  %s791_s14 = sphi %s818_s14, %s986_s14   ;;  %s787_s13 = sphi %s816_s13, %s985_s13   ;;  %s783_s12 = sphi %s814_s12, %s984_s12  }
   0x3   : > { %s38_s17 = ssub.s32 %s791_s14, %s831_s16  ;;  %s41_s18 = sadd.s32 1, %s787_s13 }
   0x4   : > { %p39_p0 = scmp.eq.s32.totalorder %s38_s17, 0  ;;  %p48_p1 = scmp.ne.s32.totalorder %s787_s13, %s783_s12 }
   0x5   : > { %p49_p2 = scmp.eq.s32.totalorder %s791_s14, 0  ;;  %p648_p4 = scmp.ge.s32.totalorder %s791_s14, 2 }
   0x6   : > { %s840_s19 = scalar_select %p39_p0, %s787_s13, %s41_s18  }
   0x7   : > { %p50_p3 = por %p49_p2, %p48_p1  ;;  %127 = sbr.rel (%p648_p4) target bundleno = 34 (0x22), region = 24 }
   0xe   : > { %130 = sbr.rel (!%p50_p3) target bundleno = 34 (0x22), region = 28  ;;  %s132_s20 = sand.u32 (%p50_p3), 1, %s787_s13  }
   0xf   : > { %s692_s21 = sshll.u32 (%p50_p3), %s791_s14, 3  ;;  %s649_s22 = sshll.u32 (%p50_p3), %s132_s20, 8 }
  0x10   : > { %s848_s25 = scalar_lea.vmem (%p50_p3), %s981_s1, %s692_s21  ;;  %s853_s26 = scalar_lea.vmem (%p50_p3), [#allocation2], %s649_s22 }
  0x11   : > { %v227_v0 = vld [vmem:[%s848_s25] sm:$0xff] (%p50_p3)  ;;  %v229_v1 = vld [vmem:[%s848_s25 + $0x10] sm:$0xff] (%p50_p3) }
  0x12   : > { %v231_v2 = vld [vmem:[%s848_s25 + $0x20] sm:$0xff] (%p50_p3)  ;;  %228 = vst [vmem:[%s853_s26] sm:$0xff] (%p50_p3), %v227_v0  ;;  %230 = vst [vmem:[%s853_s26 + $0x8] sm:$0xff] (%p50_p3), %v229_v1  ;;  %v233_v3 = vld [vmem:[%s848_s25 + $0x30] sm:$0xff] (%p50_p3) }
  0x13   : > { %232 = vst [vmem:[%s853_s26 + $0x10] sm:$0xff] (%p50_p3), %v231_v2  ;;  %v235_v4 = vld [vmem:[%s848_s25 + $0x40] sm:$0xff] (%p50_p3)  ;;  %v237_v5 = vld [vmem:[%s848_s25 + $0x50] sm:$0xff] (%p50_p3)  ;;  %234 = vst [vmem:[%s853_s26 + $0x18] sm:$0xff] (%p50_p3), %v233_v3 }
  0x14   : > { %236 = vst [vmem:[%s853_s26 + $0x20] sm:$0xff] (%p50_p3), %v235_v4  ;;  %238 = vst [vmem:[%s853_s26 + $0x28] sm:$0xff] (%p50_p3), %v237_v5  ;;  %v239_v6 = vld [vmem:[%s848_s25 + $0x60] sm:$0xff] (%p50_p3)  ;;  %v241_v7 = vld [vmem:[%s848_s25 + $0x70] sm:$0xff] (%p50_p3) }
  0x15   : > { %v243_v8 = vld [vmem:[%s848_s25 + $0x80] sm:$0xff]  ;;  %240 = vst [vmem:[%s853_s26 + $0x30] sm:$0xff] %v239_v6  ;;  %242 = vst [vmem:[%s853_s26 + $0x38] sm:$0xff] %v241_v7  ;;  %v245_v9 = vld [vmem:[%s848_s25 + $0x90] sm:$0xff] }
  0x16   : > { %244 = vst [vmem:[%s853_s26 + $0x40] sm:$0xff] %v243_v8  ;;  %v247_v10 = vld [vmem:[%s848_s25 + $0xa0] sm:$0xff]  ;;  %v249_v11 = vld [vmem:[%s848_s25 + $0xb0] sm:$0xff]  ;;  %246 = vst [vmem:[%s853_s26 + $0x48] sm:$0xff] %v245_v9 }
  0x17   : > { %248 = vst [vmem:[%s853_s26 + $0x50] sm:$0xff] %v247_v10  ;;  %250 = vst [vmem:[%s853_s26 + $0x58] sm:$0xff] %v249_v11  ;;  %v251_v12 = vld [vmem:[%s848_s25 + $0xc0] sm:$0xff]  ;;  %v253_v13 = vld [vmem:[%s848_s25 + $0xd0] sm:$0xff] }
  0x18   : > { %v255_v14 = vld [vmem:[%s848_s25 + $0xe0] sm:$0xff]  ;;  %252 = vst [vmem:[%s853_s26 + $0x60] sm:$0xff] %v251_v12  ;;  %254 = vst [vmem:[%s853_s26 + $0x68] sm:$0xff] %v253_v13  ;;  %v257_v15 = vld [vmem:[%s848_s25 + $0xf0] sm:$0xff] }
  0x19   : > { %256 = vst [vmem:[%s853_s26 + $0x70] sm:$0xff] %v255_v14  ;;  %v259_v16 = vld [vmem:[%s848_s25 + $0x100] sm:$0xff]  ;;  %v261_v17 = vld [vmem:[%s848_s25 + $0x110] sm:$0xff]  ;;  %258 = vst [vmem:[%s853_s26 + $0x78] sm:$0xff] %v257_v15 }
  0x1a   : > { %260 = vst [vmem:[%s853_s26 + $0x80] sm:$0xff] %v259_v16  ;;  %262 = vst [vmem:[%s853_s26 + $0x88] sm:$0xff] %v261_v17  ;;  %v263_v18 = vld [vmem:[%s848_s25 + $0x120] sm:$0xff]  ;;  %v265_v19 = vld [vmem:[%s848_s25 + $0x130] sm:$0xff] }
  0x1b   : > { %v267_v20 = vld [vmem:[%s848_s25 + $0x140] sm:$0xff]  ;;  %264 = vst [vmem:[%s853_s26 + $0x90] sm:$0xff] %v263_v18  ;;  %266 = vst [vmem:[%s853_s26 + $0x98] sm:$0xff] %v265_v19  ;;  %v269_v21 = vld [vmem:[%s848_s25 + $0x150] sm:$0xff] }
  0x1c   : > { %268 = vst [vmem:[%s853_s26 + $0xa0] sm:$0xff] %v267_v20  ;;  %v271_v22 = vld [vmem:[%s848_s25 + $0x160] sm:$0xff]  ;;  %v273_v23 = vld [vmem:[%s848_s25 + $0x170] sm:$0xff]  ;;  %270 = vst [vmem:[%s853_s26 + $0xa8] sm:$0xff] %v269_v21 }
  0x1d   : > { %272 = vst [vmem:[%s853_s26 + $0xb0] sm:$0xff] %v271_v22  ;;  %274 = vst [vmem:[%s853_s26 + $0xb8] sm:$0xff] %v273_v23  ;;  %v275_v24 = vld [vmem:[%s848_s25 + $0x180] sm:$0xff]  ;;  %v277_v25 = vld [vmem:[%s848_s25 + $0x190] sm:$0xff] }
  0x1e   : > { %v279_v26 = vld [vmem:[%s848_s25 + $0x1a0] sm:$0xff]  ;;  %276 = vst [vmem:[%s853_s26 + $0xc0] sm:$0xff] %v275_v24  ;;  %278 = vst [vmem:[%s853_s26 + $0xc8] sm:$0xff] %v277_v25  ;;  %v281_v27 = vld [vmem:[%s848_s25 + $0x1b0] sm:$0xff] }
  0x1f   : > { %280 = vst [vmem:[%s853_s26 + $0xd0] sm:$0xff] %v279_v26  ;;  %v283_v28 = vld [vmem:[%s848_s25 + $0x1c0] sm:$0xff]  ;;  %v285_v29 = vld [vmem:[%s848_s25 + $0x1d0] sm:$0xff]  ;;  %282 = vst [vmem:[%s853_s26 + $0xd8] sm:$0xff] %v281_v27 }
  0x20   : > { %284 = vst [vmem:[%s853_s26 + $0xe0] sm:$0xff] %v283_v28  ;;  %286 = vst [vmem:[%s853_s26 + $0xe8] sm:$0xff] %v285_v29  ;;  %v287_v30 = vld [vmem:[%s848_s25 + $0x1e0] sm:$0xff]  ;;  %v289_v31 = vld [vmem:[%s848_s25 + $0x1f0] sm:$0xff] }
  0x21   : > { %288 = vst [vmem:[%s853_s26 + $0xf0] sm:$0xff] %v287_v30  ;;  %290 = vst [vmem:[%s853_s26 + $0xf8] sm:$0xff] %v289_v31 }
  0x22 PF: > { %p652_p5 = scmp.ge.s32.totalorder %s791_s14, 1  ;;  %p295_p6 = scmp.lt.s32.totalorder %s791_s14, 3 }
  0x24   : > { %p296_p7 = pnand %p652_p5, %p295_p6 }
  0x25   : > { %s302_s27 = sand.u32 (!%p296_p7), 1, %s783_s12   ;;  %v922_v32 = vld [vmem:[%s980_s0] sm:$0xff] (!%p296_p7)  ;;  %v793_v35 = vmov (!%p296_p7), 0   ;;  %s654_s7 = sshll.u32 (!%p296_p7), %s645_s15, 1 }
  0x26   : > { %299 = sbr.rel (%p296_p7) target bundleno = 323 (0x143), region = 66  ;;  %v365_v33 = vld [vmem:[%s982_s2] sm:$0xff] (!%p296_p7)  ;;  %s653_s5 = sshll.u32 (!%p296_p7), %s302_s27, 8  ;;  %v657_v34 = vcombine.high (!%p296_p7), %v922_v32, %v922_v32  ;;  %718 = vset.pattern.permute.xlu0 (!%p296_p7), %v793_v35  ;;  %v656_v4 = vcombine.low (!%p296_p7), %v922_v32, %v922_v32 }
  0x27   : > { %368 = vperm.xlu0 (!%p296_p7), %718, %v365_v33   ;;  %s929_s6 = scalar_lea.vmem (!%p296_p7), [#allocation2], %s653_s5  ;;  %p327_p8 = scmp.lt.s32.totalorder (!%p296_p7), %s654_s7, 3 }
  0x28   : > { %v719_v36 = vld [vmem:[%s929_s6 + $0x4] ss:$8 sps:$4 sm:$0xff] (!%p296_p7)   ;;  %570 = vmatprep.mubr.bf16.mxu0 (!%p296_p7), %v657_v34  ;;  %v721_v37 = vld [vmem:[%s929_s6] ss:$8 sps:$4 sm:$0xff] (!%p296_p7)   ;;  %v722_v38 = vld [vmem:[%s929_s6 + $0x14] ss:$8 sps:$4 sm:$0xff] (!%p296_p7)  }
  0x29   : > { %538 = vmatprep.subr.bf16.mxu0 (!%p296_p7), %v719_v36  ;;  %v724_v39 = vld [vmem:[%s929_s6 + $0x10] ss:$8 sps:$4 sm:$0xff] (!%p296_p7)   ;;  %v725_v40 = vld [vmem:[%s929_s6 + $0x24] ss:$8 sps:$4 sm:$0xff] (!%p296_p7)   ;;  %v727_v41 = vld [vmem:[%s929_s6 + $0x20] ss:$8 sps:$4 sm:$0xff] (!%p296_p7)  }
  0x2a   : > { %539 = vmatpush1.bf16.msra.mxu0 (!%p296_p7), %v721_v37  ;;  %v728_v42 = vld [vmem:[%s929_s6 + $0x34] ss:$8 sps:$4 sm:$0xff] (!%p296_p7)   ;;  %v730_v43 = vld [vmem:[%s929_s6 + $0x30] ss:$8 sps:$4 sm:$0xff] (!%p296_p7)   ;;  %v731_v44 = vld [vmem:[%s929_s6 + $0x44] ss:$8 sps:$4 sm:$0xff] (!%p296_p7)  }
  0x2b   : > { %540 = vmatprep.subr.bf16.mxu0 (!%p296_p7), %v722_v38  ;;  %v733_v45 = vld [vmem:[%s929_s6 + $0x40] ss:$8 sps:$4 sm:$0xff] (!%p296_p7)   ;;  %v734_v46 = vld [vmem:[%s929_s6 + $0x54] ss:$8 sps:$4 sm:$0xff] (!%p296_p7)   ;;  %v736_v47 = vld [vmem:[%s929_s6 + $0x50] ss:$8 sps:$4 sm:$0xff] (!%p296_p7)  }
  0x2c   : > { %v737_v48 = vld [vmem:[%s929_s6 + $0x64] ss:$8 sps:$4 sm:$0xff] (!%p296_p7)   ;;  %v739_v49 = vld [vmem:[%s929_s6 + $0x60] ss:$8 sps:$4 sm:$0xff] (!%p296_p7)   ;;  %v740_v50 = vld [vmem:[%s929_s6 + $0x74] ss:$8 sps:$4 sm:$0xff] (!%p296_p7)  }
  0x2d   : > { %v742_v51 = vld [vmem:[%s929_s6 + $0x70] ss:$8 sps:$4 sm:$0xff]   ;;  %v743_v52 = vld [vmem:[%s929_s6 + $0x84] ss:$8 sps:$4 sm:$0xff]   ;;  %v745_v53 = vld [vmem:[%s929_s6 + $0x80] ss:$8 sps:$4 sm:$0xff]  }
  0x2e   : > { %541 = vmatpush1.bf16.msra.mxu0 %v724_v39  ;;  %v746_v54 = vld [vmem:[%s929_s6 + $0x94] ss:$8 sps:$4 sm:$0xff]   ;;  %v748_v55 = vld [vmem:[%s929_s6 + $0x90] ss:$8 sps:$4 sm:$0xff]   ;;  %v749_v56 = vld [vmem:[%s929_s6 + $0xa4] ss:$8 sps:$4 sm:$0xff]  }
  0x2f   : > { %542 = vmatprep.subr.bf16.mxu0 %v725_v40  ;;  %v751_v57 = vld [vmem:[%s929_s6 + $0xa0] ss:$8 sps:$4 sm:$0xff]   ;;  %v752_v58 = vld [vmem:[%s929_s6 + $0xb4] ss:$8 sps:$4 sm:$0xff]   ;;  %v754_v59 = vld [vmem:[%s929_s6 + $0xb0] ss:$8 sps:$4 sm:$0xff]  }
  0x30   : > { %v755_v60 = vld [vmem:[%s929_s6 + $0xc4] ss:$8 sps:$4 sm:$0xff]   ;;  %v757_v61 = vld [vmem:[%s929_s6 + $0xc0] ss:$8 sps:$4 sm:$0xff]   ;;  %v758_v62 = vld [vmem:[%s929_s6 + $0xd4] ss:$8 sps:$4 sm:$0xff]  }
  0x31   : > { %v760_v63 = vld [vmem:[%s929_s6 + $0xd0] ss:$8 sps:$4 sm:$0xff]   ;;  %v761_v0 = vld [vmem:[%s929_s6 + $0xe4] ss:$8 sps:$4 sm:$0xff]   ;;  %v763_v1 = vld [vmem:[%s929_s6 + $0xe0] ss:$8 sps:$4 sm:$0xff]  }
  0x32   : > { %543 = vmatpush1.bf16.msra.mxu0 %v727_v41  ;;  %v764_v2 = vld [vmem:[%s929_s6 + $0xf4] ss:$8 sps:$4 sm:$0xff]   ;;  %v766_v3 = vld [vmem:[%s929_s6 + $0xf0] ss:$8 sps:$4 sm:$0xff]   ;;  %s988_s7 = smov (!%p327_p8, %s654_s7), 3 }
  0x33   : > { %544 = vmatprep.subr.bf16.mxu0 %v728_v42  ;;  %s655_s8 = sshll.u32 %s988_s7, 3 }
  0x34   : > { %s330_s11 = scalar_lea.vmem %s983_s3, %s655_s8 }
  0x36   : > { %545 = vmatpush1.bf16.msra.mxu0 %v730_v43 }
  0x37   : > { %546 = vmatprep.subr.bf16.mxu0 %v731_v44 }
  0x3a   : > { %547 = vmatpush1.bf16.msra.mxu0 %v733_v45 }
  0x3b   : > { %548 = vmatprep.subr.bf16.mxu0 %v734_v46 }
  0x3e   : > { %549 = vmatpush1.bf16.msra.mxu0 %v736_v47 }
  0x3f   : > { %550 = vmatprep.subr.bf16.mxu0 %v737_v48 }
  0x42   : > { %551 = vmatpush1.bf16.msra.mxu0 %v739_v49 }
  0x43   : > { %552 = vmatprep.subr.bf16.mxu0 %v740_v50 }
  0x46   : > { %553 = vmatpush1.bf16.msra.mxu0 %v742_v51 }
  0x47   : > { %554 = vmatprep.subr.bf16.mxu0 %v743_v52 }
  0x4a   : > { %555 = vmatpush1.bf16.msra.mxu0 %v745_v53 }
  0x4b   : > { %556 = vmatprep.subr.bf16.mxu0 %v746_v54 }
  0x4e   : > { %557 = vmatpush1.bf16.msra.mxu0 %v748_v55 }
  0x4f   : > { %558 = vmatprep.subr.bf16.mxu0 %v749_v56 }
  0x52   : > { %559 = vmatpush1.bf16.msra.mxu0 %v751_v57 }
  0x53   : > { %560 = vmatprep.subr.bf16.mxu0 %v752_v58 }
  0x56   : > { %561 = vmatpush1.bf16.msra.mxu0 %v754_v59 }
  0x57   : > { %562 = vmatprep.subr.bf16.mxu0 %v755_v60 }
  0x5a   : > { %563 = vmatpush1.bf16.msra.mxu0 %v757_v61 }
  0x5b   : > { %564 = vmatprep.subr.bf16.mxu0 %v758_v62 }
  0x5e   : > { %565 = vmatpush1.bf16.msra.mxu0 %v760_v63 }
  0x5f   : > { %566 = vmatprep.subr.bf16.mxu0 %v761_v0 }
  0x62   : > { %567 = vmatpush1.bf16.msra.mxu0 %v763_v1 }
  0x63   : > { %568 = vmatprep.subr.bf16.mxu0 %v764_v2 }
  0x66   : > { %569 = vmatpush1.bf16.msra.mxu0 %v766_v3 }
  0x69   : > { %571 = vmatmul.mubr.bf16.vlgmr.msra.gmra.mrb[0].mxu0 %v656_v4 }
  0xa6   : > { %v369_v5 = vpop.permute.xlu0 %368 }
 0x13c   : > { %v572_v6 = vpop.f32.mrb[0].mxu0 }
 0x13d   : > { %v573_v7 = vadd.f32 %v572_v6, %v369_v5  ;;  %v574_v8 = vpop.f32.mrb[1].mxu0 }
 0x13e   : > { %v575_v9 = vadd.f32 %v574_v8, %v369_v5  ;;  %v576_v10 = vpop.f32.mrb[2].mxu0 }
 0x13f   : > { %v579_v11 = vmax.f32 %v573_v7, 0.0  ;;  %v577_v12 = vpop.f32.mrb[3].mxu0 }
 0x140   : > { %v580_v13 = vmax.f32 %v575_v9, 0.0 }
 0x141   : > { %581 = vst [vmem:[%s330_s11] sm:$0xff] %v579_v11 }
 0x142   : > { %582 = vst [vmem:[%s330_s11 + $0x8] sm:$0xff] %v580_v13 }
 0x143 PF: > { %p10_p9 = scmp.ge.s32.totalorder %s831_s16, 4   ;;  %s984_s12 = smov %s787_s13 }
 0x144   : > { %s985_s13 = smov %s840_s19  ;;  %s986_s14 = smov %s831_s16 }
 0x145   :  { %12 = sbr.rel (!%p10_p9) target bundleno = 2 (0x2), region = 105 }

// kernel: _lambda_.10
= control target key start
LH: loop header
LB: loop body
LE: loop exit
PB: predicated region body
PF: predicated region fallthrough
CT: control target
= control target key end

     0   :  { %vm72_vm0 = vcmask 293888   ;;  %s191_s0 = inlined_call_operand.vmem [shape: f32[16,16,36], index: 0, kind: input, shape index: {}]   ;;  %s192_s1 = inlined_call_operand.vmem [shape: f32[16,36], index: 1, kind: output, shape index: {}]  }
   0x1   :  { %v8_v0 = vld [vmem:[%s191_s0] sm:$0xff]  ;;  %v10_v1 = vld [vmem:[%s191_s0 + $0x10] sm:$0xff]  ;;  %v9_v8 = vld [vmem:[%s191_s0 + $0x8] sm:$0xff] }
   0x2   :  { %v12_v2 = vld [vmem:[%s191_s0 + $0x20] sm:$0xff]  ;;  %v40_v3 = vmax.f32 %v8_v0, %v10_v1  ;;  %v14_v4 = vld [vmem:[%s191_s0 + $0x30] sm:$0xff]  ;;  %v11_v9 = vld [vmem:[%s191_s0 + $0x18] sm:$0xff] }
   0x3   :  { %v16_v6 = vld [vmem:[%s191_s0 + $0x40] sm:$0xff]  ;;  %v18_v10 = vld [vmem:[%s191_s0 + $0x50] sm:$0xff]  ;;  %v13_v11 = vld [vmem:[%s191_s0 + $0x28] sm:$0xff]  ;;  %v41_v12 = vmax.f32 %v9_v8, %v11_v9 }
   0x4   :  { %v42_v5 = vmax.f32 %v40_v3, %v12_v2  ;;  %v15_v14 = vld [vmem:[%s191_s0 + $0x38] sm:$0xff]  ;;  %v20_v15 = vld [vmem:[%s191_s0 + $0x60] sm:$0xff]  ;;  %v17_v18 = vld [vmem:[%s191_s0 + $0x48] sm:$0xff] }
   0x5   :  { %v43_v16 = vmax.f32 %v41_v12, %v13_v11  ;;  %v22_v19 = vld [vmem:[%s191_s0 + $0x70] sm:$0xff]  ;;  %v19_v22 = vld [vmem:[%s191_s0 + $0x58] sm:$0xff]  ;;  %v24_v23 = vld [vmem:[%s191_s0 + $0x80] sm:$0xff] }
   0x6   :  { %v44_v7 = vmax.f32 %v42_v5, %v14_v4  ;;  %v21_v26 = vld [vmem:[%s191_s0 + $0x68] sm:$0xff]  ;;  %v26_v27 = vld [vmem:[%s191_s0 + $0x90] sm:$0xff]  ;;  %v23_v30 = vld [vmem:[%s191_s0 + $0x78] sm:$0xff] }
   0x7   :  { %v45_v20 = vmax.f32 %v43_v16, %v15_v14  ;;  %v28_v31 = vld [vmem:[%s191_s0 + $0xa0] sm:$0xff]  ;;  %v25_v34 = vld [vmem:[%s191_s0 + $0x88] sm:$0xff]  ;;  %v30_v35 = vld [vmem:[%s191_s0 + $0xb0] sm:$0xff] }
   0x8   :  { %v46_v13 = vmax.f32 %v44_v7, %v16_v6  ;;  %v27_v38 = vld [vmem:[%s191_s0 + $0x98] sm:$0xff]  ;;  %v32_v39 = vld [vmem:[%s191_s0 + $0xc0] sm:$0xff]  ;;  %v29_v42 = vld [vmem:[%s191_s0 + $0xa8] sm:$0xff] }
   0x9   :  { %v47_v24 = vmax.f32 %v45_v20, %v17_v18  ;;  %v34_v43 = vld [vmem:[%s191_s0 + $0xd0] sm:$0xff]  ;;  %v31_v46 = vld [vmem:[%s191_s0 + $0xb8] sm:$0xff]  ;;  %v36_v47 = vld [vmem:[%s191_s0 + $0xe0] sm:$0xff] }
   0xa   :  { %v48_v17 = vmax.f32 %v46_v13, %v18_v10  ;;  %v33_v50 = vld [vmem:[%s191_s0 + $0xc8] sm:$0xff]  ;;  %v38_v51 = vld [vmem:[%s191_s0 + $0xf0] sm:$0xff]  ;;  %v35_v54 = vld [vmem:[%s191_s0 + $0xd8] sm:$0xff] }
   0xb   :  { %v49_v28 = vmax.f32 %v47_v24, %v19_v22  ;;  %v37_v57 = vld [vmem:[%s191_s0 + $0xe8] sm:$0xff]  ;;  %v39_v60 = vld [vmem:[%s191_s0 + $0xf8] sm:$0xff] }
   0xc   :  { %v50_v21 = vmax.f32 %v48_v17, %v20_v15 }
   0xd   :  { %v51_v32 = vmax.f32 %v49_v28, %v21_v26 }
   0xe   :  { %v52_v25 = vmax.f32 %v50_v21, %v22_v19 }
   0xf   :  { %v53_v36 = vmax.f32 %v51_v32, %v23_v30 }
  0x10   :  { %v54_v29 = vmax.f32 %v52_v25, %v24_v23 }
  0x11   :  { %v55_v40 = vmax.f32 %v53_v36, %v25_v34 }
  0x12   :  { %v56_v33 = vmax.f32 %v54_v29, %v26_v27 }
  0x13   :  { %v57_v44 = vmax.f32 %v55_v40, %v27_v38 }
  0x14   :  { %v58_v37 = vmax.f32 %v56_v33, %v28_v31 }
  0x15   :  { %v59_v48 = vmax.f32 %v57_v44, %v29_v42 }
  0x16   :  { %v60_v41 = vmax.f32 %v58_v37, %v30_v35 }
  0x17   :  { %v61_v52 = vmax.f32 %v59_v48, %v31_v46 }
  0x18   :  { %v62_v45 = vmax.f32 %v60_v41, %v32_v39 }
  0x19   :  { %v63_v55 = vmax.f32 %v61_v52, %v33_v50 }
  0x1a   :  { %v64_v49 = vmax.f32 %v62_v45, %v34_v43 }
  0x1b   :  { %v65_v58 = vmax.f32 %v63_v55, %v35_v54 }
  0x1c   :  { %v66_v53 = vmax.f32 %v64_v49, %v36_v47 }
  0x1d   :  { %v67_v61 = vmax.f32 %v65_v58, %v37_v57 }
  0x1e   :  { %v68_v56 = vmax.f32 %v66_v53, %v38_v51 }
  0x1f   :  { %v69_v62 = vmax.f32 %v67_v61, %v39_v60 }
  0x20   :  { %v70_v59 = vmax.f32 %v68_v56, 0.0 }
  0x21   :  { %v71_v63 = vmax.f32 %v69_v62, 0.0 }
  0x22   :  { %73 = vst.msk [vmem:[%s192_s1] sm:$0xff] %vm72_vm0, %v70_v59 }
  0x23   :  { %74 = vst.msk [vmem:[%s192_s1 + $0x8] sm:$0xff] %vm72_vm0, %v71_v63 }

// kernel: _lambda_.11
= control target key start
LH: loop header
LB: loop body
LE: loop exit
PB: predicated region body
PF: predicated region fallthrough
CT: control target
= control target key end

     0   :  { %vm567_vm0 = vcmask 1043456   ;;  %v1118_v0 = vmov 0   ;;  %v1119_v4 = vmov 0.0   ;;  %vm1120_vm1 = vmmov 0   ;;  %s1662_s2 = inlined_call_operand.vmem [shape: f32[400,1], index: 2, kind: input, shape index: {}]   ;;  %s1663_s1 = inlined_call_operand.vmem [shape: bf16[8,128], index: 1, kind: input, shape index: {}]   ;;  %s1664_s0 = inlined_call_operand.vmem [shape: bf16[400,8], index: 0, kind: input, shape index: {}]   ;;  %s1665_s3 = inlined_call_operand.vmem [shape: f32[400,128], index: 3, kind: output, shape index: {}]  }
   0x1   :  { %1092 = vset.pattern.permute.xlu1 %v1118_v0  ;;  %1091 = vset.pattern.permute.xlu0 %v1118_v0  ;;  %v68_v1 = vld [vmem:[%s1662_s2 + $0x10] sm:$0xff]  ;;  %v66_v2 = vld [vmem:[%s1662_s2] sm:$0xff]  ;;  %v69_v6 = vld [vmem:[%s1662_s2 + $0x18] sm:$0xff]  ;;  %vm491_vm2 = vcmask 64512  }
   0x2   :  { %v65_v3 = vld [vmem:[%s1663_s1] sm:$0xf]  ;;  %984 = vmatprep.subr.bf16.mxu0 %v1119_v4  ;;  %1086 = vmatprep.subr.bf16.mxu1 %v1119_v4  ;;  %v67_v7 = vld [vmem:[%s1662_s2 + $0x8] sm:$0xff]  ;;  %v73_v12 = vld [vmem:[%s1662_s2 + $0x38] sm:$0xff] }
   0x3   :  { %v569_v5 = vsel %vm567_vm0, %v65_v3, 0  ;;  %128 = vperm.xlu1 %1092, %v68_v1   ;;  %118 = vperm.xlu0 %1091, %v66_v2   ;;  %v1093_v8 = vld [vmem:[%s1664_s0] sm:$0xff]   ;;  %v1094_v9 = vld [vmem:[%s1664_s0 + $0x68] sm:$0xff]   ;;  %v72_v13 = vld [vmem:[%s1662_s2 + $0x30] sm:$0xff] }
   0x4   :  { %985 = vmatpush3.bf16.msra.mxu0 %v569_v5  ;;  %1087 = vmatpush3.bf16.msra.mxu1 %v569_v5  ;;  %v71_v10 = vld [vmem:[%s1662_s2 + $0x28] sm:$0xff]  ;;  %v70_v11 = vld [vmem:[%s1662_s2 + $0x20] sm:$0xff]  ;;  %v1096_v15 = vld [vmem:[%s1664_s0 + $0x70] sm:$0xff]  }
   0x5   :  { %986 = vmatprep.mubr.msk.bf16.mxu0 %vm1120_vm1, %v1119_v4  ;;  %1038 = vmatprep.mubr.msk.bf16.mxu1 %vm1120_vm1, %v1119_v4  ;;  %v1095_v14 = vld [vmem:[%s1664_s0 + $0x8] sm:$0xff]   ;;  %v74_v17 = vld [vmem:[%s1662_s2 + $0x40] sm:$0xff]  ;;  %v77_v18 = vld [vmem:[%s1662_s2 + $0x58] sm:$0xff] }
   0x6   :  { %v75_v16 = vld [vmem:[%s1662_s2 + $0x48] sm:$0xff]  ;;  %v76_v19 = vld [vmem:[%s1662_s2 + $0x50] sm:$0xff]  ;;  %v1098_v21 = vld [vmem:[%s1664_s0 + $0x78] sm:$0xff]  }
   0x7   :  { %133 = vperm.xlu1 %1092, %v69_v6   ;;  %123 = vperm.xlu0 %1091, %v67_v7   ;;  %v1097_v20 = vld [vmem:[%s1664_s0 + $0x10] sm:$0xff]   ;;  %v79_v22 = vld [vmem:[%s1662_s2 + $0x68] sm:$0xff]  ;;  %v78_v23 = vld [vmem:[%s1662_s2 + $0x60] sm:$0xff] }
   0x8   :  { %987 = vmatmul.mubr.msk.bf16.vlgmr.msra.gmra.mrb[0].mxu0 %vm491_vm2, %v1093_v8  ;;  %1039 = vmatmul.mubr.msk.bf16.vlgmr.msra.gmra.mrb[0].mxu1 %vm491_vm2, %v1094_v9  ;;  %v81_v24 = vld [vmem:[%s1662_s2 + $0x78] sm:$0xff]  ;;  %v80_v25 = vld [vmem:[%s1662_s2 + $0x70] sm:$0xff]  ;;  %v1100_v27 = vld [vmem:[%s1664_s0 + $0x80] sm:$0xff]  }
   0x9   :  { %990 = vmatprep.mubr.msk.bf16.mxu0 %vm1120_vm1, %v1119_v4  ;;  %1042 = vmatprep.mubr.msk.bf16.mxu1 %vm1120_vm1, %v1119_v4  ;;  %v1099_v26 = vld [vmem:[%s1664_s0 + $0x18] sm:$0xff]   ;;  %v83_v28 = vld [vmem:[%s1662_s2 + $0x88] sm:$0xff]  ;;  %v82_v29 = vld [vmem:[%s1662_s2 + $0x80] sm:$0xff] }
   0xa   :  { %v85_v30 = vld [vmem:[%s1662_s2 + $0x98] sm:$0xff]  ;;  %v84_v31 = vld [vmem:[%s1662_s2 + $0x90] sm:$0xff]  ;;  %v1101_v32 = vld [vmem:[%s1664_s0 + $0x20] sm:$0xff]  }
   0xb   :  { %143 = vperm.xlu1 %1092, %v71_v10   ;;  %138 = vperm.xlu0 %1091, %v70_v11   ;;  %v1102_v33 = vld [vmem:[%s1664_s0 + $0x88] sm:$0xff]   ;;  %v86_v35 = vld [vmem:[%s1662_s2 + $0xa0] sm:$0xff]  ;;  %v89_v36 = vld [vmem:[%s1662_s2 + $0xb8] sm:$0xff] }
   0xc   :  { %v87_v34 = vld [vmem:[%s1662_s2 + $0xa8] sm:$0xff]  ;;  %v88_v37 = vld [vmem:[%s1662_s2 + $0xb0] sm:$0xff]  ;;  %v90_v41 = vld [vmem:[%s1662_s2 + $0xc0] sm:$0xff] }
   0xd   :  { %v1103_v38 = vld [vmem:[%s1664_s0 + $0x28] sm:$0xff]   ;;  %v1104_v39 = vld [vmem:[%s1664_s0 + $0x90] sm:$0xff]   ;;  %v93_v42 = vld [vmem:[%s1662_s2 + $0xd8] sm:$0xff] }
   0xe   :  { %v91_v40 = vld [vmem:[%s1662_s2 + $0xc8] sm:$0xff]  ;;  %v92_v43 = vld [vmem:[%s1662_s2 + $0xd0] sm:$0xff]  ;;  %v1106_v45 = vld [vmem:[%s1664_s0 + $0x98] sm:$0xff]  }
   0xf   :  { %153 = vperm.xlu1 %1092, %v73_v12   ;;  %148 = vperm.xlu0 %1091, %v72_v13   ;;  %v1105_v44 = vld [vmem:[%s1664_s0 + $0x30] sm:$0xff]   ;;  %v95_v46 = vld [vmem:[%s1662_s2 + $0xe8] sm:$0xff]  ;;  %v94_v47 = vld [vmem:[%s1662_s2 + $0xe0] sm:$0xff] }
  0x10   :  { %991 = vmatmul.mubr.msk.bf16.gmra.mrb[4].mxu0 %vm491_vm2, %v1095_v14  ;;  %1043 = vmatmul.mubr.msk.bf16.gmra.mrb[4].mxu1 %vm491_vm2, %v1096_v15  ;;  %v97_v48 = vld [vmem:[%s1662_s2 + $0xf8] sm:$0xff]  ;;  %v96_v49 = vld [vmem:[%s1662_s2 + $0xf0] sm:$0xff]  ;;  %v1108_v51 = vld [vmem:[%s1664_s0 + $0xa0] sm:$0xff]  }
  0x11   :  { %994 = vmatprep.mubr.msk.bf16.mxu0 %vm1120_vm1, %v1119_v4  ;;  %1046 = vmatprep.mubr.msk.bf16.mxu1 %vm1120_vm1, %v1119_v4  ;;  %v1107_v50 = vld [vmem:[%s1664_s0 + $0x38] sm:$0xff]   ;;  %v99_v52 = vld [vmem:[%s1662_s2 + $0x108] sm:$0xff]  ;;  %v98_v53 = vld [vmem:[%s1662_s2 + $0x100] sm:$0xff] }
  0x12   :  { %v101_v54 = vld [vmem:[%s1662_s2 + $0x118] sm:$0xff]  ;;  %v100_v55 = vld [vmem:[%s1662_s2 + $0x110] sm:$0xff]  ;;  %v1109_v56 = vld [vmem:[%s1664_s0 + $0x40] sm:$0xff]  }
  0x13   :  { %163 = vperm.xlu1 %1092, %v75_v16   ;;  %158 = vperm.xlu0 %1091, %v74_v17   ;;  %v1110_v57 = vld [vmem:[%s1664_s0 + $0xa8] sm:$0xff]   ;;  %v102_v59 = vld [vmem:[%s1662_s2 + $0x120] sm:$0xff]  ;;  %v105_v60 = vld [vmem:[%s1662_s2 + $0x138] sm:$0xff] }
  0x14   :  { %v103_v58 = vld [vmem:[%s1662_s2 + $0x128] sm:$0xff]  ;;  %v104_v61 = vld [vmem:[%s1662_s2 + $0x130] sm:$0xff]  ;;  %v106_v1 = vld [vmem:[%s1662_s2 + $0x140] sm:$0xff] }
  0x15   :  { %v1111_v62 = vld [vmem:[%s1664_s0 + $0x48] sm:$0xff]   ;;  %v1112_v63 = vld [vmem:[%s1664_s0 + $0xb0] sm:$0xff]   ;;  %v109_v2 = vld [vmem:[%s1662_s2 + $0x158] sm:$0xff] }
  0x16   :  { %v107_v0 = vld [vmem:[%s1662_s2 + $0x148] sm:$0xff]  ;;  %v108_v3 = vld [vmem:[%s1662_s2 + $0x150] sm:$0xff]  ;;  %v1114_v6 = vld [vmem:[%s1664_s0 + $0xb8] sm:$0xff]  }
  0x17   :  { %173 = vperm.xlu1 %1092, %v77_v18   ;;  %168 = vperm.xlu0 %1091, %v76_v19   ;;  %v1113_v5 = vld [vmem:[%s1664_s0 + $0x50] sm:$0xff]   ;;  %v111_v7 = vld [vmem:[%s1662_s2 + $0x168] sm:$0xff]  ;;  %v110_v8 = vld [vmem:[%s1662_s2 + $0x160] sm:$0xff] }
  0x18   :  { %995 = vmatmul.mubr.msk.bf16.gmra.mrb[8].mxu0 %vm491_vm2, %v1097_v20  ;;  %1047 = vmatmul.mubr.msk.bf16.gmra.mrb[8].mxu1 %vm491_vm2, %v1098_v21  ;;  %v113_v9 = vld [vmem:[%s1662_s2 + $0x178] sm:$0xff]  ;;  %v112_v10 = vld [vmem:[%s1662_s2 + $0x170] sm:$0xff]  ;;  %v1116_v12 = vld [vmem:[%s1664_s0 + $0xc0] sm:$0xff]  }
  0x19   :  { %998 = vmatprep.mubr.msk.bf16.mxu0 %vm1120_vm1, %v1119_v4  ;;  %1050 = vmatprep.mubr.msk.bf16.mxu1 %vm1120_vm1, %v1119_v4  ;;  %v1115_v11 = vld [vmem:[%s1664_s0 + $0x58] sm:$0xff]   ;;  %v115_v13 = vld [vmem:[%s1662_s2 + $0x188] sm:$0xff]  ;;  %v114_v14 = vld [vmem:[%s1662_s2 + $0x180] sm:$0xff] }
  0x1a   :  { %v1117_v15 = vld [vmem:[%s1664_s0 + $0x60] sm:$0xff]  }
  0x1b   :  { %183 = vperm.xlu1 %1092, %v79_v22   ;;  %178 = vperm.xlu0 %1091, %v78_v23  }
  0x1f   :  { %193 = vperm.xlu1 %1092, %v81_v24   ;;  %188 = vperm.xlu0 %1091, %v80_v25  }
  0x20   :  { %999 = vmatmul.mubr.msk.bf16.gmra.mrb[12].mxu0 %vm491_vm2, %v1099_v26  ;;  %1051 = vmatmul.mubr.msk.bf16.gmra.mrb[12].mxu1 %vm491_vm2, %v1100_v27 }
  0x21   :  { %1002 = vmatprep.mubr.msk.bf16.mxu0 %vm1120_vm1, %v1119_v4  ;;  %1054 = vmatprep.mubr.msk.bf16.mxu1 %vm1120_vm1, %v1119_v4 }
  0x23   :  { %203 = vperm.xlu1 %1092, %v83_v28   ;;  %198 = vperm.xlu0 %1091, %v82_v29  }
  0x27   :  { %213 = vperm.xlu1 %1092, %v85_v30   ;;  %208 = vperm.xlu0 %1091, %v84_v31  }
  0x28   :  { %1003 = vmatmul.mubr.msk.bf16.gmra.mrb[16].mxu0 %vm491_vm2, %v1101_v32  ;;  %1055 = vmatmul.mubr.msk.bf16.gmra.mrb[16].mxu1 %vm491_vm2, %v1102_v33 }
  0x29   :  { %1006 = vmatprep.mubr.msk.bf16.mxu0 %vm1120_vm1, %v1119_v4  ;;  %1058 = vmatprep.mubr.msk.bf16.mxu1 %vm1120_vm1, %v1119_v4 }
  0x2b   :  { %223 = vperm.xlu1 %1092, %v87_v34   ;;  %218 = vperm.xlu0 %1091, %v86_v35  }
  0x2f   :  { %233 = vperm.xlu1 %1092, %v89_v36   ;;  %228 = vperm.xlu0 %1091, %v88_v37  }
  0x30   :  { %1007 = vmatmul.mubr.msk.bf16.gmra.mrb[20].mxu0 %vm491_vm2, %v1103_v38  ;;  %1059 = vmatmul.mubr.msk.bf16.gmra.mrb[20].mxu1 %vm491_vm2, %v1104_v39 }
  0x31   :  { %1010 = vmatprep.mubr.msk.bf16.mxu0 %vm1120_vm1, %v1119_v4  ;;  %1062 = vmatprep.mubr.msk.bf16.mxu1 %vm1120_vm1, %v1119_v4 }
  0x33   :  { %243 = vperm.xlu1 %1092, %v91_v40   ;;  %238 = vperm.xlu0 %1091, %v90_v41  }
  0x37   :  { %253 = vperm.xlu1 %1092, %v93_v42   ;;  %248 = vperm.xlu0 %1091, %v92_v43  }
  0x38   :  { %1011 = vmatmul.mubr.msk.bf16.gmra.mrb[24].mxu0 %vm491_vm2, %v1105_v44  ;;  %1063 = vmatmul.mubr.msk.bf16.gmra.mrb[24].mxu1 %vm491_vm2, %v1106_v45 }
  0x39   :  { %1014 = vmatprep.mubr.msk.bf16.mxu0 %vm1120_vm1, %v1119_v4  ;;  %1066 = vmatprep.mubr.msk.bf16.mxu1 %vm1120_vm1, %v1119_v4 }
  0x3b   :  { %263 = vperm.xlu1 %1092, %v95_v46   ;;  %258 = vperm.xlu0 %1091, %v94_v47  }
  0x3f   :  { %273 = vperm.xlu1 %1092, %v97_v48   ;;  %268 = vperm.xlu0 %1091, %v96_v49  }
  0x40   :  { %1015 = vmatmul.mubr.msk.bf16.gmra.mrb[28].mxu0 %vm491_vm2, %v1107_v50  ;;  %1067 = vmatmul.mubr.msk.bf16.gmra.mrb[28].mxu1 %vm491_vm2, %v1108_v51 }
  0x41   :  { %1018 = vmatprep.mubr.msk.bf16.mxu0 %vm1120_vm1, %v1119_v4  ;;  %1070 = vmatprep.mubr.msk.bf16.mxu1 %vm1120_vm1, %v1119_v4 }
  0x43   :  { %283 = vperm.xlu1 %1092, %v99_v52   ;;  %278 = vperm.xlu0 %1091, %v98_v53  }
  0x47   :  { %293 = vperm.xlu1 %1092, %v101_v54   ;;  %288 = vperm.xlu0 %1091, %v100_v55  }
  0x48   :  { %1019 = vmatmul.mubr.msk.bf16.gmra.mrb[32].mxu0 %vm491_vm2, %v1109_v56  ;;  %1071 = vmatmul.mubr.msk.bf16.gmra.mrb[32].mxu1 %vm491_vm2, %v1110_v57 }
  0x49   :  { %1022 = vmatprep.mubr.msk.bf16.mxu0 %vm1120_vm1, %v1119_v4  ;;  %1074 = vmatprep.mubr.msk.bf16.mxu1 %vm1120_vm1, %v1119_v4 }
  0x4b   :  { %303 = vperm.xlu1 %1092, %v103_v58   ;;  %298 = vperm.xlu0 %1091, %v102_v59  }
  0x4f   :  { %313 = vperm.xlu1 %1092, %v105_v60   ;;  %308 = vperm.xlu0 %1091, %v104_v61  }
  0x50   :  { %1023 = vmatmul.mubr.msk.bf16.gmra.mrb[36].mxu0 %vm491_vm2, %v1111_v62  ;;  %1075 = vmatmul.mubr.msk.bf16.gmra.mrb[36].mxu1 %vm491_vm2, %v1112_v63 }
  0x51   :  { %1026 = vmatprep.mubr.msk.bf16.mxu0 %vm1120_vm1, %v1119_v4  ;;  %1078 = vmatprep.mubr.msk.bf16.mxu1 %vm1120_vm1, %v1119_v4 }
  0x53   :  { %323 = vperm.xlu1 %1092, %v107_v0   ;;  %318 = vperm.xlu0 %1091, %v106_v1  }
  0x57   :  { %333 = vperm.xlu1 %1092, %v109_v2   ;;  %328 = vperm.xlu0 %1091, %v108_v3  }
  0x58   :  { %1027 = vmatmul.mubr.msk.bf16.gmra.mrb[40].mxu0 %vm491_vm2, %v1113_v5  ;;  %1079 = vmatmul.mubr.msk.bf16.gmra.mrb[40].mxu1 %vm491_vm2, %v1114_v6 }
  0x59   :  { %1030 = vmatprep.mubr.msk.bf16.mxu0 %vm1120_vm1, %v1119_v4  ;;  %1082 = vmatprep.mubr.msk.bf16.mxu1 %vm1120_vm1, %v1119_v4 }
  0x5b   :  { %343 = vperm.xlu1 %1092, %v111_v7   ;;  %338 = vperm.xlu0 %1091, %v110_v8  }
  0x5f   :  { %353 = vperm.xlu1 %1092, %v113_v9   ;;  %348 = vperm.xlu0 %1091, %v112_v10  }
  0x60   :  { %1031 = vmatmul.mubr.msk.bf16.gmra.mrb[44].mxu0 %vm491_vm2, %v1115_v11  ;;  %1083 = vmatmul.mubr.msk.bf16.gmra.mrb[44].mxu1 %vm491_vm2, %v1116_v12 }
  0x61   :  { %1034 = vmatprep.mubr.msk.bf16.mxu0 %vm1120_vm1, %v1119_v4 }
  0x63   :  { %363 = vperm.xlu1 %1092, %v115_v13   ;;  %358 = vperm.xlu0 %1091, %v114_v14  }
  0x68   :  { %1035 = vmatmul.mubr.msk.bf16.gmra.mrb[48].mxu0 %vm491_vm2, %v1117_v15 }
  0x82   :  { %v129_v16 = vpop.permute.xlu1 %128  ;;  %v119_v17 = vpop.permute.xlu0 %118 }
  0x86   :  { %v134_v18 = vpop.permute.xlu1 %133  ;;  %v124_v19 = vpop.permute.xlu0 %123 }
  0x8a   :  { %v1446_v20 = vpop.permute.xlu1 %143  ;;  %v1448_v21 = vpop.permute.xlu0 %138 }
  0x8e   :  { %v1450_v22 = vpop.permute.xlu1 %153  ;;  %v1452_v23 = vpop.permute.xlu0 %148 }
  0x92   :  { %v1454_v4 = vpop.permute.xlu1 %163  ;;  %v1456_v24 = vpop.permute.xlu0 %158 }
  0x96   :  { %v1458_v25 = vpop.permute.xlu1 %173  ;;  %v1460_v26 = vpop.permute.xlu0 %168 }
  0x9a   :  { %v1462_v27 = vpop.permute.xlu1 %183  ;;  %v1464_v28 = vpop.permute.xlu0 %178 }
  0x9e   :  { %v1466_v29 = vpop.permute.xlu1 %193  ;;  %v1468_v30 = vpop.permute.xlu0 %188 }
  0xa2   :  { %v1470_v31 = vpop.permute.xlu1 %203  ;;  %v1472_v32 = vpop.permute.xlu0 %198 }
  0xa6   :  { %v1474_v33 = vpop.permute.xlu1 %213  ;;  %v1476_v34 = vpop.permute.xlu0 %208 }
  0xaa   :  { %v1478_v35 = vpop.permute.xlu1 %223  ;;  %v1480_v36 = vpop.permute.xlu0 %218 }
  0xae   :  { %v1482_v37 = vpop.permute.xlu1 %233  ;;  %v1484_v38 = vpop.permute.xlu0 %228 }
  0xb2   :  { %v1486_v39 = vpop.permute.xlu1 %243  ;;  %v1488_v40 = vpop.permute.xlu0 %238 }
  0xb6   :  { %v254_v41 = vpop.permute.xlu1 %253  ;;  %v249_v42 = vpop.permute.xlu0 %248 }
  0xba   :  { %v264_v59 = vpop.permute.xlu1 %263  ;;  %v259_v60 = vpop.permute.xlu0 %258 }
  0xbe   :  { %v274_v14 = vpop.permute.xlu1 %273  ;;  %v269_v15 = vpop.permute.xlu0 %268 }
  0xdb   :  { %v605_v43 = vpop.f32.mrb[0].mxu0  ;;  %v709_v44 = vpop.f32.mrb[0].mxu1 }
  0xdc   :  { %v606_v45 = vadd.f32 %v605_v43, %v119_v17  ;;  %v710_v46 = vadd.f32 %v709_v44, %v249_v42  ;;  %v988_v47 = vpop.f32.mrb[1].mxu0  ;;  %v1040_v48 = vpop.f32.mrb[1].mxu1 }
  0xdd   :  { %v608_v49 = vpop.f32.mrb[2].mxu0  ;;  %v712_v50 = vpop.f32.mrb[2].mxu1 }
  0xde   :  { %v804_v51 = vmax.f32 %v606_v45, 0.0  ;;  %v830_v52 = vmax.f32 %v710_v46, 0.0  ;;  %v609_v53 = vadd.f32 %v608_v49, %v124_v19  ;;  %v713_v54 = vadd.f32 %v712_v50, %v254_v41  ;;  %v989_v55 = vpop.f32.mrb[3].mxu0  ;;  %v1041_v56 = vpop.f32.mrb[3].mxu1 }
  0xe0   :  { %854 = vst [vmem:[%s1665_s3] sm:$0xff] %v804_v51  ;;  %880 = vst [vmem:[%s1665_s3 + $0xd0] sm:$0xff] %v830_v52  ;;  %v805_v57 = vmax.f32 %v609_v53, 0.0  ;;  %v831_v58 = vmax.f32 %v713_v54, 0.0  ;;  %v284_v52 = vpop.permute.xlu1 %283  ;;  %v279_v53 = vpop.permute.xlu0 %278 }
  0xe2   :  { %855 = vst [vmem:[%s1665_s3 + $0x8] sm:$0xff] %v805_v57  ;;  %881 = vst [vmem:[%s1665_s3 + $0xd8] sm:$0xff] %v831_v58 }
  0xe3   :  { %v613_v61 = vpop.f32.mrb[4].mxu0  ;;  %v717_v63 = vpop.f32.mrb[4].mxu1 }
  0xe4   :  { %v614_v62 = vadd.f32 %v613_v61, %v129_v16  ;;  %v992_v0 = vpop.f32.mrb[5].mxu0  ;;  %v718_v1 = vadd.f32 %v717_v63, %v259_v60  ;;  %v1044_v2 = vpop.f32.mrb[5].mxu1 }
  0xe5   :  { %v616_v3 = vpop.f32.mrb[6].mxu0  ;;  %v720_v7 = vpop.f32.mrb[6].mxu1 }
  0xe6   :  { %v806_v5 = vmax.f32 %v614_v62, 0.0  ;;  %v617_v6 = vadd.f32 %v616_v3, %v134_v18  ;;  %v993_v8 = vpop.f32.mrb[7].mxu0  ;;  %v832_v9 = vmax.f32 %v718_v1, 0.0  ;;  %v721_v10 = vadd.f32 %v720_v7, %v264_v59  ;;  %v1045_v11 = vpop.f32.mrb[7].mxu1 }
  0xe8   :  { %856 = vst [vmem:[%s1665_s3 + $0x10] sm:$0xff] %v806_v5  ;;  %v807_v12 = vmax.f32 %v617_v6, 0.0  ;;  %882 = vst [vmem:[%s1665_s3 + $0xe0] sm:$0xff] %v832_v9  ;;  %v833_v13 = vmax.f32 %v721_v10, 0.0  ;;  %v294_v5 = vpop.permute.xlu1 %293  ;;  %v289_v6 = vpop.permute.xlu0 %288 }
  0xea   :  { %857 = vst [vmem:[%s1665_s3 + $0x18] sm:$0xff] %v807_v12  ;;  %883 = vst [vmem:[%s1665_s3 + $0xe8] sm:$0xff] %v833_v13 }
  0xeb   :  { %v621_v16 = vpop.f32.mrb[8].mxu0  ;;  %v725_v17 = vpop.f32.mrb[8].mxu1 }
  0xec   :  { %v622_v18 = vadd.f32 %v621_v16, %v1448_v21  ;;  %v726_v19 = vadd.f32 %v725_v17, %v269_v15  ;;  %v996_v41 = vpop.f32.mrb[9].mxu0  ;;  %v1048_v42 = vpop.f32.mrb[9].mxu1 }
  0xed   :  { %v624_v43 = vpop.f32.mrb[10].mxu0  ;;  %v728_v44 = vpop.f32.mrb[10].mxu1 }
  0xee   :  { %v808_v45 = vmax.f32 %v622_v18, 0.0  ;;  %v834_v46 = vmax.f32 %v726_v19, 0.0  ;;  %v625_v47 = vadd.f32 %v624_v43, %v1446_v20  ;;  %v729_v48 = vadd.f32 %v728_v44, %v274_v14  ;;  %v997_v49 = vpop.f32.mrb[11].mxu0  ;;  %v1049_v50 = vpop.f32.mrb[11].mxu1 }
  0xef   :  { %v304_v42 = vpop.permute.xlu1 %303  ;;  %v299_v43 = vpop.permute.xlu0 %298 }
  0xf0   :  { %858 = vst [vmem:[%s1665_s3 + $0x20] sm:$0xff] %v808_v45  ;;  %884 = vst [vmem:[%s1665_s3 + $0xf0] sm:$0xff] %v834_v46  ;;  %v809_v21 = vmax.f32 %v625_v47, 0.0  ;;  %v835_v51 = vmax.f32 %v729_v48, 0.0 }
  0xf2   :  { %859 = vst [vmem:[%s1665_s3 + $0x28] sm:$0xff] %v809_v21  ;;  %885 = vst [vmem:[%s1665_s3 + $0xf8] sm:$0xff] %v835_v51 }
  0xf3   :  { %v629_v20 = vpop.f32.mrb[12].mxu0  ;;  %v733_v54 = vpop.f32.mrb[12].mxu1 }
  0xf4   :  { %v630_v55 = vadd.f32 %v629_v20, %v1452_v23  ;;  %v734_v56 = vadd.f32 %v733_v54, %v279_v53  ;;  %v1000_v57 = vpop.f32.mrb[13].mxu0  ;;  %v1052_v58 = vpop.f32.mrb[13].mxu1 }
  0xf5   :  { %v632_v59 = vpop.f32.mrb[14].mxu0  ;;  %v736_v60 = vpop.f32.mrb[14].mxu1 }
  0xf6   :  { %v810_v61 = vmax.f32 %v630_v55, 0.0  ;;  %v836_v62 = vmax.f32 %v734_v56, 0.0  ;;  %v633_v63 = vadd.f32 %v632_v59, %v1450_v22  ;;  %v737_v0 = vadd.f32 %v736_v60, %v284_v52  ;;  %v1001_v1 = vpop.f32.mrb[15].mxu0  ;;  %v1053_v2 = vpop.f32.mrb[15].mxu1 }
  0xf7   :  { %v314_v56 = vpop.permute.xlu1 %313  ;;  %v309_v57 = vpop.permute.xlu0 %308 }
  0xf8   :  { %860 = vst [vmem:[%s1665_s3 + $0x30] sm:$0xff] %v810_v61  ;;  %886 = vst [vmem:[%s1665_s3 + $0x100] sm:$0xff] %v836_v62  ;;  %v811_v23 = vmax.f32 %v633_v63, 0.0  ;;  %v837_v3 = vmax.f32 %v737_v0, 0.0 }
  0xfa   :  { %861 = vst [vmem:[%s1665_s3 + $0x38] sm:$0xff] %v811_v23  ;;  %887 = vst [vmem:[%s1665_s3 + $0x108] sm:$0xff] %v837_v3 }
  0xfb   :  { %v637_v22 = vpop.f32.mrb[16].mxu0  ;;  %v741_v7 = vpop.f32.mrb[16].mxu1 }
  0xfc   :  { %v638_v8 = vadd.f32 %v637_v22, %v1456_v24  ;;  %v742_v9 = vadd.f32 %v741_v7, %v289_v6  ;;  %v1004_v10 = vpop.f32.mrb[17].mxu0  ;;  %v1056_v11 = vpop.f32.mrb[17].mxu1 }
  0xfd   :  { %v640_v12 = vpop.f32.mrb[18].mxu0  ;;  %v744_v13 = vpop.f32.mrb[18].mxu1 }
  0xfe   :  { %v812_v14 = vmax.f32 %v638_v8, 0.0  ;;  %v838_v15 = vmax.f32 %v742_v9, 0.0  ;;  %v641_v16 = vadd.f32 %v640_v12, %v1454_v4  ;;  %v745_v17 = vadd.f32 %v744_v13, %v294_v5  ;;  %v1005_v18 = vpop.f32.mrb[19].mxu0  ;;  %v1057_v19 = vpop.f32.mrb[19].mxu1 }
  0xff   :  { %v324_v7 = vpop.permute.xlu1 %323  ;;  %v319_v8 = vpop.permute.xlu0 %318 }
 0x100   :  { %862 = vst [vmem:[%s1665_s3 + $0x40] sm:$0xff] %v812_v14  ;;  %888 = vst [vmem:[%s1665_s3 + $0x110] sm:$0xff] %v838_v15  ;;  %v813_v24 = vmax.f32 %v641_v16, 0.0  ;;  %v839_v41 = vmax.f32 %v745_v17, 0.0 }
 0x102   :  { %863 = vst [vmem:[%s1665_s3 + $0x48] sm:$0xff] %v813_v24  ;;  %889 = vst [vmem:[%s1665_s3 + $0x118] sm:$0xff] %v839_v41 }
 0x103   :  { %v645_v4 = vpop.f32.mrb[20].mxu0  ;;  %v749_v44 = vpop.f32.mrb[20].mxu1 }
 0x104   :  { %v646_v45 = vadd.f32 %v645_v4, %v1460_v26  ;;  %v750_v46 = vadd.f32 %v749_v44, %v299_v43  ;;  %v1008_v47 = vpop.f32.mrb[21].mxu0  ;;  %v1060_v48 = vpop.f32.mrb[21].mxu1 }
 0x105   :  { %v648_v49 = vpop.f32.mrb[22].mxu0  ;;  %v752_v50 = vpop.f32.mrb[22].mxu1 }
 0x106   :  { %v814_v21 = vmax.f32 %v646_v45, 0.0  ;;  %v840_v51 = vmax.f32 %v750_v46, 0.0  ;;  %v649_v52 = vadd.f32 %v648_v49, %v1458_v25  ;;  %v753_v53 = vadd.f32 %v752_v50, %v304_v42  ;;  %v1009_v20 = vpop.f32.mrb[23].mxu0  ;;  %v1061_v54 = vpop.f32.mrb[23].mxu1 }
 0x107   :  { %v334_v43 = vpop.permute.xlu1 %333  ;;  %v329_v4 = vpop.permute.xlu0 %328 }
 0x108   :  { %864 = vst [vmem:[%s1665_s3 + $0x50] sm:$0xff] %v814_v21  ;;  %890 = vst [vmem:[%s1665_s3 + $0x120] sm:$0xff] %v840_v51  ;;  %v815_v26 = vmax.f32 %v649_v52, 0.0  ;;  %v841_v55 = vmax.f32 %v753_v53, 0.0 }
 0x10a   :  { %865 = vst [vmem:[%s1665_s3 + $0x58] sm:$0xff] %v815_v26  ;;  %891 = vst [vmem:[%s1665_s3 + $0x128] sm:$0xff] %v841_v55 }
 0x10b   :  { %v653_v25 = vpop.f32.mrb[24].mxu0  ;;  %v757_v58 = vpop.f32.mrb[24].mxu1 }
 0x10c   :  { %v654_v59 = vadd.f32 %v653_v25, %v1464_v28  ;;  %v758_v60 = vadd.f32 %v757_v58, %v309_v57  ;;  %v1012_v61 = vpop.f32.mrb[25].mxu0  ;;  %v1064_v62 = vpop.f32.mrb[25].mxu1 }
 0x10d   :  { %v656_v63 = vpop.f32.mrb[26].mxu0  ;;  %v760_v0 = vpop.f32.mrb[26].mxu1 }
 0x10e   :  { %v816_v1 = vmax.f32 %v654_v59, 0.0  ;;  %v842_v2 = vmax.f32 %v758_v60, 0.0  ;;  %v657_v23 = vadd.f32 %v656_v63, %v1462_v27  ;;  %v761_v3 = vadd.f32 %v760_v0, %v314_v56  ;;  %v1013_v5 = vpop.f32.mrb[27].mxu0  ;;  %v1065_v6 = vpop.f32.mrb[27].mxu1 }
 0x10f   :  { %v344_v55 = vpop.permute.xlu1 %343  ;;  %v339_v56 = vpop.permute.xlu0 %338 }
 0x110   :  { %866 = vst [vmem:[%s1665_s3 + $0x60] sm:$0xff] %v816_v1  ;;  %892 = vst [vmem:[%s1665_s3 + $0x130] sm:$0xff] %v842_v2  ;;  %v817_v28 = vmax.f32 %v657_v23, 0.0  ;;  %v843_v22 = vmax.f32 %v761_v3, 0.0 }
 0x112   :  { %867 = vst [vmem:[%s1665_s3 + $0x68] sm:$0xff] %v817_v28  ;;  %893 = vst [vmem:[%s1665_s3 + $0x138] sm:$0xff] %v843_v22 }
 0x113   :  { %v661_v27 = vpop.f32.mrb[28].mxu0  ;;  %v765_v9 = vpop.f32.mrb[28].mxu1 }
 0x114   :  { %v662_v10 = vadd.f32 %v661_v27, %v1468_v30  ;;  %v766_v11 = vadd.f32 %v765_v9, %v319_v8  ;;  %v1016_v12 = vpop.f32.mrb[29].mxu0  ;;  %v1068_v13 = vpop.f32.mrb[29].mxu1 }
 0x115   :  { %v664_v14 = vpop.f32.mrb[30].mxu0  ;;  %v768_v15 = vpop.f32.mrb[30].mxu1 }
 0x116   :  { %v818_v16 = vmax.f32 %v662_v10, 0.0  ;;  %v844_v17 = vmax.f32 %v766_v11, 0.0  ;;  %v665_v18 = vadd.f32 %v664_v14, %v1466_v29  ;;  %v769_v19 = vadd.f32 %v768_v15, %v324_v7  ;;  %v1017_v24 = vpop.f32.mrb[31].mxu0  ;;  %v1069_v41 = vpop.f32.mrb[31].mxu1 }
 0x117   :  { %v354_v6 = vpop.permute.xlu1 %353  ;;  %v349_v28 = vpop.permute.xlu0 %348 }
 0x118   :  { %868 = vst [vmem:[%s1665_s3 + $0x70] sm:$0xff] %v818_v16  ;;  %894 = vst [vmem:[%s1665_s3 + $0x140] sm:$0xff] %v844_v17  ;;  %v819_v30 = vmax.f32 %v665_v18, 0.0  ;;  %v845_v42 = vmax.f32 %v769_v19, 0.0 }
 0x11a   :  { %869 = vst [vmem:[%s1665_s3 + $0x78] sm:$0xff] %v819_v30  ;;  %895 = vst [vmem:[%s1665_s3 + $0x148] sm:$0xff] %v845_v42 }
 0x11b   :  { %v669_v29 = vpop.f32.mrb[32].mxu0  ;;  %v773_v44 = vpop.f32.mrb[32].mxu1 }
 0x11c   :  { %v670_v45 = vadd.f32 %v669_v29, %v1472_v32  ;;  %v774_v46 = vadd.f32 %v773_v44, %v329_v4  ;;  %v1020_v47 = vpop.f32.mrb[33].mxu0  ;;  %v1072_v48 = vpop.f32.mrb[33].mxu1 }
 0x11d   :  { %v672_v49 = vpop.f32.mrb[34].mxu0  ;;  %v776_v50 = vpop.f32.mrb[34].mxu1 }
 0x11e   :  { %v820_v21 = vmax.f32 %v670_v45, 0.0  ;;  %v846_v51 = vmax.f32 %v774_v46, 0.0  ;;  %v673_v52 = vadd.f32 %v672_v49, %v1470_v31  ;;  %v777_v53 = vadd.f32 %v776_v50, %v334_v43  ;;  %v1021_v20 = vpop.f32.mrb[35].mxu0  ;;  %v1073_v54 = vpop.f32.mrb[35].mxu1 }
 0x11f   :  { %v364_v19 = vpop.permute.xlu1 %363  ;;  %v359_v24 = vpop.permute.xlu0 %358 }
 0x120   :  { %870 = vst [vmem:[%s1665_s3 + $0x80] sm:$0xff] %v820_v21  ;;  %896 = vst [vmem:[%s1665_s3 + $0x150] sm:$0xff] %v846_v51  ;;  %v821_v32 = vmax.f32 %v673_v52, 0.0  ;;  %v847_v26 = vmax.f32 %v777_v53, 0.0 }
 0x122   :  { %871 = vst [vmem:[%s1665_s3 + $0x88] sm:$0xff] %v821_v32  ;;  %897 = vst [vmem:[%s1665_s3 + $0x158] sm:$0xff] %v847_v26 }
 0x123   :  { %v677_v31 = vpop.f32.mrb[36].mxu0  ;;  %v781_v57 = vpop.f32.mrb[36].mxu1 }
 0x124   :  { %v678_v25 = vadd.f32 %v677_v31, %v1476_v34  ;;  %v782_v58 = vadd.f32 %v781_v57, %v339_v56  ;;  %v1024_v59 = vpop.f32.mrb[37].mxu0  ;;  %v1076_v60 = vpop.f32.mrb[37].mxu1 }
 0x125   :  { %v680_v61 = vpop.f32.mrb[38].mxu0  ;;  %v784_v62 = vpop.f32.mrb[38].mxu1 }
 0x126   :  { %v822_v63 = vmax.f32 %v678_v25, 0.0  ;;  %v848_v0 = vmax.f32 %v782_v58, 0.0  ;;  %v681_v1 = vadd.f32 %v680_v61, %v1474_v33  ;;  %v785_v2 = vadd.f32 %v784_v62, %v344_v55  ;;  %v1025_v23 = vpop.f32.mrb[39].mxu0  ;;  %v1077_v3 = vpop.f32.mrb[39].mxu1 }
 0x128   :  { %872 = vst [vmem:[%s1665_s3 + $0x90] sm:$0xff] %v822_v63  ;;  %898 = vst [vmem:[%s1665_s3 + $0x160] sm:$0xff] %v848_v0  ;;  %v823_v34 = vmax.f32 %v681_v1, 0.0  ;;  %v849_v5 = vmax.f32 %v785_v2, 0.0 }
 0x12a   :  { %873 = vst [vmem:[%s1665_s3 + $0x98] sm:$0xff] %v823_v34  ;;  %899 = vst [vmem:[%s1665_s3 + $0x168] sm:$0xff] %v849_v5 }
 0x12b   :  { %v685_v33 = vpop.f32.mrb[40].mxu0  ;;  %v789_v22 = vpop.f32.mrb[40].mxu1 }
 0x12c   :  { %v686_v7 = vadd.f32 %v685_v33, %v1480_v36  ;;  %v790_v8 = vadd.f32 %v789_v22, %v349_v28  ;;  %v1028_v27 = vpop.f32.mrb[41].mxu0  ;;  %v1080_v9 = vpop.f32.mrb[41].mxu1 }
 0x12d   :  { %v688_v10 = vpop.f32.mrb[42].mxu0  ;;  %v792_v11 = vpop.f32.mrb[42].mxu1 }
 0x12e   :  { %v824_v12 = vmax.f32 %v686_v7, 0.0  ;;  %v850_v13 = vmax.f32 %v790_v8, 0.0  ;;  %v689_v14 = vadd.f32 %v688_v10, %v1478_v35  ;;  %v793_v15 = vadd.f32 %v792_v11, %v354_v6  ;;  %v1029_v16 = vpop.f32.mrb[43].mxu0  ;;  %v1081_v17 = vpop.f32.mrb[43].mxu1 }
 0x130   :  { %874 = vst [vmem:[%s1665_s3 + $0xa0] sm:$0xff] %v824_v12  ;;  %900 = vst [vmem:[%s1665_s3 + $0x170] sm:$0xff] %v850_v13  ;;  %v825_v36 = vmax.f32 %v689_v14, 0.0  ;;  %v851_v18 = vmax.f32 %v793_v15, 0.0 }
 0x132   :  { %875 = vst [vmem:[%s1665_s3 + $0xa8] sm:$0xff] %v825_v36  ;;  %901 = vst [vmem:[%s1665_s3 + $0x178] sm:$0xff] %v851_v18 }
 0x133   :  { %v693_v35 = vpop.f32.mrb[44].mxu0  ;;  %v797_v41 = vpop.f32.mrb[44].mxu1 }
 0x134   :  { %v694_v30 = vadd.f32 %v693_v35, %v1484_v38  ;;  %v798_v42 = vadd.f32 %v797_v41, %v359_v24  ;;  %v1032_v43 = vpop.f32.mrb[45].mxu0  ;;  %v1084_v4 = vpop.f32.mrb[45].mxu1 }
 0x135   :  { %v696_v29 = vpop.f32.mrb[46].mxu0  ;;  %v800_v44 = vpop.f32.mrb[46].mxu1 }
 0x136   :  { %v826_v45 = vmax.f32 %v694_v30, 0.0  ;;  %v852_v46 = vmax.f32 %v798_v42, 0.0  ;;  %v697_v47 = vadd.f32 %v696_v29, %v1482_v37  ;;  %v801_v48 = vadd.f32 %v800_v44, %v364_v19  ;;  %v1033_v49 = vpop.f32.mrb[47].mxu0  ;;  %v1085_v50 = vpop.f32.mrb[47].mxu1 }
 0x138   :  { %876 = vst [vmem:[%s1665_s3 + $0xb0] sm:$0xff] %v826_v45  ;;  %902 = vst [vmem:[%s1665_s3 + $0x180] sm:$0xff] %v852_v46  ;;  %v827_v38 = vmax.f32 %v697_v47, 0.0  ;;  %v853_v21 = vmax.f32 %v801_v48, 0.0 }
 0x13a   :  { %877 = vst [vmem:[%s1665_s3 + $0xb8] sm:$0xff] %v827_v38  ;;  %903 = vst [vmem:[%s1665_s3 + $0x188] sm:$0xff] %v853_v21 }
 0x13b   :  { %v701_v37 = vpop.f32.mrb[48].mxu0 }
 0x13c   :  { %v702_v51 = vadd.f32 %v701_v37, %v1488_v40  ;;  %v1036_v52 = vpop.f32.mrb[49].mxu0 }
 0x13d   :  { %v704_v53 = vpop.f32.mrb[50].mxu0 }
 0x13e   :  { %v828_v20 = vmax.f32 %v702_v51, 0.0  ;;  %v705_v54 = vadd.f32 %v704_v53, %v1486_v39  ;;  %v1037_v32 = vpop.f32.mrb[51].mxu0 }
 0x140   :  { %878 = vst [vmem:[%s1665_s3 + $0xc0] sm:$0xff] %v828_v20  ;;  %v829_v26 = vmax.f32 %v705_v54, 0.0 }
 0x142   :  { %879 = vst [vmem:[%s1665_s3 + $0xc8] sm:$0xff] %v829_v26 }

// kernel: _lambda_.12
= control target key start
LH: loop header
LB: loop body
LE: loop exit
PB: predicated region body
PF: predicated region fallthrough
CT: control target
= control target key end

     0   :  { %s833_s12 = smov 0   ;;  %s835_s13 = smov 0   ;;  %s1047_s0 = inlined_call_operand.vmem [shape: bf16[32,16], index: 0, kind: input, shape index: {}]   ;;  %s1048_s1 = inlined_call_operand.vmem [shape: bf16[16,1792], index: 1, kind: input, shape index: {}]   ;;  %s1049_s2 = inlined_call_operand.vmem [shape: f32[32,1], index: 2, kind: input, shape index: {}]   ;;  %s1050_s3 = inlined_call_operand.vmem [shape: f32[32,1792], index: 3, kind: output, shape index: {}]  }
   0x1   :  { %s837_s14 = smov 0  }
   0x2 LB: > { %s705_s15 = sadd.s32 4294967295, %s810_s14   ;;  %s850_s16 = sadd.s32 1, %s810_s14   ;;  %s810_s14 = sphi %s837_s14, %s1054_s14   ;;  %s806_s13 = sphi %s835_s13, %s1053_s13   ;;  %s802_s12 = sphi %s833_s12, %s1052_s12  }
   0x3   : > { %s38_s17 = ssub.s32 %s810_s14, %s850_s16  ;;  %s41_s18 = sadd.s32 1, %s806_s13 }
   0x4   : > { %p39_p0 = scmp.eq.s32.totalorder %s38_s17, 0  ;;  %p48_p1 = scmp.ne.s32.totalorder %s806_s13, %s802_s12 }
   0x5   : > { %p49_p2 = scmp.eq.s32.totalorder %s810_s14, 0  ;;  %p99_p3 = scmp.eq.s32.totalorder %s705_s15, 1 }
   0x6   : > { %s861_s19 = scalar_select %p39_p0, %s806_s13, %s41_s18  }
   0x7   : > { %p50_p4 = por %p49_p2, %p48_p1  ;;  %p863_p5 = por %p99_p3, %p48_p1 }
   0x8   : > { %p708_p6 = scmp.ge.s32.totalorder %s810_s14, 2 }
   0xa   : > { %127 = sbr.rel (%p708_p6) target bundleno = 26 (0x1a), region = 24 }
  0x11   : > { %130 = sbr.rel (!%p50_p4) target bundleno = 26 (0x1a), region = 28  ;;  %s132_s21 = sand.u32 (%p50_p4), 1, %s806_s13  }
  0x12   : > { %s735_s22 = smul.u32 (%p50_p4), 28, %s810_s14 }
  0x13   : > { %s746_s23 = smul.u32 (%p50_p4), 56, %s132_s21 }
  0x14   : > { %s137_s26 = scalar_lea.vmem (%p50_p4), %s1048_s1, %s735_s22 }
  0x15   : > { %v152_v0 = vld [vmem:[%s137_s26] sm:$0xff] (%p50_p4)  ;;  %v154_v1 = vld [vmem:[%s137_s26 + $0x8] sm:$0xff] (%p50_p4)  ;;  %v156_v2 = vld [vmem:[%s137_s26 + $0x10] sm:$0xff] (%p50_p4)  ;;  %s134_s27 = scalar_lea.vmem (%p50_p4), [#allocation2], %s746_s23 }
  0x16   : > { %153 = vst [vmem:[%s134_s27] sm:$0xff] (%p50_p4), %v152_v0  ;;  %155 = vst [vmem:[%s134_s27 + $0x8] sm:$0xff] (%p50_p4), %v154_v1  ;;  %v158_v3 = vld [vmem:[%s137_s26 + $0x38] sm:$0xff] (%p50_p4)  ;;  %v160_v4 = vld [vmem:[%s137_s26 + $0x40] sm:$0xff] (%p50_p4) }
  0x17   : > { %157 = vst [vmem:[%s134_s27 + $0x10] sm:$0xff] (%p50_p4), %v156_v2  ;;  %v162_v5 = vld [vmem:[%s137_s26 + $0x48] sm:$0xff] (%p50_p4)  ;;  %159 = vst [vmem:[%s134_s27 + $0x1c] sm:$0xff] (%p50_p4), %v158_v3  ;;  %v710_v6 = vld [vmem:[%s137_s26 + $0x18] sm:$0xf] (%p50_p4) }
  0x18   : > { %161 = vst [vmem:[%s134_s27 + $0x24] sm:$0xff] %v160_v4  ;;  %163 = vst [vmem:[%s134_s27 + $0x2c] sm:$0xff] %v162_v5  ;;  %v712_v7 = vld [vmem:[%s137_s26 + $0x50] sm:$0xf] }
  0x19   : > { %711 = vst [vmem:[%s134_s27 + $0x18] sm:$0xf] %v710_v6  ;;  %713 = vst [vmem:[%s134_s27 + $0x34] sm:$0xf] %v712_v7 }
  0x1a PF: > { %p714_p7 = scmp.ge.s32.totalorder %s810_s14, 1  ;;  %p179_p8 = scmp.lt.s32.totalorder %s810_s14, 3 }
  0x1c   : > { %p180_p9 = pnand %p714_p7, %p179_p8 }
  0x1d   : > { %s186_s28 = sand.u32 (!%p180_p9), 1, %s802_s12   ;;  %v812_v8 = vmov (!%p180_p9), 0   ;;  %v223_v9 = vld [vmem:[%s1049_s2] sm:$0xff] (!%p180_p9)  ;;  %v224_v10 = vld [vmem:[%s1049_s2 + $0x8] sm:$0xff] (!%p180_p9)  ;;  %v225_v11 = vld [vmem:[%s1049_s2 + $0x10] sm:$0xff] (!%p180_p9)  ;;  %vm293_vm0 = vcmask (!%p180_p9), 130048  }
  0x1e   : > { %183 = sbr.rel (%p180_p9) target bundleno = 291 (0x123), region = 54  ;;  %332 = vmatprep.mubr.bf16.mxu0 (!%p180_p9), %v812_v8  ;;  %385 = vmatprep.mubr.bf16.mxu1 (!%p180_p9), %v812_v8  ;;  %v226_v12 = vld [vmem:[%s1049_s2 + $0x18] sm:$0xff] (!%p180_p9)  ;;  %v779_v14 = vld [vmem:[%s1047_s0] sm:$0xff] (!%p180_p9)   ;;  %v786_v21 = vld [vmem:[%s1047_s0 + $0x8] sm:$0xff] (!%p180_p9)  }
  0x1f   : > { %s747_s29 = smul.u32 (!%p180_p9), 56, %s186_s28  ;;  %774 = vset.pattern.permute.xlu0 (!%p180_p9), %v812_v8  ;;  %775 = vset.pattern.permute.xlu1 (!%p180_p9), %v812_v8 }
  0x20   : > { %229 = vperm.xlu0 (!%p180_p9), %774, %v223_v9   ;;  %239 = vperm.xlu1 (!%p180_p9), %775, %v225_v11   ;;  %s748_s23 = smul.u32 (!%p180_p9), 224, %s186_s28 }
  0x21   : > { %s188_s11 = scalar_lea.vmem (!%p180_p9), [#allocation2], %s747_s29 }
  0x22   : > { %v776_v13 = vld [vmem:[%s188_s11 + $0x4] ss:$28 sps:$4 sm:$0xff] (!%p180_p9)   ;;  %v780_v16 = vld [vmem:[%s188_s11 + $0x10] ss:$28 sps:$4 sm:$0xff] (!%p180_p9)   ;;  %v787_v20 = vld [vmem:[%s188_s11 + $0x18] ss:$28 sps:$4 sm:$0xff] (!%p180_p9)  }
  0x23   : > { %v778_v15 = vld [vmem:[%s188_s11] ss:$28 sps:$4 sm:$0xff] (!%p180_p9)   ;;  %300 = vmatprep.subr.bf16.mxu0 (!%p180_p9), %v776_v13  ;;  %v782_v17 = vld [vmem:[%s188_s11 + $0x14] ss:$28 sps:$4 sm:$0xff] (!%p180_p9)   ;;  %v783_v18 = vld [vmem:[%s188_s11 + $0xc] ss:$28 sps:$4 sm:$0xff] (!%p180_p9)  }
  0x24   : > { %301 = vmatpush1.bf16.msra.mxu0 (!%p180_p9), %v778_v15  ;;  %v785_v19 = vld [vmem:[%s188_s11 + $0x8] ss:$28 sps:$4 sm:$0xff] (!%p180_p9)   ;;  %234 = vperm.xlu0 (!%p180_p9), %774, %v224_v10   ;;  %s917_s12 = scalar_lea.vmem (!%p180_p9), [#allocation3], %s748_s23 }
  0x25   : > { %406 = vmatprep.subr.bf16.mxu0 %v782_v17  ;;  %244 = vperm.xlu1 %775, %v226_v12   ;;  %s736_s24 = smul.u32 (%p863_p5), 56, %s705_s15 }
  0x26   : > { %353 = vmatprep.subr.bf16.mxu1 %v783_v18 }
  0x27   : > { %724 = vmatmul.mubr.msk.bf16.vlgmr.msra.gmra.mrb[0].mxu0 %vm293_vm0, %v779_v14  ;;  %354 = vmatpush1.bf16.msra.mxu1 %v785_v19  ;;  %s985_s25 = scalar_lea.vmem (%p863_p5), %s1050_s3, %s736_s24 }
  0x28   : > { %407 = vmatpush1.bf16.msra.mxu0 %v780_v16  ;;  %342 = vmatprep.mubr.bf16.mxu0 %v812_v8 }
  0x29   : > { %740 = vmatprep.subr.bf16.mxu1 %v787_v20 }
  0x2a   : > { %726 = vmatmul.mubr.msk.bf16.vlgmr.msra.gmra.mrb[0].mxu1 %vm293_vm0, %v779_v14 }
  0x2b   : > { %741 = vmatpush3.bf16.msra.mxu1 %v787_v20  ;;  %395 = vmatprep.mubr.bf16.mxu1 %v812_v8 }
  0x2f   : > { %725 = vmatmul.mubr.msk.bf16.gmra.mrb[4].mxu0 %vm293_vm0, %v786_v21 }
  0x30   : > { %438 = vmatprep.mubr.bf16.mxu0 %v812_v8 }
  0x32   : > { %727 = vmatmul.mubr.msk.bf16.gmra.mrb[4].mxu1 %vm293_vm0, %v786_v21 }
  0x33   : > { %742 = vmatprep.mubr.msk.bf16.mxu1 %vm293_vm0, %v779_v14 }
  0x37   : > { %728 = vmatmul.mubr.msk.bf16.vlgmr.msra.gmra.mrb[8].mxu0 %vm293_vm0, %v779_v14 }
  0x38   : > { %448 = vmatprep.mubr.bf16.mxu0 %v812_v8 }
  0x3a   : > { %743 = vmatmul.mubr.msk.bf16.vlgmr.msra.gmra.mrb[8].mxu1 %vm293_vm0, %v786_v21 }
  0x3f   : > { %729 = vmatmul.mubr.msk.bf16.gmra.mrb[12].mxu0 %vm293_vm0, %v786_v21 }
  0x9f   : > { %v904_v22 = vpop.permute.xlu0 %229  ;;  %v912_v29 = vpop.permute.xlu1 %239 }
  0xa3   : > { %v908_v24 = vpop.permute.xlu0 %234 }
  0xa4   : > { %v927_v49 = vpop.permute.xlu1 %244 }
  0xfa   : > { %v334_v23 = vpop.f32.mrb[0].mxu0 }
  0xfb   : > { %v335_v25 = vadd.f32 %v334_v23, %v904_v22  ;;  %v336_v26 = vpop.f32.mrb[1].mxu0 }
  0xfc   : > { %v337_v27 = vadd.f32 %v336_v26, %v904_v22  ;;  %v338_v28 = vpop.f32.mrb[2].mxu0 }
  0xfd   : > { %v508_v30 = vmax.f32 %v335_v25, 0.0  ;;  %v339_v31 = vadd.f32 %v338_v28, %v908_v24  ;;  %v340_v32 = vpop.f32.mrb[3].mxu0  ;;  %v387_v33 = vpop.f32.mrb[0].mxu1 }
  0xfe   : > { %v509_v34 = vmax.f32 %v337_v27, 0.0  ;;  %v341_v35 = vadd.f32 %v340_v32, %v908_v24  ;;  %v388_v36 = vadd.f32 %v387_v33, %v904_v22  ;;  %v389_v37 = vpop.f32.mrb[1].mxu1 }
  0xff   : > { %536 = vst [vmem:[%s917_s12] sm:$0xff] %v508_v30  ;;  %v515_v38 = vmax.f32 %v339_v31, 0.0  ;;  %v390_v39 = vadd.f32 %v389_v37, %v904_v22  ;;  %v391_v40 = vpop.f32.mrb[2].mxu1 }
 0x100   : > { %537 = vst [vmem:[%s917_s12 + $0x8] sm:$0xff] %v509_v34  ;;  %v516_v41 = vmax.f32 %v341_v35, 0.0  ;;  %v510_v42 = vmax.f32 %v388_v36, 0.0  ;;  %v392_v43 = vadd.f32 %v391_v40, %v908_v24  ;;  %v393_v44 = vpop.f32.mrb[3].mxu1 }
 0x101   : > { %543 = vst [vmem:[%s917_s12 + $0x38] sm:$0xff] %v515_v38  ;;  %v511_v45 = vmax.f32 %v390_v39, 0.0  ;;  %v394_v46 = vadd.f32 %v393_v44, %v908_v24 }
 0x102   : > { %544 = vst [vmem:[%s917_s12 + $0x40] sm:$0xff] %v516_v41  ;;  %538 = vst [vmem:[%s917_s12 + $0x10] sm:$0xff] %v510_v42  ;;  %v344_v47 = vpop.f32.mrb[4].mxu0  ;;  %v517_v48 = vmax.f32 %v392_v43, 0.0 }
 0x103   : > { %539 = vst [vmem:[%s917_s12 + $0x18] sm:$0xff] %v511_v45  ;;  %v345_v50 = vadd.f32 %v344_v47, %v912_v29  ;;  %v346_v51 = vpop.f32.mrb[5].mxu0  ;;  %v518_v52 = vmax.f32 %v394_v46, 0.0 }
 0x104   : > { %545 = vst [vmem:[%s917_s12 + $0x48] sm:$0xff] %v517_v48  ;;  %v347_v53 = vadd.f32 %v346_v51, %v912_v29  ;;  %v348_v54 = vpop.f32.mrb[6].mxu0 }
 0x105   : > { %v522_v55 = vmax.f32 %v345_v50, 0.0  ;;  %546 = vst [vmem:[%s917_s12 + $0x50] sm:$0xff] %v518_v52  ;;  %v349_v56 = vadd.f32 %v348_v54, %v927_v49  ;;  %v350_v57 = vpop.f32.mrb[7].mxu0  ;;  %v397_v58 = vpop.f32.mrb[4].mxu1 }
 0x106   : > { %v523_v59 = vmax.f32 %v347_v53, 0.0  ;;  %v351_v60 = vadd.f32 %v350_v57, %v927_v49  ;;  %v398_v61 = vadd.f32 %v397_v58, %v912_v29  ;;  %v399_v62 = vpop.f32.mrb[5].mxu1 }
 0x107   : > { %550 = vst [vmem:[%s917_s12 + $0x70] sm:$0xff] %v522_v55  ;;  %v529_v63 = vmax.f32 %v349_v56, 0.0  ;;  %v400_v0 = vadd.f32 %v399_v62, %v912_v29  ;;  %v401_v1 = vpop.f32.mrb[6].mxu1  ;;  %v588_v47 = vld [vmem:[%s917_s12 + $0x8] sm:$0xff] (%p863_p5) }
 0x108   : > { %551 = vst [vmem:[%s917_s12 + $0x78] sm:$0xff] %v523_v59  ;;  %v530_v2 = vmax.f32 %v351_v60, 0.0  ;;  %v524_v3 = vmax.f32 %v398_v61, 0.0  ;;  %v402_v4 = vadd.f32 %v401_v1, %v927_v49  ;;  %v403_v5 = vpop.f32.mrb[7].mxu1  ;;  %v600_v53 = vld [vmem:[%s917_s12 + $0x38] sm:$0xff] (%p863_p5)  ;;  %589 = vst [vmem:[%s985_s25 + $0x8] sm:$0xff] (%p863_p5), %v588_v47 }
 0x109   : > { %557 = vst [vmem:[%s917_s12 + $0xa8] sm:$0xff] %v529_v63  ;;  %v525_v6 = vmax.f32 %v400_v0, 0.0  ;;  %v404_v7 = vadd.f32 %v403_v5, %v927_v49  ;;  %v590_v48 = vld [vmem:[%s917_s12 + $0x10] sm:$0xff] (%p863_p5)  ;;  %v602_v54 = vld [vmem:[%s917_s12 + $0x40] sm:$0xff] (%p863_p5)  ;;  %601 = vst [vmem:[%s985_s25 + $0x70] sm:$0xff] (%p863_p5), %v600_v53 }
 0x10a   : > { %558 = vst [vmem:[%s917_s12 + $0xb0] sm:$0xff] %v530_v2  ;;  %552 = vst [vmem:[%s917_s12 + $0x80] sm:$0xff] %v524_v3  ;;  %v531_v8 = vmax.f32 %v402_v4, 0.0  ;;  %v440_v9 = vpop.f32.mrb[8].mxu0 }
 0x10b   : > { %553 = vst [vmem:[%s917_s12 + $0x88] sm:$0xff] %v525_v6  ;;  %v441_v10 = vadd.f32 %v440_v9, %v904_v22  ;;  %v532_v11 = vmax.f32 %v404_v7, 0.0  ;;  %v442_v12 = vpop.f32.mrb[9].mxu0  ;;  %591 = vst [vmem:[%s985_s25 + $0x10] sm:$0xff] (%p863_p5), %v590_v48  ;;  %v604_v55 = vld [vmem:[%s917_s12 + $0x48] sm:$0xff] (%p863_p5) }
 0x10c   : > { %559 = vst [vmem:[%s917_s12 + $0xb8] sm:$0xff] %v531_v8  ;;  %v443_v13 = vadd.f32 %v442_v12, %v904_v22  ;;  %v444_v14 = vpop.f32.mrb[10].mxu0  ;;  %603 = vst [vmem:[%s985_s25 + $0x78] sm:$0xff] (%p863_p5), %v602_v54  ;;  %v606_v56 = vld [vmem:[%s917_s12 + $0x50] sm:$0xff] (%p863_p5) }
 0x10d   : > { %v512_v15 = vmax.f32 %v441_v10, 0.0  ;;  %560 = vst [vmem:[%s917_s12 + $0xc0] sm:$0xff] %v532_v11  ;;  %v445_v16 = vadd.f32 %v444_v14, %v908_v24  ;;  %v446_v17 = vpop.f32.mrb[11].mxu0  ;;  %v744_v18 = vpop.f32.mrb[8].mxu1  ;;  %605 = vst [vmem:[%s985_s25 + $0x80] sm:$0xff] (%p863_p5), %v604_v55 }
 0x10e   : > { %v513_v19 = vmax.f32 %v443_v13, 0.0  ;;  %v447_v20 = vadd.f32 %v446_v17, %v908_v24  ;;  %v502_v21 = vadd.f32 %v744_v18, %v912_v29  ;;  %v493_v23 = vpop.f32.mrb[9].mxu1  ;;  %607 = vst [vmem:[%s985_s25 + $0x88] sm:$0xff] (%p863_p5), %v606_v56  ;;  %v614_v60 = vld [vmem:[%s917_s12 + $0x70] sm:$0xff] (%p863_p5) }
 0x10f   : > { %540 = vst [vmem:[%s917_s12 + $0x20] sm:$0xff] %v512_v15  ;;  %v519_v25 = vmax.f32 %v445_v16, 0.0  ;;  %v494_v26 = vadd.f32 %v493_v23, %v904_v22  ;;  %v745_v27 = vpop.f32.mrb[10].mxu1  ;;  %615 = vst [vmem:[%s985_s25 + $0xe0] sm:$0xff] (%p863_p5), %v614_v60  ;;  %v616_v61 = vld [vmem:[%s917_s12 + $0x78] sm:$0xff] (%p863_p5) }
 0x110   : > { %541 = vst [vmem:[%s917_s12 + $0x28] sm:$0xff] %v513_v19  ;;  %v520_v28 = vmax.f32 %v447_v20, 0.0  ;;  %v528_v30 = vmax.f32 %v502_v21, 0.0  ;;  %v505_v31 = vadd.f32 %v745_v27, %v927_v49  ;;  %v496_v32 = vpop.f32.mrb[11].mxu1  ;;  %617 = vst [vmem:[%s985_s25 + $0xe8] sm:$0xff] (%p863_p5), %v616_v61  ;;  %v628_v3 = vld [vmem:[%s917_s12 + $0xa8] sm:$0xff] (%p863_p5) }
 0x111   : > { %547 = vst [vmem:[%s917_s12 + $0x58] sm:$0xff] %v519_v25  ;;  %v514_v33 = vmax.f32 %v494_v26, 0.0  ;;  %v497_v34 = vadd.f32 %v496_v32, %v908_v24  ;;  %v618_v62 = vld [vmem:[%s917_s12 + $0x80] sm:$0xff] (%p863_p5)  ;;  %v630_v4 = vld [vmem:[%s917_s12 + $0xb0] sm:$0xff] (%p863_p5)  ;;  %629 = vst [vmem:[%s985_s25 + $0x150] sm:$0xff] (%p863_p5), %v628_v3 }
 0x112   : > { %548 = vst [vmem:[%s917_s12 + $0x60] sm:$0xff] %v520_v28  ;;  %556 = vst [vmem:[%s917_s12 + $0xa0] sm:$0xff] %v528_v30  ;;  %v535_v35 = vmax.f32 %v505_v31, 0.0  ;;  %v450_v36 = vpop.f32.mrb[12].mxu0  ;;  %v620_v63 = vld [vmem:[%s917_s12 + $0x88] sm:$0xff] (%p863_p5) }
 0x113   : > { %542 = vst [vmem:[%s917_s12 + $0x30] sm:$0xff] %v514_v33  ;;  %v451_v22 = vadd.f32 %v450_v36, %v912_v29  ;;  %v521_v37 = vmax.f32 %v497_v34, 0.0  ;;  %v452_v38 = vpop.f32.mrb[13].mxu0  ;;  %619 = vst [vmem:[%s985_s25 + $0xf0] sm:$0xff] (%p863_p5), %v618_v62  ;;  %v632_v5 = vld [vmem:[%s917_s12 + $0xb8] sm:$0xff] (%p863_p5) }
 0x114   : > { %563 = vst [vmem:[%s917_s12 + $0xd8] sm:$0xff] %v535_v35  ;;  %v453_v39 = vadd.f32 %v452_v38, %v912_v29  ;;  %v454_v40 = vpop.f32.mrb[14].mxu0  ;;  %570 = sbr.rel (!%p863_p5) target bundleno = 291 (0x123), region = 62  ;;  %v586_v29 = vld [vmem:[%s917_s12] sm:$0xff] (%p863_p5)  ;;  %621 = vst [vmem:[%s985_s25 + $0xf8] sm:$0xff] (%p863_p5), %v620_v63 }
 0x115   : > { %v526_v41 = vmax.f32 %v451_v22, 0.0  ;;  %549 = vst [vmem:[%s917_s12 + $0x68] sm:$0xff] %v521_v37  ;;  %v455_v24 = vadd.f32 %v454_v40, %v927_v49  ;;  %v456_v42 = vpop.f32.mrb[15].mxu0  ;;  %587 = vst [vmem:[%s985_s25] sm:$0xff] (%p863_p5), %v586_v29  ;;  %v634_v6 = vld [vmem:[%s917_s12 + $0xc0] sm:$0xff] (%p863_p5) }
 0x116   : > { %v527_v43 = vmax.f32 %v453_v39, 0.0  ;;  %v457_v44 = vadd.f32 %v456_v42, %v927_v49  ;;  %v592_v49 = vld [vmem:[%s917_s12 + $0x18] sm:$0xff] (%p863_p5)  ;;  %v594_v50 = vld [vmem:[%s917_s12 + $0x20] sm:$0xff] (%p863_p5)  ;;  %631 = vst [vmem:[%s985_s25 + $0x158] sm:$0xff] (%p863_p5), %v630_v4  ;;  %633 = vst [vmem:[%s985_s25 + $0x160] sm:$0xff] (%p863_p5), %v632_v5 }
 0x117   : > { %554 = vst [vmem:[%s917_s12 + $0x90] sm:$0xff] %v526_v41  ;;  %v533_v45 = vmax.f32 %v455_v24, 0.0  ;;  %v596_v51 = vld [vmem:[%s917_s12 + $0x28] sm:$0xff] (%p863_p5)  ;;  %593 = vst [vmem:[%s985_s25 + $0x18] sm:$0xff] (%p863_p5), %v592_v49 }
 0x118   : > { %555 = vst [vmem:[%s917_s12 + $0x98] sm:$0xff] %v527_v43  ;;  %v534_v46 = vmax.f32 %v457_v44, 0.0  ;;  %595 = vst [vmem:[%s985_s25 + $0x20] sm:$0xff] (%p863_p5), %v594_v50  ;;  %v608_v57 = vld [vmem:[%s917_s12 + $0x58] sm:$0xff] (%p863_p5) }
 0x119   : > { %561 = vst [vmem:[%s917_s12 + $0xc8] sm:$0xff] %v533_v45  ;;  %597 = vst [vmem:[%s985_s25 + $0x28] sm:$0xff] (%p863_p5), %v596_v51  ;;  %v610_v58 = vld [vmem:[%s917_s12 + $0x60] sm:$0xff] (%p863_p5) }
 0x11a   : > { %562 = vst [vmem:[%s917_s12 + $0xd0] sm:$0xff] %v534_v46  ;;  %v598_v52 = vld [vmem:[%s917_s12 + $0x30] sm:$0xff] (%p863_p5)  ;;  %609 = vst [vmem:[%s985_s25 + $0x90] sm:$0xff] (%p863_p5), %v608_v57  ;;  %v626_v2 = vld [vmem:[%s917_s12 + $0xa0] sm:$0xff] (%p863_p5) }
 0x11b   : > { %599 = vst [vmem:[%s985_s25 + $0x30] sm:$0xff] %v598_v52  ;;  %611 = vst [vmem:[%s985_s25 + $0x98] sm:$0xff] %v610_v58  ;;  %v640_v9 = vld [vmem:[%s917_s12 + $0xd8] sm:$0xff] }
 0x11c   : > { %v612_v59 = vld [vmem:[%s917_s12 + $0x68] sm:$0xff]  ;;  %627 = vst [vmem:[%s985_s25 + $0x110] sm:$0xff] %v626_v2  ;;  %635 = vst [vmem:[%s985_s25 + $0x168] sm:$0xff] %v634_v6 }
 0x11d   : > { %613 = vst [vmem:[%s985_s25 + $0xa0] sm:$0xff] %v612_v59  ;;  %641 = vst [vmem:[%s985_s25 + $0x180] sm:$0xff] %v640_v9 }
 0x11e   : > { %v622_v0 = vld [vmem:[%s917_s12 + $0x90] sm:$0xff] }
 0x11f   : > { %v624_v1 = vld [vmem:[%s917_s12 + $0x98] sm:$0xff]  ;;  %623 = vst [vmem:[%s985_s25 + $0x100] sm:$0xff] %v622_v0 }
 0x120   : > { %625 = vst [vmem:[%s985_s25 + $0x108] sm:$0xff] %v624_v1  ;;  %v636_v7 = vld [vmem:[%s917_s12 + $0xc8] sm:$0xff] }
 0x121   : > { %v638_v8 = vld [vmem:[%s917_s12 + $0xd0] sm:$0xff]  ;;  %637 = vst [vmem:[%s985_s25 + $0x170] sm:$0xff] %v636_v7 }
 0x122   : > { %639 = vst [vmem:[%s985_s25 + $0x178] sm:$0xff] %v638_v8 }
 0x123 PF: > { %p10_p10 = scmp.ge.s32.totalorder %s850_s16, 4   ;;  %s1052_s12 = smov %s806_s13 }
 0x124   : > { %s1053_s13 = smov %s861_s19  ;;  %s1054_s14 = smov %s850_s16 }
 0x125   :  { %12 = sbr.rel (!%p10_p10) target bundleno = 2 (0x2), region = 122 }

// kernel: _lambda_.13
= control target key start
LH: loop header
LB: loop body
LE: loop exit
PB: predicated region body
PF: predicated region fallthrough
CT: control target
= control target key end

     0   :  { %s1680_s12 = smov 0   ;;  %s1682_s13 = smov 0   ;;  %s2255_s0 = inlined_call_operand.vmem [shape: bf16[48,32], index: 0, kind: input, shape index: {}]   ;;  %s2256_s1 = inlined_call_operand.vmem [shape: bf16[32,6656], index: 1, kind: input, shape index: {}]   ;;  %s2257_s2 = inlined_call_operand.vmem [shape: f32[48,1], index: 2, kind: input, shape index: {}]   ;;  %s2258_s3 = inlined_call_operand.vmem [shape: f32[48,6656], index: 3, kind: output, shape index: {}]  }
   0x1   :  { %s1684_s14 = smov 0  }
   0x2 LB: > { %s1310_s15 = sadd.s32 4294967295, %s1655_s14   ;;  %s1697_s16 = sadd.s32 1, %s1655_s14   ;;  %s1655_s14 = sphi %s1684_s14, %s2262_s14   ;;  %s1651_s13 = sphi %s1682_s13, %s2261_s13   ;;  %s1647_s12 = sphi %s1680_s12, %s2260_s12  }
   0x3   : > { %s38_s17 = ssub.s32 %s1655_s14, %s1697_s16  ;;  %s41_s18 = sadd.s32 1, %s1651_s13 }
   0x4   : > { %p39_p0 = scmp.eq.s32.totalorder %s38_s17, 0  ;;  %p48_p1 = scmp.ne.s32.totalorder %s1651_s13, %s1647_s12 }
   0x5   : > { %p49_p2 = scmp.eq.s32.totalorder %s1655_s14, 0  ;;  %p99_p3 = scmp.eq.s32.totalorder %s1310_s15, 3 }
   0x6   : > { %s1708_s19 = scalar_select %p39_p0, %s1651_s13, %s41_s18  }
   0x7   : > { %p50_p4 = por %p49_p2, %p48_p1  ;;  %p1710_p5 = por %p99_p3, %p48_p1 }
   0x8   : > { %p1313_p6 = scmp.ge.s32.totalorder %s1655_s14, 4 }
   0xa   : > { %127 = sbr.rel (%p1313_p6) target bundleno = 36 (0x24), region = 24 }
  0x11   : > { %130 = sbr.rel (!%p50_p4) target bundleno = 36 (0x24), region = 28  ;;  %s132_s21 = sand.u32 (%p50_p4), 1, %s1651_s13  }
  0x12   : > { %s1377_s22 = smul.u32 (%p50_p4), 52, %s1655_s14 }
  0x13   : > { %s1404_s23 = smul.u32 (%p50_p4), 208, %s132_s21 }
  0x14   : > { %s1720_s26 = scalar_lea.vmem (%p50_p4), %s2256_s1, %s1377_s22 }
  0x15   : > { %v152_v0 = vld [vmem:[%s1720_s26] sm:$0xff] (%p50_p4)  ;;  %v154_v1 = vld [vmem:[%s1720_s26 + $0x8] sm:$0xff] (%p50_p4)  ;;  %v156_v2 = vld [vmem:[%s1720_s26 + $0x10] sm:$0xff] (%p50_p4)  ;;  %s1725_s27 = scalar_lea.vmem (%p50_p4), [#allocation2], %s1404_s23 }
  0x16   : > { %153 = vst [vmem:[%s1725_s27] sm:$0xff] (%p50_p4), %v152_v0  ;;  %155 = vst [vmem:[%s1725_s27 + $0x8] sm:$0xff] (%p50_p4), %v154_v1  ;;  %v158_v3 = vld [vmem:[%s1720_s26 + $0x18] sm:$0xff] (%p50_p4)  ;;  %v160_v4 = vld [vmem:[%s1720_s26 + $0x20] sm:$0xff] (%p50_p4) }
  0x17   : > { %157 = vst [vmem:[%s1725_s27 + $0x10] sm:$0xff] (%p50_p4), %v156_v2  ;;  %v162_v5 = vld [vmem:[%s1720_s26 + $0x28] sm:$0xff] (%p50_p4)  ;;  %159 = vst [vmem:[%s1725_s27 + $0x18] sm:$0xff] (%p50_p4), %v158_v3  ;;  %v164_v6 = vld [vmem:[%s1720_s26 + $0xd0] sm:$0xff] (%p50_p4) }
  0x18   : > { %161 = vst [vmem:[%s1725_s27 + $0x20] sm:$0xff] %v160_v4  ;;  %163 = vst [vmem:[%s1725_s27 + $0x28] sm:$0xff] %v162_v5  ;;  %v166_v7 = vld [vmem:[%s1720_s26 + $0xd8] sm:$0xff]  ;;  %v168_v8 = vld [vmem:[%s1720_s26 + $0xe0] sm:$0xff] }
  0x19   : > { %165 = vst [vmem:[%s1725_s27 + $0x34] sm:$0xff] %v164_v6  ;;  %167 = vst [vmem:[%s1725_s27 + $0x3c] sm:$0xff] %v166_v7  ;;  %v170_v9 = vld [vmem:[%s1720_s26 + $0xe8] sm:$0xff]  ;;  %v172_v10 = vld [vmem:[%s1720_s26 + $0xf0] sm:$0xff] }
  0x1a   : > { %169 = vst [vmem:[%s1725_s27 + $0x44] sm:$0xff] %v168_v8  ;;  %v174_v11 = vld [vmem:[%s1720_s26 + $0xf8] sm:$0xff]  ;;  %171 = vst [vmem:[%s1725_s27 + $0x4c] sm:$0xff] %v170_v9  ;;  %v176_v12 = vld [vmem:[%s1720_s26 + $0x1a0] sm:$0xff] }
  0x1b   : > { %173 = vst [vmem:[%s1725_s27 + $0x54] sm:$0xff] %v172_v10  ;;  %175 = vst [vmem:[%s1725_s27 + $0x5c] sm:$0xff] %v174_v11  ;;  %v178_v13 = vld [vmem:[%s1720_s26 + $0x1a8] sm:$0xff]  ;;  %v180_v14 = vld [vmem:[%s1720_s26 + $0x1b0] sm:$0xff] }
  0x1c   : > { %177 = vst [vmem:[%s1725_s27 + $0x68] sm:$0xff] %v176_v12  ;;  %179 = vst [vmem:[%s1725_s27 + $0x70] sm:$0xff] %v178_v13  ;;  %v182_v15 = vld [vmem:[%s1720_s26 + $0x1b8] sm:$0xff]  ;;  %v184_v16 = vld [vmem:[%s1720_s26 + $0x1c0] sm:$0xff] }
  0x1d   : > { %181 = vst [vmem:[%s1725_s27 + $0x78] sm:$0xff] %v180_v14  ;;  %v186_v17 = vld [vmem:[%s1720_s26 + $0x1c8] sm:$0xff]  ;;  %183 = vst [vmem:[%s1725_s27 + $0x80] sm:$0xff] %v182_v15  ;;  %v188_v18 = vld [vmem:[%s1720_s26 + $0x270] sm:$0xff] }
  0x1e   : > { %185 = vst [vmem:[%s1725_s27 + $0x88] sm:$0xff] %v184_v16  ;;  %187 = vst [vmem:[%s1725_s27 + $0x90] sm:$0xff] %v186_v17  ;;  %v190_v19 = vld [vmem:[%s1720_s26 + $0x278] sm:$0xff]  ;;  %v192_v20 = vld [vmem:[%s1720_s26 + $0x280] sm:$0xff] }
  0x1f   : > { %189 = vst [vmem:[%s1725_s27 + $0x9c] sm:$0xff] %v188_v18  ;;  %191 = vst [vmem:[%s1725_s27 + $0xa4] sm:$0xff] %v190_v19  ;;  %v194_v21 = vld [vmem:[%s1720_s26 + $0x288] sm:$0xff]  ;;  %v196_v22 = vld [vmem:[%s1720_s26 + $0x290] sm:$0xff] }
  0x20   : > { %193 = vst [vmem:[%s1725_s27 + $0xac] sm:$0xff] %v192_v20  ;;  %v198_v23 = vld [vmem:[%s1720_s26 + $0x298] sm:$0xff]  ;;  %195 = vst [vmem:[%s1725_s27 + $0xb4] sm:$0xff] %v194_v21  ;;  %v1315_v24 = vld [vmem:[%s1720_s26 + $0x30] sm:$0xf] }
  0x21   : > { %197 = vst [vmem:[%s1725_s27 + $0xbc] sm:$0xff] %v196_v22  ;;  %199 = vst [vmem:[%s1725_s27 + $0xc4] sm:$0xff] %v198_v23  ;;  %v1317_v25 = vld [vmem:[%s1720_s26 + $0x100] sm:$0xf]  ;;  %v1319_v26 = vld [vmem:[%s1720_s26 + $0x1d0] sm:$0xf] }
  0x22   : > { %1316 = vst [vmem:[%s1725_s27 + $0x30] sm:$0xf] %v1315_v24  ;;  %1318 = vst [vmem:[%s1725_s27 + $0x64] sm:$0xf] %v1317_v25  ;;  %v1321_v27 = vld [vmem:[%s1720_s26 + $0x2a0] sm:$0xf] }
  0x23   : > { %1320 = vst [vmem:[%s1725_s27 + $0x98] sm:$0xf] %v1319_v26  ;;  %1322 = vst [vmem:[%s1725_s27 + $0xcc] sm:$0xf] %v1321_v27 }
  0x24 PF: > { %p1323_p7 = scmp.ge.s32.totalorder %s1655_s14, 1  ;;  %p219_p8 = scmp.lt.s32.totalorder %s1655_s14, 5 }
  0x26   : > { %p220_p9 = pnand %p1323_p7, %p219_p8 }
  0x27   : > { %s226_s28 = sand.u32 (!%p220_p9), 1, %s1647_s12   ;;  %v1657_v28 = vmov (!%p220_p9), 0   ;;  %v287_v29 = vld [vmem:[%s2257_s2 + $0x10] sm:$0xff] (!%p220_p9)  ;;  %v1803_v36 = vld [vmem:[%s2255_s0 + $0x8] sm:$0xff] (!%p220_p9)   ;;  %v1808_v37 = vld [vmem:[%s2255_s0] sm:$0xff] (!%p220_p9)   ;;  %vm468_vm0 = vcmask (!%p220_p9), 261120  }
  0x28   : > { %223 = sbr.rel (%p220_p9) target bundleno = 384 (0x180), region = 54  ;;  %520 = vmatprep.mubr.bf16.mxu1 (!%p220_p9), %v1657_v28  ;;  %510 = vmatprep.mubr.bf16.mxu0 (!%p220_p9), %v1657_v28  ;;  %v1827_v46 = vld [vmem:[%s2255_s0 + $0x10] sm:$0xff] (!%p220_p9)   ;;  %v285_v49 = vld [vmem:[%s2257_s2] sm:$0xff] (!%p220_p9)  ;;  %v288_v50 = vld [vmem:[%s2257_s2 + $0x18] sm:$0xff] (!%p220_p9)  ;;  %v1658_v56 = vmov (!%p220_p9), 0.0   ;;  %vm1659_vm1 = vmmov (!%p220_p9), 0  }
  0x29   : > { %s1405_s29 = smul.u32 (!%p220_p9), 208, %s226_s28  ;;  %1435 = vset.pattern.permute.xlu1 (!%p220_p9), %v1657_v28  ;;  %1434 = vset.pattern.permute.xlu0 (!%p220_p9), %v1657_v28  ;;  %v286_v52 = vld [vmem:[%s2257_s2 + $0x8] sm:$0xff] (!%p220_p9)  ;;  %v289_v57 = vld [vmem:[%s2257_s2 + $0x20] sm:$0xff] (!%p220_p9) }
  0x2a   : > { %303 = vperm.xlu1 (!%p220_p9), %1435, %v287_v29   ;;  %293 = vperm.xlu0 (!%p220_p9), %1434, %v285_v49   ;;  %v290_v53 = vld [vmem:[%s2257_s2 + $0x28] sm:$0xff] (!%p220_p9)  ;;  %s1406_s30 = smul.u32 (!%p220_p9), 624, %s226_s28 }
  0x2b   : > { %s1792_s5 = scalar_lea.vmem (!%p220_p9), [#allocation2], %s1405_s29 }
  0x2c   : > { %v1436_v30 = vld [vmem:[%s1792_s5 + $0x4] ss:$52 sps:$4 sm:$0xff] (!%p220_p9)   ;;  %v1438_v31 = vld [vmem:[%s1792_s5] ss:$52 sps:$4 sm:$0xff] (!%p220_p9)   ;;  %v1441_v33 = vld [vmem:[%s1792_s5 + $0x68] ss:$52 sps:$4 sm:$0xff] (!%p220_p9)  }
  0x2d   : > { %1400 = vmatprep.subr.bf16.mxu1 (!%p220_p9), %v1436_v30  ;;  %478 = vmatprep.subr.bf16.mxu0 (!%p220_p9), %v1436_v30  ;;  %v1439_v32 = vld [vmem:[%s1792_s5 + $0x6c] ss:$52 sps:$4 sm:$0xff] (!%p220_p9)   ;;  %v1449_v35 = vld [vmem:[%s1792_s5 + $0x14] ss:$52 sps:$4 sm:$0xff] (!%p220_p9)   ;;  %v1447_v39 = vld [vmem:[%s1792_s5 + $0x10] ss:$52 sps:$4 sm:$0xff] (!%p220_p9)  }
  0x2e   : > { %1402 = vmatpush1.bf16.msra.mxu1 (!%p220_p9), %v1438_v31  ;;  %479 = vmatpush1.bf16.msra.mxu0 (!%p220_p9), %v1438_v31  ;;  %v1445_v34 = vld [vmem:[%s1792_s5 + $0xc] ss:$52 sps:$4 sm:$0xff] (!%p220_p9)   ;;  %v1443_v38 = vld [vmem:[%s1792_s5 + $0x8] ss:$52 sps:$4 sm:$0xff] (!%p220_p9)   ;;  %v1454_v43 = vld [vmem:[%s1792_s5 + $0x70] ss:$52 sps:$4 sm:$0xff] (!%p220_p9)  }
  0x2f   : > { %1401 = vmatprep.subr.bf16.mxu1 %v1439_v32  ;;  %480 = vmatprep.subr.bf16.mxu0 %v1439_v32  ;;  %v1452_v40 = vld [vmem:[%s1792_s5 + $0x7c] ss:$52 sps:$4 sm:$0xff]   ;;  %v1456_v41 = vld [vmem:[%s1792_s5 + $0x74] ss:$52 sps:$4 sm:$0xff]   ;;  %v1450_v42 = vld [vmem:[%s1792_s5 + $0x78] ss:$52 sps:$4 sm:$0xff]  }
  0x30   : > { %v1459_v44 = vld [vmem:[%s1792_s5 + $0x1c] ss:$52 sps:$4 sm:$0xff]   ;;  %v1462_v45 = vld [vmem:[%s1792_s5 + $0x24] ss:$52 sps:$4 sm:$0xff]   ;;  %v1460_v47 = vld [vmem:[%s1792_s5 + $0x20] ss:$52 sps:$4 sm:$0xff]   ;;  %308 = vperm.xlu1 %1435, %v288_v50   ;;  %298 = vperm.xlu0 %1434, %v286_v52  }
  0x31   : > { %v1468_v48 = vld [vmem:[%s1792_s5 + $0x8c] ss:$52 sps:$4 sm:$0xff]   ;;  %v1466_v51 = vld [vmem:[%s1792_s5 + $0x88] ss:$52 sps:$4 sm:$0xff]   ;;  %v1465_v55 = vld [vmem:[%s1792_s5 + $0x84] ss:$52 sps:$4 sm:$0xff]  }
  0x32   : > { %1403 = vmatpush1.bf16.msra.mxu1 %v1441_v33  ;;  %481 = vmatpush1.bf16.msra.mxu0 %v1441_v33  ;;  %v1457_v54 = vld [vmem:[%s1792_s5 + $0x18] ss:$52 sps:$4 sm:$0xff]   ;;  %v1463_v58 = vld [vmem:[%s1792_s5 + $0x80] ss:$52 sps:$4 sm:$0xff]   ;;  %v1472_v60 = vld [vmem:[%s1792_s5 + $0x30] ss:$52 sps:$4 sm:$0xff]  }
  0x33   : > { %541 = vmatprep.subr.bf16.mxu1 %v1445_v34  ;;  %604 = vmatprep.subr.bf16.mxu0 %v1449_v35  ;;  %v1471_v59 = vld [vmem:[%s1792_s5 + $0x2c] ss:$52 sps:$4 sm:$0xff]   ;;  %v1469_v62 = vld [vmem:[%s1792_s5 + $0x28] ss:$52 sps:$4 sm:$0xff]   ;;  %v1473_v0 = vld [vmem:[%s1792_s5 + $0x90] ss:$52 sps:$4 sm:$0xff]  }
  0x34   : > { %318 = vperm.xlu1 %1435, %v290_v53   ;;  %313 = vperm.xlu0 %1434, %v289_v57   ;;  %v1476_v61 = vld [vmem:[%s1792_s5 + $0x98] ss:$52 sps:$4 sm:$0xff]   ;;  %v1475_v63 = vld [vmem:[%s1792_s5 + $0x94] ss:$52 sps:$4 sm:$0xff]   ;;  %s1937_s12 = scalar_lea.vmem [#allocation3], %s1406_s30  ;;  %s1378_s28 = smul.u32 (%p1710_p5), 104, %s1310_s15 }
  0x35   : > { %1354 = vmatmul.mubr.msk.bf16.vlgmr.msra.gmra.mrb[0].mxu1 %vm468_vm0, %v1803_v36  ;;  %1353 = vmatmul.mubr.msk.bf16.vlgmr.msra.gmra.mrb[0].mxu0 %vm468_vm0, %v1808_v37 }
  0x36   : > { %542 = vmatpush1.bf16.msra.mxu1 %v1443_v38  ;;  %605 = vmatpush1.bf16.msra.mxu0 %v1447_v39  ;;  %s2093_s4 = scalar_lea.vmem (%p1710_p5), %s2258_s3, %s1378_s28 }
  0x37   : > { %606 = vmatprep.subr.bf16.mxu0 %v1452_v40  ;;  %530 = vmatprep.mubr.bf16.mxu1 %v1657_v28 }
  0x38   : > { %543 = vmatprep.subr.bf16.mxu1 %v1456_v41  ;;  %636 = vmatprep.mubr.bf16.mxu0 %v1657_v28 }
  0x3a   : > { %607 = vmatpush1.bf16.msra.mxu0 %v1450_v42  ;;  %544 = vmatpush1.bf16.msra.mxu1 %v1454_v43 }
  0x3b   : > { %667 = vmatprep.subr.bf16.mxu1 %v1459_v44  ;;  %730 = vmatprep.subr.bf16.mxu0 %v1462_v45 }
  0x3d   : > { %1355 = vmatmul.mubr.msk.bf16.gmra.mrb[4].mxu1 %vm468_vm0, %v1827_v46  ;;  %1359 = vmatmul.mubr.msk.bf16.vlgmr.msra.gmra.mrb[4].mxu0 %vm468_vm0, %v1808_v37 }
  0x3e   : > { %573 = vmatprep.mubr.bf16.mxu1 %v1657_v28  ;;  %646 = vmatprep.mubr.bf16.mxu0 %v1657_v28 }
  0x3f   : > { %731 = vmatpush1.bf16.msra.mxu0 %v1460_v47 }
  0x40   : > { %732 = vmatprep.subr.bf16.mxu0 %v1468_v48 }
  0x43   : > { %733 = vmatpush1.bf16.msra.mxu0 %v1466_v51 }
  0x44   : > { %1384 = vmatprep.subr.bf16.mxu0 %v1658_v56 }
  0x45   : > { %1356 = vmatmul.mubr.msk.bf16.vlgmr.msra.gmra.mrb[8].mxu1 %vm468_vm0, %v1808_v37  ;;  %1360 = vmatmul.mubr.msk.bf16.gmra.mrb[8].mxu0 %vm468_vm0, %v1803_v36 }
  0x46   : > { %668 = vmatpush1.bf16.msra.mxu1 %v1457_v54  ;;  %583 = vmatprep.mubr.bf16.mxu1 %v1657_v28 }
  0x47   : > { %656 = vmatprep.mubr.bf16.mxu0 %v1657_v28  ;;  %669 = vmatprep.subr.bf16.mxu1 %v1465_v55 }
  0x4a   : > { %670 = vmatpush1.bf16.msra.mxu1 %v1463_v58 }
  0x4b   : > { %793 = vmatprep.subr.bf16.mxu1 %v1471_v59 }
  0x4d   : > { %1357 = vmatmul.mubr.msk.bf16.gmra.mrb[12].mxu1 %vm468_vm0, %v1803_v36  ;;  %1361 = vmatmul.mubr.msk.bf16.gmra.mrb[12].mxu0 %vm468_vm0, %v1827_v46 }
  0x4e   : > { %593 = vmatprep.mubr.bf16.mxu1 %v1657_v28  ;;  %762 = vmatprep.mubr.bf16.mxu0 %v1657_v28 }
  0x55   : > { %1358 = vmatmul.mubr.msk.bf16.gmra.mrb[16].mxu1 %vm468_vm0, %v1827_v46  ;;  %1365 = vmatmul.mubr.msk.bf16.vlgmr.msra.gmra.mrb[16].mxu0 %vm468_vm0, %v1808_v37 }
  0x56   : > { %699 = vmatprep.mubr.bf16.mxu1 %v1657_v28  ;;  %772 = vmatprep.mubr.bf16.mxu0 %v1657_v28 }
  0x57   : > { %1385 = vmatpush3.bf16.msra.mxu0 %v1472_v60 }
  0x58   : > { %1386 = vmatprep.subr.bf16.mxu0 %v1658_v56 }
  0x5b   : > { %1387 = vmatpush3.bf16.msra.mxu0 %v1476_v61 }
  0x5d   : > { %1362 = vmatmul.mubr.msk.bf16.vlgmr.msra.gmra.mrb[20].mxu1 %vm468_vm0, %v1808_v37  ;;  %1366 = vmatmul.mubr.msk.bf16.gmra.mrb[20].mxu0 %vm468_vm0, %v1803_v36 }
  0x5e   : > { %794 = vmatpush1.bf16.msra.mxu1 %v1469_v62  ;;  %709 = vmatprep.mubr.bf16.mxu1 %v1657_v28 }
  0x5f   : > { %782 = vmatprep.mubr.bf16.mxu0 %v1657_v28  ;;  %795 = vmatprep.subr.bf16.mxu1 %v1475_v63 }
  0x62   : > { %796 = vmatpush1.bf16.msra.mxu1 %v1473_v0 }
  0x65   : > { %1363 = vmatmul.mubr.msk.bf16.gmra.mrb[24].mxu1 %vm468_vm0, %v1803_v36  ;;  %1367 = vmatmul.mubr.msk.bf16.gmra.mrb[24].mxu0 %vm468_vm0, %v1827_v46 }
  0x66   : > { %719 = vmatprep.mubr.bf16.mxu1 %v1657_v28  ;;  %1388 = vmatprep.mubr.msk.bf16.mxu0 %vm1659_vm1, %v1658_v56 }
  0x6d   : > { %1364 = vmatmul.mubr.msk.bf16.gmra.mrb[28].mxu1 %vm468_vm0, %v1827_v46  ;;  %1389 = vmatmul.mubr.msk.bf16.vlgmr.msra.gmra.mrb[28].mxu0 %vm468_vm0, %v1808_v37 }
  0x6e   : > { %825 = vmatprep.mubr.bf16.mxu1 %v1657_v28  ;;  %1392 = vmatprep.mubr.msk.bf16.mxu0 %vm1659_vm1, %v1658_v56 }
  0x75   : > { %1368 = vmatmul.mubr.msk.bf16.vlgmr.msra.gmra.mrb[32].mxu1 %vm468_vm0, %v1808_v37  ;;  %1393 = vmatmul.mubr.msk.bf16.gmra.mrb[32].mxu0 %vm468_vm0, %v1803_v36 }
  0x76   : > { %835 = vmatprep.mubr.bf16.mxu1 %v1657_v28  ;;  %1396 = vmatprep.mubr.msk.bf16.mxu0 %vm1659_vm1, %v1658_v56 }
  0x7d   : > { %1369 = vmatmul.mubr.msk.bf16.gmra.mrb[36].mxu1 %vm468_vm0, %v1803_v36  ;;  %1397 = vmatmul.mubr.msk.bf16.gmra.mrb[36].mxu0 %vm468_vm0, %v1827_v46 }
  0x7e   : > { %845 = vmatprep.mubr.bf16.mxu1 %v1657_v28 }
  0x85   : > { %1370 = vmatmul.mubr.msk.bf16.gmra.mrb[40].mxu1 %vm468_vm0, %v1827_v46 }
  0xa9   : > { %v1908_v1 = vpop.permute.xlu1 %303  ;;  %v1910_v2 = vpop.permute.xlu0 %293 }
  0xaf   : > { %v1912_v3 = vpop.permute.xlu1 %308  ;;  %v1914_v4 = vpop.permute.xlu0 %298 }
  0xb3   : > { %v1923_v20 = vpop.permute.xlu0 %313  ;;  %v1928_v22 = vpop.permute.xlu1 %318 }
 0x108   : > { %v522_v5 = vpop.f32.mrb[0].mxu1  ;;  %v512_v6 = vpop.f32.mrb[0].mxu0 }
 0x109   : > { %v523_v7 = vadd.f32 %v522_v5, %v1908_v1  ;;  %v524_v8 = vpop.f32.mrb[1].mxu1  ;;  %v514_v9 = vpop.f32.mrb[1].mxu0  ;;  %v513_v15 = vadd.f32 %v512_v6, %v1910_v2 }
 0x10a   : > { %v525_v10 = vadd.f32 %v524_v8, %v1908_v1  ;;  %v526_v11 = vpop.f32.mrb[2].mxu1  ;;  %v516_v12 = vpop.f32.mrb[2].mxu0  ;;  %v515_v18 = vadd.f32 %v514_v9, %v1910_v2 }
 0x10b   : > { %1477 = vtanh.f32 %v523_v7  ;;  %v527_v13 = vadd.f32 %v526_v11, %v1912_v3  ;;  %v528_v14 = vpop.f32.mrb[3].mxu1  ;;  %v518_v16 = vpop.f32.mrb[3].mxu0  ;;  %v517_v19 = vadd.f32 %v516_v12, %v1914_v4 }
 0x10c   : > { %1479 = vtanh.f32 %v525_v10  ;;  %v529_v17 = vadd.f32 %v528_v14, %v1912_v3  ;;  %v519_v21 = vadd.f32 %v518_v16, %v1914_v4 }
 0x10d   : > { %1481 = vtanh.f32 %v527_v13 }
 0x10e   : > { %1483 = vtanh.f32 %v529_v17 }
 0x10f   : > { %1485 = vtanh.f32 %v513_v15 }
 0x110   : > { %1487 = vtanh.f32 %v515_v18  ;;  %v532_v23 = vpop.f32.mrb[4].mxu1  ;;  %v638_v24 = vpop.f32.mrb[4].mxu0 }
 0x111   : > { %v533_v25 = vadd.f32 %v532_v23, %v1923_v20  ;;  %1489 = vtanh.f32 %v517_v19  ;;  %v534_v26 = vpop.f32.mrb[5].mxu1  ;;  %v640_v27 = vpop.f32.mrb[5].mxu0  ;;  %v639_v33 = vadd.f32 %v638_v24, %v1910_v2 }
 0x112   : > { %v535_v28 = vadd.f32 %v534_v26, %v1923_v20  ;;  %1491 = vtanh.f32 %v519_v21  ;;  %v536_v29 = vpop.f32.mrb[6].mxu1  ;;  %v642_v30 = vpop.f32.mrb[6].mxu0  ;;  %v641_v36 = vadd.f32 %v640_v27, %v1910_v2 }
 0x113   : > { %1493 = vtanh.f32 %v533_v25  ;;  %v537_v31 = vadd.f32 %v536_v29, %v1928_v22  ;;  %v538_v32 = vpop.f32.mrb[7].mxu1  ;;  %v644_v34 = vpop.f32.mrb[7].mxu0  ;;  %v643_v38 = vadd.f32 %v642_v30, %v1914_v4 }
 0x114   : > { %1495 = vtanh.f32 %v535_v28  ;;  %v539_v35 = vadd.f32 %v538_v32, %v1928_v22  ;;  %v645_v40 = vadd.f32 %v644_v34, %v1914_v4 }
 0x115   : > { %v1478_v37 = vpop.eup %1477  ;;  %1497 = vtanh.f32 %v537_v31 }
 0x116   : > { %v1480_v39 = vpop.eup %1479  ;;  %1017 = vst [vmem:[%s1937_s12 + $0xd0] sm:$0xff] %v1478_v37  ;;  %1499 = vtanh.f32 %v539_v35 }
 0x117   : > { %v1482_v41 = vpop.eup %1481  ;;  %1018 = vst [vmem:[%s1937_s12 + $0xd8] sm:$0xff] %v1480_v39  ;;  %1501 = vtanh.f32 %v639_v33 }
 0x118   : > { %v1484_v42 = vpop.eup %1483  ;;  %1030 = vst [vmem:[%s1937_s12 + $0x138] sm:$0xff] %v1482_v41  ;;  %v575_v43 = vpop.f32.mrb[8].mxu1  ;;  %1503 = vtanh.f32 %v641_v36 }
 0x119   : > { %v648_v44 = vpop.f32.mrb[8].mxu0  ;;  %v1486_v45 = vpop.eup %1485  ;;  %1031 = vst [vmem:[%s1937_s12 + $0x140] sm:$0xff] %v1484_v42  ;;  %v576_v46 = vadd.f32 %v575_v43, %v1910_v2  ;;  %1505 = vtanh.f32 %v643_v38 }
 0x11a   : > { %v577_v47 = vpop.f32.mrb[9].mxu1  ;;  %v650_v48 = vpop.f32.mrb[9].mxu0  ;;  %991 = vst [vmem:[%s1937_s12] sm:$0xff] %v1486_v45  ;;  %1507 = vtanh.f32 %v645_v40  ;;  %v649_v56 = vadd.f32 %v648_v44, %v1908_v1 }
 0x11b   : > { %v1488_v49 = vpop.eup %1487  ;;  %v578_v50 = vadd.f32 %v577_v47, %v1910_v2  ;;  %v579_v51 = vpop.f32.mrb[10].mxu1  ;;  %1509 = vtanh.f32 %v576_v46  ;;  %v651_v60 = vadd.f32 %v650_v48, %v1908_v1 }
 0x11c   : > { %v652_v52 = vpop.f32.mrb[10].mxu0  ;;  %v1490_v53 = vpop.eup %1489  ;;  %992 = vst [vmem:[%s1937_s12 + $0x8] sm:$0xff] %v1488_v49  ;;  %v580_v54 = vadd.f32 %v579_v51, %v1914_v4 }
 0x11d   : > { %v581_v55 = vpop.f32.mrb[11].mxu1  ;;  %v654_v57 = vpop.f32.mrb[11].mxu0  ;;  %1004 = vst [vmem:[%s1937_s12 + $0x68] sm:$0xff] %v1490_v53  ;;  %1511 = vtanh.f32 %v578_v50  ;;  %v653_v62 = vadd.f32 %v652_v52, %v1912_v3 }
 0x11e   : > { %v1492_v58 = vpop.eup %1491  ;;  %v582_v59 = vadd.f32 %v581_v55, %v1914_v4  ;;  %1513 = vtanh.f32 %v580_v54  ;;  %v655_v0 = vadd.f32 %v654_v57, %v1912_v3 }
 0x11f   : > { %v1494_v61 = vpop.eup %1493  ;;  %1005 = vst [vmem:[%s1937_s12 + $0x70] sm:$0xff] %v1492_v58 }
 0x120   : > { %v1496_v63 = vpop.eup %1495  ;;  %1043 = vst [vmem:[%s1937_s12 + $0x1a0] sm:$0xff] %v1494_v61  ;;  %1515 = vtanh.f32 %v582_v59  ;;  %v585_v7 = vpop.f32.mrb[12].mxu1 }
 0x121   : > { %v1498_v5 = vpop.eup %1497  ;;  %1044 = vst [vmem:[%s1937_s12 + $0x1a8] sm:$0xff] %v1496_v63  ;;  %1517 = vtanh.f32 %v649_v56  ;;  %v658_v8 = vpop.f32.mrb[12].mxu0  ;;  %v586_v10 = vadd.f32 %v585_v7, %v1908_v1 }
 0x122   : > { %v1500_v6 = vpop.eup %1499  ;;  %1056 = vst [vmem:[%s1937_s12 + $0x208] sm:$0xff] %v1498_v5  ;;  %1519 = vtanh.f32 %v651_v60  ;;  %v587_v11 = vpop.f32.mrb[13].mxu1  ;;  %v659_v21 = vadd.f32 %v658_v8, %v1923_v20 }
 0x123   : > { %v1502_v9 = vpop.eup %1501  ;;  %1057 = vst [vmem:[%s1937_s12 + $0x210] sm:$0xff] %v1500_v6  ;;  %1521 = vtanh.f32 %v653_v62  ;;  %v660_v12 = vpop.f32.mrb[13].mxu0  ;;  %v588_v14 = vadd.f32 %v587_v11, %v1908_v1 }
 0x124   : > { %v1504_v13 = vpop.eup %1503  ;;  %995 = vst [vmem:[%s1937_s12 + $0x20] sm:$0xff] %v1502_v9  ;;  %v589_v15 = vpop.f32.mrb[14].mxu1  ;;  %1523 = vtanh.f32 %v655_v0  ;;  %v661_v26 = vadd.f32 %v660_v12, %v1923_v20 }
 0x125   : > { %v662_v16 = vpop.f32.mrb[14].mxu0  ;;  %v1506_v17 = vpop.eup %1505  ;;  %996 = vst [vmem:[%s1937_s12 + $0x28] sm:$0xff] %v1504_v13  ;;  %1525 = vtanh.f32 %v586_v10  ;;  %v590_v18 = vadd.f32 %v589_v15, %v1912_v3 }
 0x126   : > { %v591_v19 = vpop.f32.mrb[15].mxu1  ;;  %v664_v23 = vpop.f32.mrb[15].mxu0  ;;  %1008 = vst [vmem:[%s1937_s12 + $0x88] sm:$0xff] %v1506_v17  ;;  %1527 = vtanh.f32 %v588_v14  ;;  %v663_v28 = vadd.f32 %v662_v16, %v1928_v22 }
 0x127   : > { %v1508_v24 = vpop.eup %1507  ;;  %v592_v25 = vadd.f32 %v591_v19, %v1912_v3  ;;  %1529 = vtanh.f32 %v590_v18  ;;  %v665_v30 = vadd.f32 %v664_v23, %v1928_v22 }
 0x128   : > { %v1510_v27 = vpop.eup %1509  ;;  %1009 = vst [vmem:[%s1937_s12 + $0x90] sm:$0xff] %v1508_v24  ;;  %v595_v33 = vpop.f32.mrb[16].mxu1 }
 0x129   : > { %v1512_v29 = vpop.eup %1511  ;;  %993 = vst [vmem:[%s1937_s12 + $0x10] sm:$0xff] %v1510_v27  ;;  %1531 = vtanh.f32 %v592_v25  ;;  %v764_v34 = vpop.f32.mrb[16].mxu0  ;;  %v596_v36 = vadd.f32 %v595_v33, %v1923_v20 }
 0x12a   : > { %v1514_v31 = vpop.eup %1513  ;;  %994 = vst [vmem:[%s1937_s12 + $0x18] sm:$0xff] %v1512_v29  ;;  %1533 = vtanh.f32 %v659_v21  ;;  %v597_v37 = vpop.f32.mrb[17].mxu1  ;;  %v765_v46 = vadd.f32 %v764_v34, %v1910_v2 }
 0x12b   : > { %v1516_v32 = vpop.eup %1515  ;;  %1006 = vst [vmem:[%s1937_s12 + $0x78] sm:$0xff] %v1514_v31  ;;  %1535 = vtanh.f32 %v661_v26  ;;  %v766_v38 = vpop.f32.mrb[17].mxu0  ;;  %v598_v40 = vadd.f32 %v597_v37, %v1923_v20 }
 0x12c   : > { %v1518_v35 = vpop.eup %1517  ;;  %1007 = vst [vmem:[%s1937_s12 + $0x80] sm:$0xff] %v1516_v32  ;;  %1537 = vtanh.f32 %v663_v28  ;;  %v599_v41 = vpop.f32.mrb[18].mxu1  ;;  %v767_v50 = vadd.f32 %v766_v38, %v1910_v2 }
 0x12d   : > { %v1520_v39 = vpop.eup %1519  ;;  %1021 = vst [vmem:[%s1937_s12 + $0xf0] sm:$0xff] %v1518_v35  ;;  %1539 = vtanh.f32 %v665_v30  ;;  %v768_v42 = vpop.f32.mrb[18].mxu0  ;;  %v600_v44 = vadd.f32 %v599_v41, %v1928_v22 }
 0x12e   : > { %v1522_v43 = vpop.eup %1521  ;;  %1022 = vst [vmem:[%s1937_s12 + $0xf8] sm:$0xff] %v1520_v39  ;;  %1541 = vtanh.f32 %v596_v36  ;;  %v601_v45 = vpop.f32.mrb[19].mxu1  ;;  %v769_v52 = vadd.f32 %v768_v42, %v1914_v4 }
 0x12f   : > { %v770_v47 = vpop.f32.mrb[19].mxu0  ;;  %v1524_v48 = vpop.eup %1523  ;;  %1034 = vst [vmem:[%s1937_s12 + $0x158] sm:$0xff] %v1522_v43  ;;  %1543 = vtanh.f32 %v598_v40  ;;  %v602_v49 = vadd.f32 %v601_v45, %v1928_v22 }
 0x130   : > { %v1526_v51 = vpop.eup %1525  ;;  %1035 = vst [vmem:[%s1937_s12 + $0x160] sm:$0xff] %v1524_v48  ;;  %1545 = vtanh.f32 %v600_v44  ;;  %v771_v54 = vadd.f32 %v770_v47, %v1914_v4  ;;  %v701_v57 = vpop.f32.mrb[20].mxu1 }
 0x131   : > { %v1528_v53 = vpop.eup %1527  ;;  %1019 = vst [vmem:[%s1937_s12 + $0xe0] sm:$0xff] %v1526_v51  ;;  %1547 = vtanh.f32 %v602_v49  ;;  %v774_v58 = vpop.f32.mrb[20].mxu0  ;;  %v702_v60 = vadd.f32 %v701_v57, %v1910_v2 }
 0x132   : > { %v1530_v55 = vpop.eup %1529  ;;  %1020 = vst [vmem:[%s1937_s12 + $0xe8] sm:$0xff] %v1528_v53  ;;  %1549 = vtanh.f32 %v765_v46  ;;  %v703_v61 = vpop.f32.mrb[21].mxu1  ;;  %v775_v10 = vadd.f32 %v774_v58, %v1908_v1 }
 0x133   : > { %v1532_v56 = vpop.eup %1531  ;;  %1032 = vst [vmem:[%s1937_s12 + $0x148] sm:$0xff] %v1530_v55  ;;  %1551 = vtanh.f32 %v767_v50  ;;  %v776_v62 = vpop.f32.mrb[21].mxu0  ;;  %v704_v0 = vadd.f32 %v703_v61, %v1910_v2 }
 0x134   : > { %v1534_v59 = vpop.eup %1533  ;;  %1033 = vst [vmem:[%s1937_s12 + $0x150] sm:$0xff] %v1532_v56  ;;  %1553 = vtanh.f32 %v769_v52  ;;  %v705_v5 = vpop.f32.mrb[22].mxu1  ;;  %v777_v14 = vadd.f32 %v776_v62, %v1908_v1 }
 0x135   : > { %v1536_v63 = vpop.eup %1535  ;;  %1047 = vst [vmem:[%s1937_s12 + $0x1c0] sm:$0xff] %v1534_v59  ;;  %1555 = vtanh.f32 %v771_v54  ;;  %v778_v6 = vpop.f32.mrb[22].mxu0  ;;  %v706_v8 = vadd.f32 %v705_v5, %v1914_v4 }
 0x136   : > { %v1538_v7 = vpop.eup %1537  ;;  %1048 = vst [vmem:[%s1937_s12 + $0x1c8] sm:$0xff] %v1536_v63  ;;  %1557 = vtanh.f32 %v702_v60  ;;  %v707_v9 = vpop.f32.mrb[23].mxu1  ;;  %v779_v16 = vadd.f32 %v778_v6, %v1912_v3 }
 0x137   : > { %v780_v11 = vpop.f32.mrb[23].mxu0  ;;  %v1540_v12 = vpop.eup %1539  ;;  %1060 = vst [vmem:[%s1937_s12 + $0x228] sm:$0xff] %v1538_v7  ;;  %1559 = vtanh.f32 %v704_v0  ;;  %v708_v13 = vadd.f32 %v707_v9, %v1914_v4 }
 0x138   : > { %v1542_v15 = vpop.eup %1541  ;;  %1061 = vst [vmem:[%s1937_s12 + $0x230] sm:$0xff] %v1540_v12  ;;  %1561 = vtanh.f32 %v706_v8  ;;  %v781_v18 = vadd.f32 %v780_v11, %v1912_v3  ;;  %v711_v23 = vpop.f32.mrb[24].mxu1 }
 0x139   : > { %v1544_v17 = vpop.eup %1543  ;;  %1045 = vst [vmem:[%s1937_s12 + $0x1b0] sm:$0xff] %v1542_v15  ;;  %1563 = vtanh.f32 %v708_v13  ;;  %v784_v24 = vpop.f32.mrb[24].mxu0  ;;  %v712_v26 = vadd.f32 %v711_v23, %v1908_v1 }
 0x13a   : > { %v1546_v19 = vpop.eup %1545  ;;  %1046 = vst [vmem:[%s1937_s12 + $0x1b8] sm:$0xff] %v1544_v17  ;;  %1565 = vtanh.f32 %v775_v10  ;;  %v713_v27 = vpop.f32.mrb[25].mxu1  ;;  %v785_v36 = vadd.f32 %v784_v24, %v1923_v20 }
 0x13b   : > { %v1548_v21 = vpop.eup %1547  ;;  %1058 = vst [vmem:[%s1937_s12 + $0x218] sm:$0xff] %v1546_v19  ;;  %1567 = vtanh.f32 %v777_v14  ;;  %v786_v28 = vpop.f32.mrb[25].mxu0  ;;  %v714_v30 = vadd.f32 %v713_v27, %v1908_v1 }
 0x13c   : > { %v1550_v25 = vpop.eup %1549  ;;  %1059 = vst [vmem:[%s1937_s12 + $0x220] sm:$0xff] %v1548_v21  ;;  %1569 = vtanh.f32 %v779_v16  ;;  %v715_v31 = vpop.f32.mrb[26].mxu1  ;;  %v787_v40 = vadd.f32 %v786_v28, %v1923_v20 }
 0x13d   : > { %v1552_v29 = vpop.eup %1551  ;;  %999 = vst [vmem:[%s1937_s12 + $0x40] sm:$0xff] %v1550_v25  ;;  %1571 = vtanh.f32 %v781_v18  ;;  %v788_v32 = vpop.f32.mrb[26].mxu0  ;;  %v716_v34 = vadd.f32 %v715_v31, %v1912_v3 }
 0x13e   : > { %v1554_v33 = vpop.eup %1553  ;;  %1000 = vst [vmem:[%s1937_s12 + $0x48] sm:$0xff] %v1552_v29  ;;  %1573 = vtanh.f32 %v712_v26  ;;  %v717_v35 = vpop.f32.mrb[27].mxu1  ;;  %v789_v42 = vadd.f32 %v788_v32, %v1928_v22 }
 0x13f   : > { %v790_v37 = vpop.f32.mrb[27].mxu0  ;;  %v1556_v38 = vpop.eup %1555  ;;  %1012 = vst [vmem:[%s1937_s12 + $0xa8] sm:$0xff] %v1554_v33  ;;  %1575 = vtanh.f32 %v714_v30  ;;  %v718_v39 = vadd.f32 %v717_v35, %v1912_v3 }
 0x140   : > { %v1558_v41 = vpop.eup %1557  ;;  %1013 = vst [vmem:[%s1937_s12 + $0xb0] sm:$0xff] %v1556_v38  ;;  %1577 = vtanh.f32 %v716_v34  ;;  %v791_v44 = vadd.f32 %v790_v37, %v1928_v22  ;;  %v721_v47 = vpop.f32.mrb[28].mxu1 }
 0x141   : > { %v1560_v43 = vpop.eup %1559  ;;  %997 = vst [vmem:[%s1937_s12 + $0x30] sm:$0xff] %v1558_v41  ;;  %1579 = vtanh.f32 %v718_v39  ;;  %v890_v48 = vpop.f32.mrb[28].mxu0  ;;  %v722_v50 = vadd.f32 %v721_v47, %v1923_v20 }
 0x142   : > { %v1562_v45 = vpop.eup %1561  ;;  %998 = vst [vmem:[%s1937_s12 + $0x38] sm:$0xff] %v1560_v43  ;;  %1581 = vtanh.f32 %v785_v36  ;;  %v723_v51 = vpop.f32.mrb[29].mxu1  ;;  %v891_v60 = vadd.f32 %v890_v48, %v1910_v2 }
 0x143   : > { %v1564_v46 = vpop.eup %1563  ;;  %1010 = vst [vmem:[%s1937_s12 + $0x98] sm:$0xff] %v1562_v45  ;;  %1583 = vtanh.f32 %v787_v40  ;;  %v1390_v52 = vpop.f32.mrb[29].mxu0  ;;  %v724_v54 = vadd.f32 %v723_v51, %v1923_v20 }
 0x144   : > { %v1566_v49 = vpop.eup %1565  ;;  %1011 = vst [vmem:[%s1937_s12 + $0xa0] sm:$0xff] %v1564_v46  ;;  %1585 = vtanh.f32 %v789_v42  ;;  %v725_v55 = vpop.f32.mrb[30].mxu1 }
 0x145   : > { %v1568_v53 = vpop.eup %1567  ;;  %1025 = vst [vmem:[%s1937_s12 + $0x110] sm:$0xff] %v1566_v49  ;;  %1587 = vtanh.f32 %v791_v44  ;;  %v893_v56 = vpop.f32.mrb[30].mxu0  ;;  %v726_v58 = vadd.f32 %v725_v55, %v1928_v22 }
 0x146   : > { %v1570_v57 = vpop.eup %1569  ;;  %1026 = vst [vmem:[%s1937_s12 + $0x118] sm:$0xff] %v1568_v53  ;;  %1589 = vtanh.f32 %v722_v50  ;;  %v727_v59 = vpop.f32.mrb[31].mxu1  ;;  %v894_v0 = vadd.f32 %v893_v56, %v1914_v4 }
 0x147   : > { %v1391_v61 = vpop.f32.mrb[31].mxu0  ;;  %v1572_v62 = vpop.eup %1571  ;;  %1038 = vst [vmem:[%s1937_s12 + $0x178] sm:$0xff] %v1570_v57  ;;  %1591 = vtanh.f32 %v724_v54  ;;  %v728_v63 = vadd.f32 %v727_v59, %v1928_v22 }
 0x148   : > { %v1574_v5 = vpop.eup %1573  ;;  %1039 = vst [vmem:[%s1937_s12 + $0x180] sm:$0xff] %v1572_v62  ;;  %1593 = vtanh.f32 %v726_v58  ;;  %v827_v9 = vpop.f32.mrb[32].mxu1 }
 0x149   : > { %v1576_v6 = vpop.eup %1575  ;;  %1023 = vst [vmem:[%s1937_s12 + $0x100] sm:$0xff] %v1574_v5  ;;  %1595 = vtanh.f32 %v728_v63  ;;  %v898_v10 = vpop.f32.mrb[32].mxu0  ;;  %v828_v12 = vadd.f32 %v827_v9, %v1910_v2  ;;  %v1095_v9 = vld [vmem:[%s1937_s12 + $0x10] sm:$0xff] (%p1710_p5) }
 0x14a   : > { %v1578_v7 = vpop.eup %1577  ;;  %1024 = vst [vmem:[%s1937_s12 + $0x108] sm:$0xff] %v1576_v6  ;;  %1597 = vtanh.f32 %v891_v60  ;;  %v829_v13 = vpop.f32.mrb[33].mxu1  ;;  %v899_v24 = vadd.f32 %v898_v10, %v1908_v1  ;;  %v1097_v10 = vld [vmem:[%s1937_s12 + $0x18] sm:$0xff] (%p1710_p5)  ;;  %1096 = vst [vmem:[%s2093_s4 + $0x10] sm:$0xff] (%p1710_p5), %v1095_v9  ;;  %v1223_v9 = vld [vmem:[%s1937_s12 + $0x210] sm:$0xff] (%p1710_p5) }
 0x14b   : > { %v1580_v8 = vpop.eup %1579  ;;  %1036 = vst [vmem:[%s1937_s12 + $0x168] sm:$0xff] %v1578_v7  ;;  %1599 = vtanh.f32 %v894_v0  ;;  %v1394_v14 = vpop.f32.mrb[33].mxu0  ;;  %v830_v16 = vadd.f32 %v829_v13, %v1910_v2  ;;  %v1091_v7 = vld [vmem:[%s1937_s12] sm:$0xff] (%p1710_p5)  ;;  %v1103_v13 = vld [vmem:[%s1937_s12 + $0x30] sm:$0xff] (%p1710_p5)  ;;  %1098 = vst [vmem:[%s2093_s4 + $0x18] sm:$0xff] (%p1710_p5), %v1097_v10 }
 0x14c   : > { %v1582_v11 = vpop.eup %1581  ;;  %1037 = vst [vmem:[%s1937_s12 + $0x170] sm:$0xff] %v1580_v8  ;;  %v831_v17 = vpop.f32.mrb[34].mxu1  ;;  %1601 = vtanh.f32 %v828_v12  ;;  %v1093_v8 = vld [vmem:[%s1937_s12 + $0x8] sm:$0xff] (%p1710_p5)  ;;  %v1105_v14 = vld [vmem:[%s1937_s12 + $0x38] sm:$0xff] (%p1710_p5)  ;;  %1092 = vst [vmem:[%s2093_s4] sm:$0xff] (%p1710_p5), %v1091_v7 }
 0x14d   : > { %v1584_v15 = vpop.eup %1583  ;;  %1051 = vst [vmem:[%s1937_s12 + $0x1e0] sm:$0xff] %v1582_v11  ;;  %v901_v18 = vpop.f32.mrb[34].mxu0  ;;  %v832_v21 = vadd.f32 %v831_v17, %v1914_v4  ;;  %1603 = vtanh.f32 %v830_v16  ;;  %v1099_v11 = vld [vmem:[%s1937_s12 + $0x20] sm:$0xff] (%p1710_p5)  ;;  %v1101_v12 = vld [vmem:[%s1937_s12 + $0x28] sm:$0xff] (%p1710_p5)  ;;  %1094 = vst [vmem:[%s2093_s4 + $0x8] sm:$0xff] (%p1710_p5), %v1093_v8 }
 0x14e   : > { %v1586_v19 = vpop.eup %1585  ;;  %1052 = vst [vmem:[%s1937_s12 + $0x1e8] sm:$0xff] %v1584_v15  ;;  %v833_v23 = vpop.f32.mrb[35].mxu1  ;;  %v902_v27 = vadd.f32 %v901_v18, %v1912_v3  ;;  %v1107_v15 = vld [vmem:[%s1937_s12 + $0x40] sm:$0xff] (%p1710_p5)  ;;  %1100 = vst [vmem:[%s2093_s4 + $0x20] sm:$0xff] (%p1710_p5), %v1099_v11  ;;  %v1109_v16 = vld [vmem:[%s1937_s12 + $0x48] sm:$0xff] (%p1710_p5) }
 0x14f   : > { %v1395_v25 = vpop.f32.mrb[35].mxu0  ;;  %v1588_v26 = vpop.eup %1587  ;;  %1064 = vst [vmem:[%s1937_s12 + $0x248] sm:$0xff] %v1586_v19  ;;  %v834_v2 = vadd.f32 %v833_v23, %v1914_v4  ;;  %1605 = vtanh.f32 %v832_v21  ;;  %1102 = vst [vmem:[%s2093_s4 + $0x28] sm:$0xff] (%p1710_p5), %v1101_v12  ;;  %v1117_v21 = vld [vmem:[%s1937_s12 + $0x68] sm:$0xff] (%p1710_p5)  ;;  %v1119_v23 = vld [vmem:[%s1937_s12 + $0x70] sm:$0xff] (%p1710_p5) }
 0x150   : > { %v1590_v28 = vpop.eup %1589  ;;  %1065 = vst [vmem:[%s1937_s12 + $0x250] sm:$0xff] %v1588_v26  ;;  %v837_v32 = vpop.f32.mrb[36].mxu1  ;;  %1104 = vst [vmem:[%s2093_s4 + $0x30] sm:$0xff] (%p1710_p5), %v1103_v13  ;;  %v1123_v25 = vld [vmem:[%s1937_s12 + $0x80] sm:$0xff] (%p1710_p5)  ;;  %v1125_v26 = vld [vmem:[%s1937_s12 + $0x88] sm:$0xff] (%p1710_p5) }
 0x151   : > { %v1592_v29 = vpop.eup %1591  ;;  %1049 = vst [vmem:[%s1937_s12 + $0x1d0] sm:$0xff] %v1590_v28  ;;  %1607 = vtanh.f32 %v834_v2  ;;  %v906_v33 = vpop.f32.mrb[36].mxu0  ;;  %v838_v34 = vadd.f32 %v837_v32, %v1908_v1  ;;  %1106 = vst [vmem:[%s2093_s4 + $0x38] sm:$0xff] (%p1710_p5), %v1105_v14  ;;  %v1127_v2 = vld [vmem:[%s1937_s12 + $0x90] sm:$0xff] (%p1710_p5)  ;;  %v1131_v28 = vld [vmem:[%s1937_s12 + $0xa0] sm:$0xff] (%p1710_p5) }
 0x152   : > { %v1594_v30 = vpop.eup %1593  ;;  %1050 = vst [vmem:[%s1937_s12 + $0x1d8] sm:$0xff] %v1592_v29  ;;  %1609 = vtanh.f32 %v899_v24  ;;  %v839_v35 = vpop.f32.mrb[37].mxu1  ;;  %v907_v40 = vadd.f32 %v906_v33, %v1923_v20  ;;  %1108 = vst [vmem:[%s2093_s4 + $0x40] sm:$0xff] (%p1710_p5), %v1107_v15  ;;  %v1121_v24 = vld [vmem:[%s1937_s12 + $0x78] sm:$0xff] (%p1710_p5)  ;;  %v1133_v29 = vld [vmem:[%s1937_s12 + $0xa8] sm:$0xff] (%p1710_p5) }
 0x153   : > { %v1596_v31 = vpop.eup %1595  ;;  %1062 = vst [vmem:[%s1937_s12 + $0x238] sm:$0xff] %v1594_v30  ;;  %1611 = vtanh.f32 %v902_v27  ;;  %v1398_v36 = vpop.f32.mrb[37].mxu0  ;;  %v840_v38 = vadd.f32 %v839_v35, %v1908_v1  ;;  %1110 = vst [vmem:[%s2093_s4 + $0x48] sm:$0xff] (%p1710_p5), %v1109_v16  ;;  %v1129_v27 = vld [vmem:[%s1937_s12 + $0x98] sm:$0xff] (%p1710_p5)  ;;  %v1135_v30 = vld [vmem:[%s1937_s12 + $0xb0] sm:$0xff] (%p1710_p5) }
 0x154   : > { %v1598_v4 = vpop.eup %1597  ;;  %1063 = vst [vmem:[%s1937_s12 + $0x240] sm:$0xff] %v1596_v31  ;;  %v841_v39 = vpop.f32.mrb[38].mxu1  ;;  %1613 = vtanh.f32 %v838_v34  ;;  %1118 = vst [vmem:[%s2093_s4 + $0x1a0] sm:$0xff] (%p1710_p5), %v1117_v21  ;;  %v1145_v34 = vld [vmem:[%s1937_s12 + $0xd8] sm:$0xff] (%p1710_p5)  ;;  %v1147_v35 = vld [vmem:[%s1937_s12 + $0xe0] sm:$0xff] (%p1710_p5) }
 0x155   : > { %v1600_v37 = vpop.eup %1599  ;;  %1003 = vst [vmem:[%s1937_s12 + $0x60] sm:$0xff] %v1598_v4  ;;  %v909_v41 = vpop.f32.mrb[38].mxu0  ;;  %v842_v42 = vadd.f32 %v841_v39, %v1912_v3  ;;  %1615 = vtanh.f32 %v840_v38  ;;  %1120 = vst [vmem:[%s2093_s4 + $0x1a8] sm:$0xff] (%p1710_p5), %v1119_v23  ;;  %v1143_v4 = vld [vmem:[%s1937_s12 + $0xd0] sm:$0xff] (%p1710_p5)  ;;  %v1149_v36 = vld [vmem:[%s1937_s12 + $0xe8] sm:$0xff] (%p1710_p5) }
 0x156   : > { %1016 = vst [vmem:[%s1937_s12 + $0xc8] sm:$0xff] %v1600_v37  ;;  %v843_v43 = vpop.f32.mrb[39].mxu1  ;;  %v1399_v44 = vpop.f32.mrb[39].mxu0  ;;  %v910_v46 = vadd.f32 %v909_v41, %v1928_v22  ;;  %1122 = vst [vmem:[%s2093_s4 + $0x1b0] sm:$0xff] (%p1710_p5), %v1121_v24  ;;  %v1151_v37 = vld [vmem:[%s1937_s12 + $0xf0] sm:$0xff] (%p1710_p5)  ;;  %v1153_v38 = vld [vmem:[%s1937_s12 + $0xf8] sm:$0xff] (%p1710_p5) }
 0x157   : > { %v844_v45 = vadd.f32 %v843_v43, %v1912_v3  ;;  %v1602_v47 = vpop.eup %1601  ;;  %1617 = vtanh.f32 %v842_v42  ;;  %1124 = vst [vmem:[%s2093_s4 + $0x1b8] sm:$0xff] (%p1710_p5), %v1123_v25  ;;  %1126 = vst [vmem:[%s2093_s4 + $0x1c0] sm:$0xff] (%p1710_p5), %v1125_v26  ;;  %v1155_v39 = vld [vmem:[%s1937_s12 + $0x100] sm:$0xff] (%p1710_p5)  ;;  %v1159_v41 = vld [vmem:[%s1937_s12 + $0x110] sm:$0xff] (%p1710_p5) }
 0x158   : > { %v1604_v1 = vpop.eup %1603  ;;  %1001 = vst [vmem:[%s1937_s12 + $0x50] sm:$0xff] %v1602_v47  ;;  %1619 = vtanh.f32 %v907_v40  ;;  %v847_v50 = vpop.f32.mrb[40].mxu1  ;;  %1128 = vst [vmem:[%s2093_s4 + $0x1c8] sm:$0xff] (%p1710_p5), %v1127_v2  ;;  %v1157_v40 = vld [vmem:[%s1937_s12 + $0x108] sm:$0xff] (%p1710_p5)  ;;  %v1161_v42 = vld [vmem:[%s1937_s12 + $0x118] sm:$0xff] (%p1710_p5) }
 0x159   : > { %v1606_v48 = vpop.eup %1605  ;;  %1002 = vst [vmem:[%s1937_s12 + $0x58] sm:$0xff] %v1604_v1  ;;  %1621 = vtanh.f32 %v844_v45  ;;  %v848_v3 = vadd.f32 %v847_v50, %v1923_v20  ;;  %v849_v52 = vpop.f32.mrb[41].mxu1  ;;  %1130 = vst [vmem:[%s2093_s4 + $0x1d0] sm:$0xff] (%p1710_p5), %v1129_v27  ;;  %v1171_v47 = vld [vmem:[%s1937_s12 + $0x140] sm:$0xff] (%p1710_p5)  ;;  %v1173_v1 = vld [vmem:[%s1937_s12 + $0x148] sm:$0xff] (%p1710_p5) }
 0x15a   : > { %1014 = vst [vmem:[%s1937_s12 + $0xb8] sm:$0xff] %v1606_v48  ;;  %1623 = vtanh.f32 %v910_v46  ;;  %v850_v54 = vadd.f32 %v849_v52, %v1923_v20  ;;  %v851_v55 = vpop.f32.mrb[42].mxu1  ;;  %1132 = vst [vmem:[%s2093_s4 + $0x1d8] sm:$0xff] (%p1710_p5), %v1131_v28  ;;  %v1169_v46 = vld [vmem:[%s1937_s12 + $0x138] sm:$0xff] (%p1710_p5)  ;;  %v1175_v48 = vld [vmem:[%s1937_s12 + $0x150] sm:$0xff] (%p1710_p5) }
 0x15b   : > { %v1608_v49 = vpop.eup %1607  ;;  %1625 = vtanh.f32 %v848_v3  ;;  %v852_v56 = vadd.f32 %v851_v55, %v1928_v22  ;;  %v853_v57 = vpop.f32.mrb[43].mxu1  ;;  %1134 = vst [vmem:[%s2093_s4 + $0x1e0] sm:$0xff] (%p1710_p5), %v1133_v29  ;;  %1136 = vst [vmem:[%s2093_s4 + $0x1e8] sm:$0xff] (%p1710_p5), %v1135_v30  ;;  %v1179_v50 = vld [vmem:[%s1937_s12 + $0x160] sm:$0xff] (%p1710_p5)  ;;  %v1183_v3 = vld [vmem:[%s1937_s12 + $0x170] sm:$0xff] (%p1710_p5) }
 0x15c   : > { %v1610_v51 = vpop.eup %1609  ;;  %1015 = vst [vmem:[%s1937_s12 + $0xc0] sm:$0xff] %v1608_v49  ;;  %1627 = vtanh.f32 %v850_v54  ;;  %v854_v58 = vadd.f32 %v853_v57, %v1928_v22  ;;  %v1115_v19 = vld [vmem:[%s1937_s12 + $0x60] sm:$0xff] (%p1710_p5)  ;;  %1144 = vst [vmem:[%s2093_s4 + $0x340] sm:$0xff] (%p1710_p5), %v1143_v4  ;;  %v1177_v49 = vld [vmem:[%s1937_s12 + $0x158] sm:$0xff] (%p1710_p5) }
 0x15d   : > { %v1612_v53 = vpop.eup %1611  ;;  %1029 = vst [vmem:[%s1937_s12 + $0x130] sm:$0xff] %v1610_v51  ;;  %1629 = vtanh.f32 %v852_v56  ;;  %1116 = vst [vmem:[%s2093_s4 + $0x60] sm:$0xff] (%p1710_p5), %v1115_v19  ;;  %v1141_v33 = vld [vmem:[%s1937_s12 + $0xc8] sm:$0xff] (%p1710_p5)  ;;  %v1185_v52 = vld [vmem:[%s1937_s12 + $0x178] sm:$0xff] (%p1710_p5) }
 0x15e   : > { %1042 = vst [vmem:[%s1937_s12 + $0x198] sm:$0xff] %v1612_v53  ;;  %v1614_v59 = vpop.eup %1613  ;;  %1631 = vtanh.f32 %v854_v58  ;;  %1142 = vst [vmem:[%s2093_s4 + $0x200] sm:$0xff] (%p1710_p5), %v1141_v33  ;;  %v1181_v51 = vld [vmem:[%s1937_s12 + $0x168] sm:$0xff] (%p1710_p5)  ;;  %v1187_v53 = vld [vmem:[%s1937_s12 + $0x180] sm:$0xff] (%p1710_p5) }
 0x15f   : > { %v1616_v60 = vpop.eup %1615  ;;  %1027 = vst [vmem:[%s1937_s12 + $0x120] sm:$0xff] %v1614_v59  ;;  %v1111_v17 = vld [vmem:[%s1937_s12 + $0x50] sm:$0xff] (%p1710_p5)  ;;  %1146 = vst [vmem:[%s2093_s4 + $0x348] sm:$0xff] (%p1710_p5), %v1145_v34  ;;  %v1195_v57 = vld [vmem:[%s1937_s12 + $0x1a0] sm:$0xff] (%p1710_p5) }
 0x160   : > { %1028 = vst [vmem:[%s1937_s12 + $0x128] sm:$0xff] %v1616_v60  ;;  %v1113_v18 = vld [vmem:[%s1937_s12 + $0x58] sm:$0xff] (%p1710_p5)  ;;  %1112 = vst [vmem:[%s2093_s4 + $0x50] sm:$0xff] (%p1710_p5), %v1111_v17  ;;  %v1197_v58 = vld [vmem:[%s1937_s12 + $0x1a8] sm:$0xff] (%p1710_p5) }
 0x161   : > { %v1618_v20 = vpop.eup %1617  ;;  %1114 = vst [vmem:[%s2093_s4 + $0x58] sm:$0xff] (%p1710_p5), %v1113_v18  ;;  %v1137_v31 = vld [vmem:[%s1937_s12 + $0xb8] sm:$0xff] (%p1710_p5)  ;;  %1148 = vst [vmem:[%s2093_s4 + $0x350] sm:$0xff] (%p1710_p5), %v1147_v35  ;;  %v1199_v59 = vld [vmem:[%s1937_s12 + $0x1b0] sm:$0xff] (%p1710_p5) }
 0x162   : > { %v1620_v61 = vpop.eup %1619  ;;  %1040 = vst [vmem:[%s1937_s12 + $0x188] sm:$0xff] %v1618_v20  ;;  %1138 = vst [vmem:[%s2093_s4 + $0x1f0] sm:$0xff] (%p1710_p5), %v1137_v31  ;;  %v1201_v60 = vld [vmem:[%s1937_s12 + $0x1b8] sm:$0xff] (%p1710_p5)  ;;  %v1203_v20 = vld [vmem:[%s1937_s12 + $0x1c0] sm:$0xff] (%p1710_p5) }
 0x163   : > { %v1622_v62 = vpop.eup %1621  ;;  %1055 = vst [vmem:[%s1937_s12 + $0x200] sm:$0xff] %v1620_v61  ;;  %1075 = sbr.rel (!%p1710_p5) target bundleno = 384 (0x180), region = 62  ;;  %v1139_v32 = vld [vmem:[%s1937_s12 + $0xc0] sm:$0xff] (%p1710_p5)  ;;  %1150 = vst [vmem:[%s2093_s4 + $0x358] sm:$0xff] (%p1710_p5), %v1149_v36  ;;  %v1205_v61 = vld [vmem:[%s1937_s12 + $0x1c8] sm:$0xff] (%p1710_p5) }
 0x164   : > { %v1624_v63 = vpop.eup %1623  ;;  %1041 = vst [vmem:[%s1937_s12 + $0x190] sm:$0xff] %v1622_v62  ;;  %1140 = vst [vmem:[%s2093_s4 + $0x1f8] sm:$0xff] (%p1710_p5), %v1139_v32  ;;  %v1167_v45 = vld [vmem:[%s1937_s12 + $0x130] sm:$0xff] (%p1710_p5)  ;;  %v1221_v8 = vld [vmem:[%s1937_s12 + $0x208] sm:$0xff] (%p1710_p5) }
 0x165   : > { %1068 = vst [vmem:[%s1937_s12 + $0x268] sm:$0xff] %v1624_v63  ;;  %v1626_v0 = vpop.eup %1625  ;;  %1152 = vst [vmem:[%s2093_s4 + $0x360] sm:$0xff] (%p1710_p5), %v1151_v37  ;;  %v1193_v56 = vld [vmem:[%s1937_s12 + $0x198] sm:$0xff] (%p1710_p5)  ;;  %v1207_v62 = vld [vmem:[%s1937_s12 + $0x1d0] sm:$0xff] (%p1710_p5) }
 0x166   : > { %v1628_v22 = vpop.eup %1627  ;;  %1053 = vst [vmem:[%s1937_s12 + $0x1f0] sm:$0xff] %v1626_v0  ;;  %1154 = vst [vmem:[%s2093_s4 + $0x368] sm:$0xff] (%p1710_p5), %v1153_v38  ;;  %v1163_v43 = vld [vmem:[%s1937_s12 + $0x120] sm:$0xff] (%p1710_p5)  ;;  %v1209_v63 = vld [vmem:[%s1937_s12 + $0x1d8] sm:$0xff] (%p1710_p5) }
 0x167   : > { %v1630_v5 = vpop.eup %1629  ;;  %1054 = vst [vmem:[%s1937_s12 + $0x1f8] sm:$0xff] %v1628_v22  ;;  %1156 = vst [vmem:[%s2093_s4 + $0x370] sm:$0xff] (%p1710_p5), %v1155_v39  ;;  %v1165_v44 = vld [vmem:[%s1937_s12 + $0x128] sm:$0xff] (%p1710_p5)  ;;  %v1211_v0 = vld [vmem:[%s1937_s12 + $0x1e0] sm:$0xff] (%p1710_p5) }
 0x168   : > { %v1632_v6 = vpop.eup %1631  ;;  %1066 = vst [vmem:[%s1937_s12 + $0x258] sm:$0xff] %v1630_v5  ;;  %1158 = vst [vmem:[%s2093_s4 + $0x378] sm:$0xff] (%p1710_p5), %v1157_v40  ;;  %v1213_v22 = vld [vmem:[%s1937_s12 + $0x1e8] sm:$0xff] (%p1710_p5)  ;;  %v1225_v10 = vld [vmem:[%s1937_s12 + $0x218] sm:$0xff] (%p1710_p5) }
 0x169   : > { %1067 = vst [vmem:[%s1937_s12 + $0x260] sm:$0xff] %v1632_v6  ;;  %1160 = vst [vmem:[%s2093_s4 + $0x380] sm:$0xff] (%p1710_p5), %v1159_v41  ;;  %v1189_v54 = vld [vmem:[%s1937_s12 + $0x188] sm:$0xff] (%p1710_p5)  ;;  %v1227_v11 = vld [vmem:[%s1937_s12 + $0x220] sm:$0xff] (%p1710_p5) }
 0x16a   : > { %1162 = vst [vmem:[%s2093_s4 + $0x388] sm:$0xff] %v1161_v42  ;;  %1164 = vst [vmem:[%s2093_s4 + $0x390] sm:$0xff] %v1163_v43  ;;  %v1219_v7 = vld [vmem:[%s1937_s12 + $0x200] sm:$0xff]  ;;  %v1229_v12 = vld [vmem:[%s1937_s12 + $0x228] sm:$0xff] }
 0x16b   : > { %1166 = vst [vmem:[%s2093_s4 + $0x398] sm:$0xff] %v1165_v44  ;;  %1168 = vst [vmem:[%s2093_s4 + $0x3a0] sm:$0xff] %v1167_v45  ;;  %v1191_v55 = vld [vmem:[%s1937_s12 + $0x190] sm:$0xff]  ;;  %v1233_v14 = vld [vmem:[%s1937_s12 + $0x238] sm:$0xff] }
 0x16c   : > { %1170 = vst [vmem:[%s2093_s4 + $0x4e0] sm:$0xff] %v1169_v46  ;;  %1172 = vst [vmem:[%s2093_s4 + $0x4e8] sm:$0xff] %v1171_v47  ;;  %v1231_v13 = vld [vmem:[%s1937_s12 + $0x230] sm:$0xff]  ;;  %v1235_v15 = vld [vmem:[%s1937_s12 + $0x240] sm:$0xff] }
 0x16d   : > { %1174 = vst [vmem:[%s2093_s4 + $0x4f0] sm:$0xff] %v1173_v1  ;;  %1176 = vst [vmem:[%s2093_s4 + $0x4f8] sm:$0xff] %v1175_v48  ;;  %v1215_v5 = vld [vmem:[%s1937_s12 + $0x1f0] sm:$0xff]  ;;  %v1237_v16 = vld [vmem:[%s1937_s12 + $0x248] sm:$0xff] }
 0x16e   : > { %1178 = vst [vmem:[%s2093_s4 + $0x500] sm:$0xff] %v1177_v49  ;;  %1180 = vst [vmem:[%s2093_s4 + $0x508] sm:$0xff] %v1179_v50  ;;  %v1217_v6 = vld [vmem:[%s1937_s12 + $0x1f8] sm:$0xff]  ;;  %v1239_v17 = vld [vmem:[%s1937_s12 + $0x250] sm:$0xff] }
 0x16f   : > { %1182 = vst [vmem:[%s2093_s4 + $0x510] sm:$0xff] %v1181_v51  ;;  %1184 = vst [vmem:[%s2093_s4 + $0x518] sm:$0xff] %v1183_v3  ;;  %v1241_v18 = vld [vmem:[%s1937_s12 + $0x258] sm:$0xff]  ;;  %v1245_v21 = vld [vmem:[%s1937_s12 + $0x268] sm:$0xff] }
 0x170   : > { %1186 = vst [vmem:[%s2093_s4 + $0x520] sm:$0xff] %v1185_v52  ;;  %1188 = vst [vmem:[%s2093_s4 + $0x528] sm:$0xff] %v1187_v53  ;;  %v1243_v19 = vld [vmem:[%s1937_s12 + $0x260] sm:$0xff] }
 0x171   : > { %1190 = vst [vmem:[%s2093_s4 + $0x530] sm:$0xff] %v1189_v54  ;;  %1192 = vst [vmem:[%s2093_s4 + $0x538] sm:$0xff] %v1191_v55 }
 0x172   : > { %1194 = vst [vmem:[%s2093_s4 + $0x540] sm:$0xff] %v1193_v56  ;;  %1196 = vst [vmem:[%s2093_s4 + $0x680] sm:$0xff] %v1195_v57 }
 0x173   : > { %1198 = vst [vmem:[%s2093_s4 + $0x688] sm:$0xff] %v1197_v58  ;;  %1200 = vst [vmem:[%s2093_s4 + $0x690] sm:$0xff] %v1199_v59 }
 0x174   : > { %1202 = vst [vmem:[%s2093_s4 + $0x698] sm:$0xff] %v1201_v60  ;;  %1204 = vst [vmem:[%s2093_s4 + $0x6a0] sm:$0xff] %v1203_v20 }
 0x175   : > { %1206 = vst [vmem:[%s2093_s4 + $0x6a8] sm:$0xff] %v1205_v61  ;;  %1208 = vst [vmem:[%s2093_s4 + $0x6b0] sm:$0xff] %v1207_v62 }
 0x176   : > { %1210 = vst [vmem:[%s2093_s4 + $0x6b8] sm:$0xff] %v1209_v63  ;;  %1212 = vst [vmem:[%s2093_s4 + $0x6c0] sm:$0xff] %v1211_v0 }
 0x177   : > { %1214 = vst [vmem:[%s2093_s4 + $0x6c8] sm:$0xff] %v1213_v22  ;;  %1216 = vst [vmem:[%s2093_s4 + $0x6d0] sm:$0xff] %v1215_v5 }
 0x178   : > { %1218 = vst [vmem:[%s2093_s4 + $0x6d8] sm:$0xff] %v1217_v6  ;;  %1220 = vst [vmem:[%s2093_s4 + $0x6e0] sm:$0xff] %v1219_v7 }
 0x179   : > { %1222 = vst [vmem:[%s2093_s4 + $0x820] sm:$0xff] %v1221_v8  ;;  %1224 = vst [vmem:[%s2093_s4 + $0x828] sm:$0xff] %v1223_v9 }
 0x17a   : > { %1226 = vst [vmem:[%s2093_s4 + $0x830] sm:$0xff] %v1225_v10  ;;  %1228 = vst [vmem:[%s2093_s4 + $0x838] sm:$0xff] %v1227_v11 }
 0x17b   : > { %1230 = vst [vmem:[%s2093_s4 + $0x840] sm:$0xff] %v1229_v12  ;;  %1232 = vst [vmem:[%s2093_s4 + $0x848] sm:$0xff] %v1231_v13 }
 0x17c   : > { %1234 = vst [vmem:[%s2093_s4 + $0x850] sm:$0xff] %v1233_v14  ;;  %1236 = vst [vmem:[%s2093_s4 + $0x858] sm:$0xff] %v1235_v15 }
 0x17d   : > { %1238 = vst [vmem:[%s2093_s4 + $0x860] sm:$0xff] %v1237_v16  ;;  %1240 = vst [vmem:[%s2093_s4 + $0x868] sm:$0xff] %v1239_v17 }
 0x17e   : > { %1242 = vst [vmem:[%s2093_s4 + $0x870] sm:$0xff] %v1241_v18  ;;  %1244 = vst [vmem:[%s2093_s4 + $0x878] sm:$0xff] %v1243_v19 }
 0x17f   : > { %1246 = vst [vmem:[%s2093_s4 + $0x880] sm:$0xff] %v1245_v21 }
 0x180 PF: > { %p10_p10 = scmp.ge.s32.totalorder %s1697_s16, 6   ;;  %s2260_s12 = smov %s1651_s13 }
 0x181   : > { %s2261_s13 = smov %s1708_s19  ;;  %s2262_s14 = smov %s1697_s16 }
 0x182   :  { %12 = sbr.rel (!%p10_p10) target bundleno = 2 (0x2), region = 122 }

</bundles_post_ra>
